<compile_context>
chip_gen: v7x
topology: tpu7x:2x2x1
jax: 0.10.0
libtpu: 0.0.40
codegen_flags: <defaults>
</compile_context>

<pallas_src>
import jax
import jax.numpy as jnp
from jax.experimental import pallas as pl
from jax.experimental.pallas import tpu as pltpu


# ----------------------------------------------------------------------------
# Kernels
# ----------------------------------------------------------------------------
def gru_recurrence_kernel(gi_ref, w_hh_ref, b_hn_ref, h_out_ref, h_state):
    """Serial GRU recurrence over one (batch_block, time_block) tile.

    Shapes seen by the kernel (Hp = 128-padded hidden size):
      gi_ref   : (bb, tt, 3*Hp)  input-side gate preactivations, gate order
                                 [r, z, n], r/z hidden biases already folded in
      w_hh_ref : (Hp, 3*Hp)      fused hidden-to-hidden weights (W^T per gate)
      b_hn_ref : (1, Hp) f32     hidden bias of the n gate (stays inside r*( ))
      h_out_ref: (bb, tt, Hp)    hidden state for every timestep of the chunk
      h_state  : (bb, Hp) f32    hidden state carried across time chunks
    """
    # Reset the carried hidden state at the first time chunk of each batch block.
    @pl.when(pl.program_id(1) == 0)
    def _():
        h_state[...] = jnp.zeros_like(h_state)

    bb, Hp = h_state.shape
    tt = gi_ref.shape[1]

    w_hh = w_hh_ref[...]                                     # (Hp, 3*Hp)
    # Hoisted broadcast: JAX does not CSE broadcast_in_dim, so do it once
    # instead of once per unrolled timestep.
    b_hn = jnp.broadcast_to(b_hn_ref[...].astype(jnp.float32), (bb, Hp))

    h = h_state[...]                                         # (bb, Hp) f32
    # Static unroll over the time chunk: only h (bb x Hp f32) is live across
    # steps, so register pressure stays bounded for the tt caps used here.
    # TODO(synk): switch to lax.fori_loop(unroll=8) if bb*tt is pushed far
    # beyond these caps.
    for t in range(tt):
        gi_t = gi_ref[:, t, :].astype(jnp.float32)           # (bb, 3*Hp)
        # ONE fused MXU dot per timestep; gate slices are 128-lane aligned.
        gh = jnp.dot(h.astype(w_hh.dtype), w_hh,
                     preferred_element_type=jnp.float32)     # (bb, 3*Hp) f32
        r = jax.nn.sigmoid(gi_t[:, 0 * Hp:1 * Hp] + gh[:, 0 * Hp:1 * Hp])
        z = jax.nn.sigmoid(gi_t[:, 1 * Hp:2 * Hp] + gh[:, 1 * Hp:2 * Hp])
        n = jnp.tanh(gi_t[:, 2 * Hp:3 * Hp] + r * (gh[:, 2 * Hp:3 * Hp] + b_hn))
        h = (1.0 - z) * n + z * h
        h_out_ref[:, t, :] = h.astype(h_out_ref.dtype)       # lane-dense store

    h_state[...] = h                                         # carry to next chunk


def output_proj_kernel(h_ref, w_ref, b_ref, out_ref):
    """One (tm, tn) tile of logits = h_all @ W_out^T + b_out.

      h_ref  : (tm, Hp)  matmul_dtype
      w_ref  : (Hp, tn)  matmul_dtype
      b_ref  : (1, tn)   f32
      out_ref: (tm, tn)  f32
    """
    out_ref[...] = (jnp.dot(h_ref[...], w_ref[...],
                            preferred_element_type=jnp.float32)
                    + b_ref[...])


# ----------------------------------------------------------------------------
# Tiling / VMEM helpers
# ----------------------------------------------------------------------------
def _round_up(n, m):
    return ((n + m - 1) // m) * m


def _pick_tile(n, cap):
    """Largest divisor of n that is <= cap and a multiple of 8 (or n itself)."""
    for d in range(min(n, cap), 0, -1):
        if n % d == 0 and (d % 8 == 0 or d == n):
            return d
    return n


def _pick_time_block(T, cap=64):
    return _pick_tile(T, cap)


def _pick_batch_block(B, cap=128):
    # bb is a leading (non-vreg) block dim, so any divisor works.  Take the
    # largest (fills MXU rows on the serial critical path) but keep >= 2
    # batch blocks when B >= 16 so the 'parallel' axis can shard onto v7x's
    # second TensorCore.
    eff = min(cap, B if B < 16 else B // 2)
    for d in range(max(eff, 1), 0, -1):
        if B % d == 0:
            return d
    return 1


def _vmem_limit(nbytes_estimate):
    # 2x headroom over the double-buffered working-set estimate, clamped so
    # the same setting stays safe on v7x (64 MiB physical VMEM).
    return int(min(max(2 * nbytes_estimate, 16 << 20), 48 << 20))


# ----------------------------------------------------------------------------
# Wrapper
# ----------------------------------------------------------------------------
def simple_lm_forward(x_tokens, kp, *, time_block=None, batch_block=None,
                      matmul_dtype=jnp.bfloat16):
    """x_tokens: (B, T) int32 token ids.  Returns logits (B, T, V) float32."""
    B, T = x_tokens.shape
    V = kp["embedding"].shape[0]
    Hp = kp["w_hh_p"].shape[0]                 # 128-padded hidden size
    G = kp["w_hh_p"].shape[1]                  # 3 * Hp
    Vp = kp["w_out_p"].shape[1]                # 128-padded vocab size
    dt = matmul_dtype
    dt_bytes = jnp.dtype(dt).itemsize

    tt = time_block if time_block is not None else _pick_time_block(T)
    bb = batch_block if batch_block is not None else _pick_batch_block(B)
    if T % tt != 0 or B % bb != 0:
        raise ValueError("time_block / batch_block must divide T / B")

    # 1) Embedding gather (plain-XLA glue).
    # TODO(synk): fuse into the recurrence via scalar-prefetched token ids.
    embedded = jnp.take(kp["embedding"], x_tokens, axis=0)          # (B, T, E)

    # 2) Hoisted input-side matmul for ALL timesteps at once: one fused,
    #    gate-padded (B, T, 3*Hp) tensor streamed in matmul_dtype (r/z hidden
    #    biases already folded into b_i_p).
    gi = jnp.einsum("bte,eg->btg",
                    embedded.astype(dt), kp["w_ih_p"].astype(dt),
                    preferred_element_type=jnp.float32)
    gi = (gi + kp["b_i_p"]).astype(dt)                               # (B, T, 3*Hp)

    # 3) Serial GRU recurrence.  Grid = (batch blocks 'parallel',
    #    time chunks 'arbitrary' — MUST stay innermost & serial).
    rec_vmem = (2 * bb * tt * G * dt_bytes          # gi, double buffered
                + 2 * Hp * G * dt_bytes             # fused W_hh
                + 2 * Hp * 4                        # b_hn
                + 2 * bb * tt * Hp * dt_bytes       # h_out tile
                + bb * Hp * 4)                      # h_state scratch
    h_all = pl.pallas_call(
        gru_recurrence_kernel,
        out_shape=jax.ShapeDtypeStruct((B, T, Hp), dt),
        grid=(B // bb, T // tt),
        in_specs=[
            pl.BlockSpec((bb, tt, G), lambda b, c: (b, c, 0)),   # gi
            pl.BlockSpec((Hp, G), lambda b, c: (0, 0)),          # W_hh fused
            pl.BlockSpec((1, Hp), lambda b, c: (0, 0)),          # b_hn
        ],
        out_specs=pl.BlockSpec((bb, tt, Hp), lambda b, c: (b, c, 0)),
        scratch_shapes=[pltpu.VMEM((bb, Hp), jnp.float32)],
        compiler_params=pltpu.CompilerParams(
            dimension_semantics=("parallel", "arbitrary"),
            vmem_limit_bytes=_vmem_limit(rec_vmem)),
    )(gi, kp["w_hh_p"].astype(dt), kp["b_hn_p"])

    # 4) Output Linear as a lane-dense tiled GEMM over (B*T, Hp) x (Hp, Vp),
    #    consuming h_all in matmul_dtype directly; slice padding afterwards.
    M = B * T
    tm = _pick_tile(M, 256)
    tn = _pick_tile(Vp, 256)
    h_flat = h_all.reshape(M, Hp)
    proj_vmem = (2 * tm * Hp * dt_bytes + 2 * Hp * tn * dt_bytes
                 + 2 * tn * 4 + 2 * tm * tn * 4)
    logits_p = pl.pallas_call(
        output_proj_kernel,
        out_shape=jax.ShapeDtypeStruct((M, Vp), jnp.float32),
        grid=(M // tm, Vp // tn),
        in_specs=[
            pl.BlockSpec((tm, Hp), lambda i, j: (i, 0)),
            pl.BlockSpec((Hp, tn), lambda i, j: (0, j)),
            pl.BlockSpec((1, tn), lambda i, j: (0, j)),
        ],
        out_specs=pl.BlockSpec((tm, tn), lambda i, j: (i, j)),
        compiler_params=pltpu.CompilerParams(
            dimension_semantics=("parallel", "parallel"),
            vmem_limit_bytes=_vmem_limit(proj_vmem)),
    )(h_flat, kp["w_out_p"].astype(dt), kp["b_out_p"])

    return logits_p.reshape(B, T, Vp)[:, :, :V]


# ----------------------------------------------------------------------------
# Parameter handling (PyTorch layout -> padded kernel layout) and reference
# ----------------------------------------------------------------------------
def init_params(key, vocab_size, embed_size, hidden_size):
    """Parameters in PyTorch nn.GRU / nn.Linear / nn.Embedding layout."""
    ks = jax.random.split(key, 7)
    s = hidden_size ** -0.5
    u = lambda k, shape: jax.random.uniform(k, shape, jnp.float32, -s, s)
    return {
        "embedding.weight": jax.random.normal(ks[0], (vocab_size, embed_size),
                                              jnp.float32),
        "gru.weight_ih_l0": u(ks[1], (3 * hidden_size, embed_size)),  # [r,z,n]
        "gru.weight_hh_l0": u(ks[2], (3 * hidden_size, hidden_size)),
        "gru.bias_ih_l0":   u(ks[3], (3 * hidden_size,)),
        "gru.bias_hh_l0":   u(ks[4], (3 * hidden_size,)),
        "output.weight":    u(ks[5], (vocab_size, hidden_size)),
        "output.bias":      u(ks[6], (vocab_size,)),
    }


def _pad_to(x, axis, size):
    pad = size - x.shape[axis]
    if pad == 0:
        return x
    widths = [(0, 0)] * x.ndim
    widths[axis] = (0, pad)
    return jnp.pad(x, widths)


def prepare_params(tp, lane=128):
    """Split/transpose/zero-pad PyTorch-layout weights into kernel-ready form.

    Zero padding keeps the padded hidden lanes exactly 0 through the GRU
    recurrence, so padded results can simply be sliced off at the end.
    """
    w_ih = tp["gru.weight_ih_l0"]      # (3H, E), PyTorch gate order [r, z, n]
    w_hh = tp["gru.weight_hh_l0"]      # (3H, H)
    b_ih = tp["gru.bias_ih_l0"]        # (3H,)
    b_hh = tp["gru.bias_hh_l0"]        # (3H,)
    H = w_hh.shape[1]
    V = tp["output.weight"].shape[0]
    Hp = _round_up(H, lane)
    Vp = _round_up(V, lane)

    def gate(x, g):
        return x[g * H:(g + 1) * H]

    # Input-side weights: (E, Hp) per gate, fused -> (E, 3*Hp).
    w_ih_p = jnp.concatenate(
        [_pad_to(gate(w_ih, g).T, 1, Hp) for g in range(3)], axis=1)
    # Fold r/z hidden biases (pure additive constants) into the input-side
    # preactivations; b_hh_n must stay inside r * ( . ).
    b_i = [gate(b_ih, 0) + gate(b_hh, 0),
           gate(b_ih, 1) + gate(b_hh, 1),
           gate(b_ih, 2)]
    b_i_p = jnp.concatenate([_pad_to(b, 0, Hp) for b in b_i], axis=0)

    # Hidden-side weights: (Hp, Hp) per gate (zero pad rows & cols), fused
    # along the gate axis -> (Hp, 3*Hp) for a single MXU dot per timestep.
    w_hh_p = jnp.concatenate(
        [_pad_to(_pad_to(gate(w_hh, g).T, 0, Hp), 1, Hp) for g in range(3)],
        axis=1)
    b_hn_p = _pad_to(gate(b_hh, 2), 0, Hp).reshape(1, Hp)

    w_out_p = _pad_to(_pad_to(tp["output.weight"].T, 0, Hp), 1, Vp)   # (Hp, Vp)
    b_out_p = _pad_to(tp["output.bias"], 0, Vp).reshape(1, Vp)        # (1, Vp)

    return {
        "embedding": tp["embedding.weight"],          # (V, E)
        "w_ih_p": w_ih_p, "b_i_p": b_i_p,
        "w_hh_p": w_hh_p, "b_hn_p": b_hn_p,
        "w_out_p": w_out_p, "b_out_p": b_out_p,
    }


def reference_forward(x_tokens, tp):
    """Pure-JAX reference implementing the PyTorch GRU equations exactly."""
    emb = jnp.take(tp["embedding.weight"], x_tokens, axis=0)   # (B, T, E)
    w_ih, w_hh = tp["gru.weight_ih_l0"], tp["gru.weight_hh_l0"]
    b_ih, b_hh = tp["gru.bias_ih_l0"], tp["gru.bias_hh_l0"]
    H = w_hh.shape[1]
    B, T, _ = emb.shape
    h = jnp.zeros((B, H), jnp.float32)
    outs = []
    for t in range(T):
        x_t = emb[:, t, :]
        gi = x_t @ w_ih.T + b_ih
        gh = h @ w_hh.T + b_hh
        i_r, i_z, i_n = gi[:, :H], gi[:, H:2 * H], gi[:, 2 * H:]
        h_r, h_z, h_n = gh[:, :H], gh[:, H:2 * H], gh[:, 2 * H:]
        r = jax.nn.sigmoid(i_r + h_r)
        z = jax.nn.sigmoid(i_z + h_z)
        n = jnp.tanh(i_n + r * h_n)
        h = (1.0 - z) * n + z * h
        outs.append(h)
    gru_out = jnp.stack(outs, axis=1)                          # (B, T, H)
    return gru_out @ tp["output.weight"].T + tp["output.bias"]


# ----------------------------------------------------------------------------
if __name__ == "__main__":
    VOCAB, EMBED, HIDDEN = 32, 64, 64
    B, T = 16, 16          # B=16 -> batch_block=8 (full f32 sublane, 2 blocks)

    key = jax.random.PRNGKey(0)
    k_params, k_tokens = jax.random.split(key)
    torch_params = init_params(k_params, VOCAB, EMBED, HIDDEN)
    kparams = prepare_params(torch_params)
    x = jax.random.randint(k_tokens, (B, T), 0, VOCAB, dtype=jnp.int32)

    ref = reference_forward(x, torch_params)

    # f32 path: time_block=8 -> 2 time chunks (exercises the carried hidden
    # state), default batch_block=8 -> 2 'parallel' batch blocks.
    fwd_f32 = jax.jit(lambda xt, p: simple_lm_forward(
        xt, p, time_block=8, matmul_dtype=jnp.float32))
    logits_f32 = jax.block_until_ready(fwd_f32(x, kparams))
    assert logits_f32.shape == (B, T, VOCAB)
    err_f32 = float(jnp.max(jnp.abs(logits_f32 - ref)))
    assert jnp.allclose(logits_f32, ref, atol=2e-2, rtol=2e-2), err_f32

    # Default bf16 streaming path (weights / gi / h_all in bf16, f32
    # accumulation and gate math): tolerance-checked, not just finiteness.
    fwd_bf16 = jax.jit(lambda xt, p: simple_lm_forward(xt, p))
    logits_bf16 = jax.block_until_ready(fwd_bf16(x, kparams))
    assert logits_bf16.shape == (B, T, VOCAB)
    err_bf16 = float(jnp.max(jnp.abs(logits_bf16 - ref)))
    assert jnp.allclose(logits_bf16, ref, atol=8e-2, rtol=8e-2), err_bf16

    print("KERNEL_OK")
</pallas_src>

<mosaic_0001>
module attributes {stable_mosaic.version = 11 : i64} {
  func.func @output_proj_kernel(%arg0: i32, %arg1: i32, %arg2: memref<256x128xf32, #tpu.memory_space<vmem>>, %arg3: memref<128x128xf32, #tpu.memory_space<vmem>>, %arg4: memref<1x128xf32, #tpu.memory_space<vmem>>, %arg5: memref<256x128xf32, #tpu.memory_space<vmem>>) attributes {dimension_semantics = [#tpu.dimension_semantics<parallel>, #tpu.dimension_semantics<parallel>], iteration_bounds = array<i64: 1, 1>, scalar_prefetch = 0 : i64, scratch_operands = 0 : i64, tpu.core_type = #tpu.core_type<tc>, window_params = [{transform_indices = @transform_0, window_bounds = array<i64: 256, 128>}, {transform_indices = @transform_1, window_bounds = array<i64: 128, 128>}, {transform_indices = @transform_2, window_bounds = array<i64: 1, 128>}, {transform_indices = @transform_3, window_bounds = array<i64: 256, 128>}]} {
    %c0 = arith.constant 0 : index
    %c0_0 = arith.constant 0 : index
    %0 = vector.load %arg2[%c0, %c0_0] : memref<256x128xf32, #tpu.memory_space<vmem>>, vector<256x128xf32>
    %c0_1 = arith.constant 0 : index
    %c0_2 = arith.constant 0 : index
    %1 = vector.load %arg3[%c0_1, %c0_2] : memref<128x128xf32, #tpu.memory_space<vmem>>, vector<128x128xf32>
    %cst = arith.constant dense<0.000000e+00> : vector<256x128xf32>
    %2 = tpu.matmul %0, %1, %cst {dimension_numbers = #tpu.dot_dimension_numbers<[1], [0], [0], [1], [0, 0, 1, 1], [], []>} : vector<256x128xf32>, vector<128x128xf32>, vector<256x128xf32> -> vector<256x128xf32>
    %c0_3 = arith.constant 0 : index
    %c0_4 = arith.constant 0 : index
    %3 = vector.load %arg4[%c0_3, %c0_4] : memref<1x128xf32, #tpu.memory_space<vmem>>, vector<1x128xf32>
    %4 = vector.broadcast %3 : vector<1x128xf32> to vector<256x128xf32>
    %5 = arith.addf %2, %4 : vector<256x128xf32>
    %c0_5 = arith.constant 0 : index
    %c0_6 = arith.constant 0 : index
    %6 = vector.load %arg5[%c0_5, %c0_6] : memref<256x128xf32, #tpu.memory_space<vmem>>, vector<256x128xf32>
    tpu.vector_store %arg5[%c0_5, %c0_6], %5 {strides = array<i32>} : memref<256x128xf32, #tpu.memory_space<vmem>>, vector<256x128xf32>,
    return
  }
  func.func @transform_0(%arg0: i32, %arg1: i32) -> (i32, i32) {
    %c0_i32 = arith.constant 0 : i32
    %c0_i32_0 = arith.constant 0 : i32
    return %arg0, %c0_i32 : i32, i32
  }
  func.func @transform_1(%arg0: i32, %arg1: i32) -> (i32, i32) {
    %c0_i32 = arith.constant 0 : i32
    %c0_i32_0 = arith.constant 0 : i32
    return %c0_i32, %arg1 : i32, i32
  }
  func.func @transform_2(%arg0: i32, %arg1: i32) -> (i32, i32) {
    %c0_i32 = arith.constant 0 : i32
    %c0_i32_0 = arith.constant 0 : i32
    return %c0_i32, %arg1 : i32, i32
  }
  func.func @transform_3(%arg0: i32, %arg1: i32) -> (i32, i32) {
    %c0_i32 = arith.constant 0 : i32
    return %arg0, %arg1 : i32, i32
  }
}

module attributes {stable_mosaic.version = 11 : i64} {
  func.func @gru_recurrence_kernel(%arg0: i32, %arg1: i32, %arg2: memref<8x8x384xf32, #tpu.memory_space<vmem>>, %arg3: memref<128x384xf32, #tpu.memory_space<vmem>>, %arg4: memref<1x128xf32, #tpu.memory_space<vmem>>, %arg5: memref<8x8x128xf32, #tpu.memory_space<vmem>>, %arg6: memref<8x128xf32, #tpu.memory_space<vmem>>) attributes {dimension_semantics = [#tpu.dimension_semantics<parallel>, #tpu.dimension_semantics<arbitrary>], iteration_bounds = array<i64: 2, 2>, scalar_prefetch = 0 : i64, scratch_operands = 1 : i64, tpu.core_type = #tpu.core_type<tc>, window_params = [{transform_indices = @transform_0, window_bounds = array<i64: 8, 8, 384>}, {pipeline_mode = #tpu.pipeline_mode<synchronous>, transform_indices = @transform_1, window_bounds = array<i64: 128, 384>}, {pipeline_mode = #tpu.pipeline_mode<synchronous>, transform_indices = @transform_2, window_bounds = array<i64: 1, 128>}, {transform_indices = @transform_3, window_bounds = array<i64: 8, 8, 128>}]} {
    %c0_i32 = arith.constant 0 : i32
    %0 = arith.cmpi eq, %arg1, %c0_i32 : i32
    %1 = arith.extui %0 : i1 to i32
    %c0_i32_0 = arith.constant 0 : i32
    %2 = arith.cmpi ne, %1, %c0_i32_0 : i32
    scf.if %2 {
      %cst_80 = arith.constant 0.000000e+00 : f32
      %273 = vector.broadcast %cst_80 : f32 to vector<8x128xf32>
      %c0_81 = arith.constant 0 : index
      %c0_82 = arith.constant 0 : index
      %274 = vector.load %arg6[%c0_81, %c0_82] : memref<8x128xf32, #tpu.memory_space<vmem>>, vector<8x128xf32>
      tpu.vector_store %arg6[%c0_81, %c0_82], %273 {strides = array<i32>} : memref<8x128xf32, #tpu.memory_space<vmem>>, vector<8x128xf32>,
    } else {
    }
    %c0 = arith.constant 0 : index
    %c0_1 = arith.constant 0 : index
    %3 = vector.load %arg3[%c0, %c0_1] : memref<128x384xf32, #tpu.memory_space<vmem>>, vector<128x384xf32>
    %c0_2 = arith.constant 0 : index
    %c0_3 = arith.constant 0 : index
    %4 = vector.load %arg4[%c0_2, %c0_3] : memref<1x128xf32, #tpu.memory_space<vmem>>, vector<1x128xf32>
    %5 = vector.shape_cast %4 : vector<1x128xf32> to vector<1x128xf32>
    %6 = vector.broadcast %5 : vector<1x128xf32> to vector<8x128xf32>
    %c0_4 = arith.constant 0 : index
    %c0_5 = arith.constant 0 : index
    %7 = vector.load %arg6[%c0_4, %c0_5] : memref<8x128xf32, #tpu.memory_space<vmem>>, vector<8x128xf32>
    %c0_6 = arith.constant 0 : index
    %c0_7 = arith.constant 0 : index
    %c0_8 = arith.constant 0 : index
    %8 = vector.load %arg2[%c0_6, %c0_7, %c0_8] : memref<8x8x384xf32, #tpu.memory_space<vmem>>, vector<8x1x384xf32>
    %9 = vector.shape_cast %8 : vector<8x1x384xf32> to vector<8x384xf32>
    %cst = arith.constant dense<0.000000e+00> : vector<8x384xf32>
    %10 = tpu.matmul %7, %3, %cst {dimension_numbers = #tpu.dot_dimension_numbers<[1], [0], [0], [1], [0, 0, 1, 1], [], []>} : vector<8x128xf32>, vector<128x384xf32>, vector<8x384xf32> -> vector<8x384xf32>
    %11 = vector.extract_strided_slice %9 {offsets = [0, 0], sizes = [8, 128], strides = [1, 1]} : vector<8x384xf32> to vector<8x128xf32>
    %12 = vector.extract_strided_slice %10 {offsets = [0, 0], sizes = [8, 128], strides = [1, 1]} : vector<8x384xf32> to vector<8x128xf32>
    %13 = arith.addf %11, %12 : vector<8x128xf32>
    %14 = arith.negf %13 : vector<8x128xf32>
    %15 = math.exp %14 : vector<8x128xf32>
    %cst_9 = arith.constant 1.000000e+00 : f32
    %16 = vector.broadcast %cst_9 : f32 to vector<8x128xf32>
    %17 = arith.addf %16, %15 : vector<8x128xf32>
    %18 = arith.divf %16, %17 : vector<8x128xf32>
    %19 = vector.extract_strided_slice %9 {offsets = [0, 128], sizes = [8, 128], strides = [1, 1]} : vector<8x384xf32> to vector<8x128xf32>
    %20 = vector.extract_strided_slice %10 {offsets = [0, 128], sizes = [8, 128], strides = [1, 1]} : vector<8x384xf32> to vector<8x128xf32>
    %21 = arith.addf %19, %20 : vector<8x128xf32>
    %22 = arith.negf %21 : vector<8x128xf32>
    %23 = math.exp %22 : vector<8x128xf32>
    %cst_10 = arith.constant 1.000000e+00 : f32
    %24 = vector.broadcast %cst_10 : f32 to vector<8x128xf32>
    %25 = arith.addf %24, %23 : vector<8x128xf32>
    %26 = arith.divf %24, %25 : vector<8x128xf32>
    %27 = vector.extract_strided_slice %9 {offsets = [0, 256], sizes = [8, 128], strides = [1, 1]} : vector<8x384xf32> to vector<8x128xf32>
    %28 = vector.extract_strided_slice %10 {offsets = [0, 256], sizes = [8, 128], strides = [1, 1]} : vector<8x384xf32> to vector<8x128xf32>
    %29 = arith.addf %28, %6 : vector<8x128xf32>
    %30 = arith.mulf %18, %29 : vector<8x128xf32>
    %31 = arith.addf %27, %30 : vector<8x128xf32>
    %32 = math.tanh %31 : vector<8x128xf32>
    %cst_11 = arith.constant 1.000000e+00 : f32
    %33 = vector.broadcast %cst_11 : f32 to vector<8x128xf32>
    %34 = arith.subf %33, %26 : vector<8x128xf32>
    %35 = arith.mulf %34, %32 : vector<8x128xf32>
    %36 = arith.mulf %26, %7 : vector<8x128xf32>
    %37 = arith.addf %35, %36 : vector<8x128xf32>
    %c0_12 = arith.constant 0 : index
    %c0_13 = arith.constant 0 : index
    %c0_14 = arith.constant 0 : index
    %38 = vector.load %arg5[%c0_12, %c0_13, %c0_14] : memref<8x8x128xf32, #tpu.memory_space<vmem>>, vector<8x1x128xf32>
    %39 = vector.shape_cast %38 : vector<8x1x128xf32> to vector<8x128xf32>
    %40 = vector.shape_cast %37 : vector<8x128xf32> to vector<8x1x128xf32>
    tpu.vector_store %arg5[%c0_12, %c0_13, %c0_14], %40 {strides = array<i32>} : memref<8x8x128xf32, #tpu.memory_space<vmem>>, vector<8x1x128xf32>,
    %c0_15 = arith.constant 0 : index
    %c1 = arith.constant 1 : index
    %c0_16 = arith.constant 0 : index
    %41 = vector.load %arg2[%c0_15, %c1, %c0_16] : memref<8x8x384xf32, #tpu.memory_space<vmem>>, vector<8x1x384xf32>
    %42 = vector.shape_cast %41 : vector<8x1x384xf32> to vector<8x384xf32>
    %cst_17 = arith.constant dense<0.000000e+00> : vector<8x384xf32>
    %43 = tpu.matmul %37, %3, %cst_17 {dimension_numbers = #tpu.dot_dimension_numbers<[1], [0], [0], [1], [0, 0, 1, 1], [], []>} : vector<8x128xf32>, vector<128x384xf32>, vector<8x384xf32> -> vector<8x384xf32>
    %44 = vector.extract_strided_slice %42 {offsets = [0, 0], sizes = [8, 128], strides = [1, 1]} : vector<8x384xf32> to vector<8x128xf32>
    %45 = vector.extract_strided_slice %43 {offsets = [0, 0], sizes = [8, 128], strides = [1, 1]} : vector<8x384xf32> to vector<8x128xf32>
    %46 = arith.addf %44, %45 : vector<8x128xf32>
    %47 = arith.negf %46 : vector<8x128xf32>
    %48 = math.exp %47 : vector<8x128xf32>
    %cst_18 = arith.constant 1.000000e+00 : f32
    %49 = vector.broadcast %cst_18 : f32 to vector<8x128xf32>
    %50 = arith.addf %49, %48 : vector<8x128xf32>
    %51 = arith.divf %49, %50 : vector<8x128xf32>
    %52 = vector.extract_strided_slice %42 {offsets = [0, 128], sizes = [8, 128], strides = [1, 1]} : vector<8x384xf32> to vector<8x128xf32>
    %53 = vector.extract_strided_slice %43 {offsets = [0, 128], sizes = [8, 128], strides = [1, 1]} : vector<8x384xf32> to vector<8x128xf32>
    %54 = arith.addf %52, %53 : vector<8x128xf32>
    %55 = arith.negf %54 : vector<8x128xf32>
    %56 = math.exp %55 : vector<8x128xf32>
    %cst_19 = arith.constant 1.000000e+00 : f32
    %57 = vector.broadcast %cst_19 : f32 to vector<8x128xf32>
    %58 = arith.addf %57, %56 : vector<8x128xf32>
    %59 = arith.divf %57, %58 : vector<8x128xf32>
    %60 = vector.extract_strided_slice %42 {offsets = [0, 256], sizes = [8, 128], strides = [1, 1]} : vector<8x384xf32> to vector<8x128xf32>
    %61 = vector.extract_strided_slice %43 {offsets = [0, 256], sizes = [8, 128], strides = [1, 1]} : vector<8x384xf32> to vector<8x128xf32>
    %62 = arith.addf %61, %6 : vector<8x128xf32>
    %63 = arith.mulf %51, %62 : vector<8x128xf32>
    %64 = arith.addf %60, %63 : vector<8x128xf32>
    %65 = math.tanh %64 : vector<8x128xf32>
    %cst_20 = arith.constant 1.000000e+00 : f32
    %66 = vector.broadcast %cst_20 : f32 to vector<8x128xf32>
    %67 = arith.subf %66, %59 : vector<8x128xf32>
    %68 = arith.mulf %67, %65 : vector<8x128xf32>
    %69 = arith.mulf %59, %37 : vector<8x128xf32>
    %70 = arith.addf %68, %69 : vector<8x128xf32>
    %c0_21 = arith.constant 0 : index
    %c1_22 = arith.constant 1 : index
    %c0_23 = arith.constant 0 : index
    %71 = vector.load %arg5[%c0_21, %c1_22, %c0_23] : memref<8x8x128xf32, #tpu.memory_space<vmem>>, vector<8x1x128xf32>
    %72 = vector.shape_cast %71 : vector<8x1x128xf32> to vector<8x128xf32>
    %73 = vector.shape_cast %70 : vector<8x128xf32> to vector<8x1x128xf32>
    tpu.vector_store %arg5[%c0_21, %c1_22, %c0_23], %73 {strides = array<i32>} : memref<8x8x128xf32, #tpu.memory_space<vmem>>, vector<8x1x128xf32>,
    %c0_24 = arith.constant 0 : index
    %c2 = arith.constant 2 : index
    %c0_25 = arith.constant 0 : index
    %74 = vector.load %arg2[%c0_24, %c2, %c0_25] : memref<8x8x384xf32, #tpu.memory_space<vmem>>, vector<8x1x384xf32>
    %75 = vector.shape_cast %74 : vector<8x1x384xf32> to vector<8x384xf32>
    %cst_26 = arith.constant dense<0.000000e+00> : vector<8x384xf32>
    %76 = tpu.matmul %70, %3, %cst_26 {dimension_numbers = #tpu.dot_dimension_numbers<[1], [0], [0], [1], [0, 0, 1, 1], [], []>} : vector<8x128xf32>, vector<128x384xf32>, vector<8x384xf32> -> vector<8x384xf32>
    %77 = vector.extract_strided_slice %75 {offsets = [0, 0], sizes = [8, 128], strides = [1, 1]} : vector<8x384xf32> to vector<8x128xf32>
    %78 = vector.extract_strided_slice %76 {offsets = [0, 0], sizes = [8, 128], strides = [1, 1]} : vector<8x384xf32> to vector<8x128xf32>
    %79 = arith.addf %77, %78 : vector<8x128xf32>
    %80 = arith.negf %79 : vector<8x128xf32>
    %81 = math.exp %80 : vector<8x128xf32>
    %cst_27 = arith.constant 1.000000e+00 : f32
    %82 = vector.broadcast %cst_27 : f32 to vector<8x128xf32>
    %83 = arith.addf %82, %81 : vector<8x128xf32>
    %84 = arith.divf %82, %83 : vector<8x128xf32>
    %85 = vector.extract_strided_slice %75 {offsets = [0, 128], sizes = [8, 128], strides = [1, 1]} : vector<8x384xf32> to vector<8x128xf32>
    %86 = vector.extract_strided_slice %76 {offsets = [0, 128], sizes = [8, 128], strides = [1, 1]} : vector<8x384xf32> to vector<8x128xf32>
    %87 = arith.addf %85, %86 : vector<8x128xf32>
    %88 = arith.negf %87 : vector<8x128xf32>
    %89 = math.exp %88 : vector<8x128xf32>
    %cst_28 = arith.constant 1.000000e+00 : f32
    %90 = vector.broadcast %cst_28 : f32 to vector<8x128xf32>
    %91 = arith.addf %90, %89 : vector<8x128xf32>
    %92 = arith.divf %90, %91 : vector<8x128xf32>
    %93 = vector.extract_strided_slice %75 {offsets = [0, 256], sizes = [8, 128], strides = [1, 1]} : vector<8x384xf32> to vector<8x128xf32>
    %94 = vector.extract_strided_slice %76 {offsets = [0, 256], sizes = [8, 128], strides = [1, 1]} : vector<8x384xf32> to vector<8x128xf32>
    %95 = arith.addf %94, %6 : vector<8x128xf32>
    %96 = arith.mulf %84, %95 : vector<8x128xf32>
    %97 = arith.addf %93, %96 : vector<8x128xf32>
    %98 = math.tanh %97 : vector<8x128xf32>
    %cst_29 = arith.constant 1.000000e+00 : f32
    %99 = vector.broadcast %cst_29 : f32 to vector<8x128xf32>
    %100 = arith.subf %99, %92 : vector<8x128xf32>
    %101 = arith.mulf %100, %98 : vector<8x128xf32>
    %102 = arith.mulf %92, %70 : vector<8x128xf32>
    %103 = arith.addf %101, %102 : vector<8x128xf32>
    %c0_30 = arith.constant 0 : index
    %c2_31 = arith.constant 2 : index
    %c0_32 = arith.constant 0 : index
    %104 = vector.load %arg5[%c0_30, %c2_31, %c0_32] : memref<8x8x128xf32, #tpu.memory_space<vmem>>, vector<8x1x128xf32>
    %105 = vector.shape_cast %104 : vector<8x1x128xf32> to vector<8x128xf32>
    %106 = vector.shape_cast %103 : vector<8x128xf32> to vector<8x1x128xf32>
    tpu.vector_store %arg5[%c0_30, %c2_31, %c0_32], %106 {strides = array<i32>} : memref<8x8x128xf32, #tpu.memory_space<vmem>>, vector<8x1x128xf32>,
    %c0_33 = arith.constant 0 : index
    %c3 = arith.constant 3 : index
    %c0_34 = arith.constant 0 : index
    %107 = vector.load %arg2[%c0_33, %c3, %c0_34] : memref<8x8x384xf32, #tpu.memory_space<vmem>>, vector<8x1x384xf32>
    %108 = vector.shape_cast %107 : vector<8x1x384xf32> to vector<8x384xf32>
    %cst_35 = arith.constant dense<0.000000e+00> : vector<8x384xf32>
    %109 = tpu.matmul %103, %3, %cst_35 {dimension_numbers = #tpu.dot_dimension_numbers<[1], [0], [0], [1], [0, 0, 1, 1], [], []>} : vector<8x128xf32>, vector<128x384xf32>, vector<8x384xf32> -> vector<8x384xf32>
    %110 = vector.extract_strided_slice %108 {offsets = [0, 0], sizes = [8, 128], strides = [1, 1]} : vector<8x384xf32> to vector<8x128xf32>
    %111 = vector.extract_strided_slice %109 {offsets = [0, 0], sizes = [8, 128], strides = [1, 1]} : vector<8x384xf32> to vector<8x128xf32>
    %112 = arith.addf %110, %111 : vector<8x128xf32>
    %113 = arith.negf %112 : vector<8x128xf32>
    %114 = math.exp %113 : vector<8x128xf32>
    %cst_36 = arith.constant 1.000000e+00 : f32
    %115 = vector.broadcast %cst_36 : f32 to vector<8x128xf32>
    %116 = arith.addf %115, %114 : vector<8x128xf32>
    %117 = arith.divf %115, %116 : vector<8x128xf32>
    %118 = vector.extract_strided_slice %108 {offsets = [0, 128], sizes = [8, 128], strides = [1, 1]} : vector<8x384xf32> to vector<8x128xf32>
    %119 = vector.extract_strided_slice %109 {offsets = [0, 128], sizes = [8, 128], strides = [1, 1]} : vector<8x384xf32> to vector<8x128xf32>
    %120 = arith.addf %118, %119 : vector<8x128xf32>
    %121 = arith.negf %120 : vector<8x128xf32>
    %122 = math.exp %121 : vector<8x128xf32>
    %cst_37 = arith.constant 1.000000e+00 : f32
    %123 = vector.broadcast %cst_37 : f32 to vector<8x128xf32>
    %124 = arith.addf %123, %122 : vector<8x128xf32>
    %125 = arith.divf %123, %124 : vector<8x128xf32>
    %126 = vector.extract_strided_slice %108 {offsets = [0, 256], sizes = [8, 128], strides = [1, 1]} : vector<8x384xf32> to vector<8x128xf32>
    %127 = vector.extract_strided_slice %109 {offsets = [0, 256], sizes = [8, 128], strides = [1, 1]} : vector<8x384xf32> to vector<8x128xf32>
    %128 = arith.addf %127, %6 : vector<8x128xf32>
    %129 = arith.mulf %117, %128 : vector<8x128xf32>
    %130 = arith.addf %126, %129 : vector<8x128xf32>
    %131 = math.tanh %130 : vector<8x128xf32>
    %cst_38 = arith.constant 1.000000e+00 : f32
    %132 = vector.broadcast %cst_38 : f32 to vector<8x128xf32>
    %133 = arith.subf %132, %125 : vector<8x128xf32>
    %134 = arith.mulf %133, %131 : vector<8x128xf32>
    %135 = arith.mulf %125, %103 : vector<8x128xf32>
    %136 = arith.addf %134, %135 : vector<8x128xf32>
    %c0_39 = arith.constant 0 : index
    %c3_40 = arith.constant 3 : index
    %c0_41 = arith.constant 0 : index
    %137 = vector.load %arg5[%c0_39, %c3_40, %c0_41] : memref<8x8x128xf32, #tpu.memory_space<vmem>>, vector<8x1x128xf32>
    %138 = vector.shape_cast %137 : vector<8x1x128xf32> to vector<8x128xf32>
    %139 = vector.shape_cast %136 : vector<8x128xf32> to vector<8x1x128xf32>
    tpu.vector_store %arg5[%c0_39, %c3_40, %c0_41], %139 {strides = array<i32>} : memref<8x8x128xf32, #tpu.memory_space<vmem>>, vector<8x1x128xf32>,
    %c0_42 = arith.constant 0 : index
    %c4 = arith.constant 4 : index
    %c0_43 = arith.constant 0 : index
    %140 = vector.load %arg2[%c0_42, %c4, %c0_43] : memref<8x8x384xf32, #tpu.memory_space<vmem>>, vector<8x1x384xf32>
    %141 = vector.shape_cast %140 : vector<8x1x384xf32> to vector<8x384xf32>
    %cst_44 = arith.constant dense<0.000000e+00> : vector<8x384xf32>
    %142 = tpu.matmul %136, %3, %cst_44 {dimension_numbers = #tpu.dot_dimension_numbers<[1], [0], [0], [1], [0, 0, 1, 1], [], []>} : vector<8x128xf32>, vector<128x384xf32>, vector<8x384xf32> -> vector<8x384xf32>
    %143 = vector.extract_strided_slice %141 {offsets = [0, 0], sizes = [8, 128], strides = [1, 1]} : vector<8x384xf32> to vector<8x128xf32>
    %144 = vector.extract_strided_slice %142 {offsets = [0, 0], sizes = [8, 128], strides = [1, 1]} : vector<8x384xf32> to vector<8x128xf32>
    %145 = arith.addf %143, %144 : vector<8x128xf32>
    %146 = arith.negf %145 : vector<8x128xf32>
    %147 = math.exp %146 : vector<8x128xf32>
    %cst_45 = arith.constant 1.000000e+00 : f32
    %148 = vector.broadcast %cst_45 : f32 to vector<8x128xf32>
    %149 = arith.addf %148, %147 : vector<8x128xf32>
    %150 = arith.divf %148, %149 : vector<8x128xf32>
    %151 = vector.extract_strided_slice %141 {offsets = [0, 128], sizes = [8, 128], strides = [1, 1]} : vector<8x384xf32> to vector<8x128xf32>
    %152 = vector.extract_strided_slice %142 {offsets = [0, 128], sizes = [8, 128], strides = [1, 1]} : vector<8x384xf32> to vector<8x128xf32>
    %153 = arith.addf %151, %152 : vector<8x128xf32>
    %154 = arith.negf %153 : vector<8x128xf32>
    %155 = math.exp %154 : vector<8x128xf32>
    %cst_46 = arith.constant 1.000000e+00 : f32
    %156 = vector.broadcast %cst_46 : f32 to vector<8x128xf32>
    %157 = arith.addf %156, %155 : vector<8x128xf32>
    %158 = arith.divf %156, %157 : vector<8x128xf32>
    %159 = vector.extract_strided_slice %141 {offsets = [0, 256], sizes = [8, 128], strides = [1, 1]} : vector<8x384xf32> to vector<8x128xf32>
    %160 = vector.extract_strided_slice %142 {offsets = [0, 256], sizes = [8, 128], strides = [1, 1]} : vector<8x384xf32> to vector<8x128xf32>
    %161 = arith.addf %160, %6 : vector<8x128xf32>
    %162 = arith.mulf %150, %161 : vector<8x128xf32>
    %163 = arith.addf %159, %162 : vector<8x128xf32>
    %164 = math.tanh %163 : vector<8x128xf32>
    %cst_47 = arith.constant 1.000000e+00 : f32
    %165 = vector.broadcast %cst_47 : f32 to vector<8x128xf32>
    %166 = arith.subf %165, %158 : vector<8x128xf32>
    %167 = arith.mulf %166, %164 : vector<8x128xf32>
    %168 = arith.mulf %158, %136 : vector<8x128xf32>
    %169 = arith.addf %167, %168 : vector<8x128xf32>
    %c0_48 = arith.constant 0 : index
    %c4_49 = arith.constant 4 : index
    %c0_50 = arith.constant 0 : index
    %170 = vector.load %arg5[%c0_48, %c4_49, %c0_50] : memref<8x8x128xf32, #tpu.memory_space<vmem>>, vector<8x1x128xf32>
    %171 = vector.shape_cast %170 : vector<8x1x128xf32> to vector<8x128xf32>
    %172 = vector.shape_cast %169 : vector<8x128xf32> to vector<8x1x128xf32>
    tpu.vector_store %arg5[%c0_48, %c4_49, %c0_50], %172 {strides = array<i32>} : memref<8x8x128xf32, #tpu.memory_space<vmem>>, vector<8x1x128xf32>,
    %c0_51 = arith.constant 0 : index
    %c5 = arith.constant 5 : index
    %c0_52 = arith.constant 0 : index
    %173 = vector.load %arg2[%c0_51, %c5, %c0_52] : memref<8x8x384xf32, #tpu.memory_space<vmem>>, vector<8x1x384xf32>
    %174 = vector.shape_cast %173 : vector<8x1x384xf32> to vector<8x384xf32>
    %cst_53 = arith.constant dense<0.000000e+00> : vector<8x384xf32>
    %175 = tpu.matmul %169, %3, %cst_53 {dimension_numbers = #tpu.dot_dimension_numbers<[1], [0], [0], [1], [0, 0, 1, 1], [], []>} : vector<8x128xf32>, vector<128x384xf32>, vector<8x384xf32> -> vector<8x384xf32>
    %176 = vector.extract_strided_slice %174 {offsets = [0, 0], sizes = [8, 128], strides = [1, 1]} : vector<8x384xf32> to vector<8x128xf32>
    %177 = vector.extract_strided_slice %175 {offsets = [0, 0], sizes = [8, 128], strides = [1, 1]} : vector<8x384xf32> to vector<8x128xf32>
    %178 = arith.addf %176, %177 : vector<8x128xf32>
    %179 = arith.negf %178 : vector<8x128xf32>
    %180 = math.exp %179 : vector<8x128xf32>
    %cst_54 = arith.constant 1.000000e+00 : f32
    %181 = vector.broadcast %cst_54 : f32 to vector<8x128xf32>
    %182 = arith.addf %181, %180 : vector<8x128xf32>
    %183 = arith.divf %181, %182 : vector<8x128xf32>
    %184 = vector.extract_strided_slice %174 {offsets = [0, 128], sizes = [8, 128], strides = [1, 1]} : vector<8x384xf32> to vector<8x128xf32>
    %185 = vector.extract_strided_slice %175 {offsets = [0, 128], sizes = [8, 128], strides = [1, 1]} : vector<8x384xf32> to vector<8x128xf32>
    %186 = arith.addf %184, %185 : vector<8x128xf32>
    %187 = arith.negf %186 : vector<8x128xf32>
    %188 = math.exp %187 : vector<8x128xf32>
    %cst_55 = arith.constant 1.000000e+00 : f32
    %189 = vector.broadcast %cst_55 : f32 to vector<8x128xf32>
    %190 = arith.addf %189, %188 : vector<8x128xf32>
    %191 = arith.divf %189, %190 : vector<8x128xf32>
    %192 = vector.extract_strided_slice %174 {offsets = [0, 256], sizes = [8, 128], strides = [1, 1]} : vector<8x384xf32> to vector<8x128xf32>
    %193 = vector.extract_strided_slice %175 {offsets = [0, 256], sizes = [8, 128], strides = [1, 1]} : vector<8x384xf32> to vector<8x128xf32>
    %194 = arith.addf %193, %6 : vector<8x128xf32>
    %195 = arith.mulf %183, %194 : vector<8x128xf32>
    %196 = arith.addf %192, %195 : vector<8x128xf32>
    %197 = math.tanh %196 : vector<8x128xf32>
    %cst_56 = arith.constant 1.000000e+00 : f32
    %198 = vector.broadcast %cst_56 : f32 to vector<8x128xf32>
    %199 = arith.subf %198, %191 : vector<8x128xf32>
    %200 = arith.mulf %199, %197 : vector<8x128xf32>
    %201 = arith.mulf %191, %169 : vector<8x128xf32>
    %202 = arith.addf %200, %201 : vector<8x128xf32>
    %c0_57 = arith.constant 0 : index
    %c5_58 = arith.constant 5 : index
    %c0_59 = arith.constant 0 : index
    %203 = vector.load %arg5[%c0_57, %c5_58, %c0_59] : memref<8x8x128xf32, #tpu.memory_space<vmem>>, vector<8x1x128xf32>
    %204 = vector.shape_cast %203 : vector<8x1x128xf32> to vector<8x128xf32>
    %205 = vector.shape_cast %202 : vector<8x128xf32> to vector<8x1x128xf32>
    tpu.vector_store %arg5[%c0_57, %c5_58, %c0_59], %205 {strides = array<i32>} : memref<8x8x128xf32, #tpu.memory_space<vmem>>, vector<8x1x128xf32>,
    %c0_60 = arith.constant 0 : index
    %c6 = arith.constant 6 : index
    %c0_61 = arith.constant 0 : index
    %206 = vector.load %arg2[%c0_60, %c6, %c0_61] : memref<8x8x384xf32, #tpu.memory_space<vmem>>, vector<8x1x384xf32>
    %207 = vector.shape_cast %206 : vector<8x1x384xf32> to vector<8x384xf32>
    %cst_62 = arith.constant dense<0.000000e+00> : vector<8x384xf32>
    %208 = tpu.matmul %202, %3, %cst_62 {dimension_numbers = #tpu.dot_dimension_numbers<[1], [0], [0], [1], [0, 0, 1, 1], [], []>} : vector<8x128xf32>, vector<128x384xf32>, vector<8x384xf32> -> vector<8x384xf32>
    %209 = vector.extract_strided_slice %207 {offsets = [0, 0], sizes = [8, 128], strides = [1, 1]} : vector<8x384xf32> to vector<8x128xf32>
    %210 = vector.extract_strided_slice %208 {offsets = [0, 0], sizes = [8, 128], strides = [1, 1]} : vector<8x384xf32> to vector<8x128xf32>
    %211 = arith.addf %209, %210 : vector<8x128xf32>
    %212 = arith.negf %211 : vector<8x128xf32>
    %213 = math.exp %212 : vector<8x128xf32>
    %cst_63 = arith.constant 1.000000e+00 : f32
    %214 = vector.broadcast %cst_63 : f32 to vector<8x128xf32>
    %215 = arith.addf %214, %213 : vector<8x128xf32>
    %216 = arith.divf %214, %215 : vector<8x128xf32>
    %217 = vector.extract_strided_slice %207 {offsets = [0, 128], sizes = [8, 128], strides = [1, 1]} : vector<8x384xf32> to vector<8x128xf32>
    %218 = vector.extract_strided_slice %208 {offsets = [0, 128], sizes = [8, 128], strides = [1, 1]} : vector<8x384xf32> to vector<8x128xf32>
    %219 = arith.addf %217, %218 : vector<8x128xf32>
    %220 = arith.negf %219 : vector<8x128xf32>
    %221 = math.exp %220 : vector<8x128xf32>
    %cst_64 = arith.constant 1.000000e+00 : f32
    %222 = vector.broadcast %cst_64 : f32 to vector<8x128xf32>
    %223 = arith.addf %222, %221 : vector<8x128xf32>
    %224 = arith.divf %222, %223 : vector<8x128xf32>
    %225 = vector.extract_strided_slice %207 {offsets = [0, 256], sizes = [8, 128], strides = [1, 1]} : vector<8x384xf32> to vector<8x128xf32>
    %226 = vector.extract_strided_slice %208 {offsets = [0, 256], sizes = [8, 128], strides = [1, 1]} : vector<8x384xf32> to vector<8x128xf32>
    %227 = arith.addf %226, %6 : vector<8x128xf32>
    %228 = arith.mulf %216, %227 : vector<8x128xf32>
    %229 = arith.addf %225, %228 : vector<8x128xf32>
    %230 = math.tanh %229 : vector<8x128xf32>
    %cst_65 = arith.constant 1.000000e+00 : f32
    %231 = vector.broadcast %cst_65 : f32 to vector<8x128xf32>
    %232 = arith.subf %231, %224 : vector<8x128xf32>
    %233 = arith.mulf %232, %230 : vector<8x128xf32>
    %234 = arith.mulf %224, %202 : vector<8x128xf32>
    %235 = arith.addf %233, %234 : vector<8x128xf32>
    %c0_66 = arith.constant 0 : index
    %c6_67 = arith.constant 6 : index
    %c0_68 = arith.constant 0 : index
    %236 = vector.load %arg5[%c0_66, %c6_67, %c0_68] : memref<8x8x128xf32, #tpu.memory_space<vmem>>, vector<8x1x128xf32>
    %237 = vector.shape_cast %236 : vector<8x1x128xf32> to vector<8x128xf32>
    %238 = vector.shape_cast %235 : vector<8x128xf32> to vector<8x1x128xf32>
    tpu.vector_store %arg5[%c0_66, %c6_67, %c0_68], %238 {strides = array<i32>} : memref<8x8x128xf32, #tpu.memory_space<vmem>>, vector<8x1x128xf32>,
    %c0_69 = arith.constant 0 : index
    %c7 = arith.constant 7 : index
    %c0_70 = arith.constant 0 : index
    %239 = vector.load %arg2[%c0_69, %c7, %c0_70] : memref<8x8x384xf32, #tpu.memory_space<vmem>>, vector<8x1x384xf32>
    %240 = vector.shape_cast %239 : vector<8x1x384xf32> to vector<8x384xf32>
    %cst_71 = arith.constant dense<0.000000e+00> : vector<8x384xf32>
    %241 = tpu.matmul %235, %3, %cst_71 {dimension_numbers = #tpu.dot_dimension_numbers<[1], [0], [0], [1], [0, 0, 1, 1], [], []>} : vector<8x128xf32>, vector<128x384xf32>, vector<8x384xf32> -> vector<8x384xf32>
    %242 = vector.extract_strided_slice %240 {offsets = [0, 0], sizes = [8, 128], strides = [1, 1]} : vector<8x384xf32> to vector<8x128xf32>
    %243 = vector.extract_strided_slice %241 {offsets = [0, 0], sizes = [8, 128], strides = [1, 1]} : vector<8x384xf32> to vector<8x128xf32>
    %244 = arith.addf %242, %243 : vector<8x128xf32>
    %245 = arith.negf %244 : vector<8x128xf32>
    %246 = math.exp %245 : vector<8x128xf32>
    %cst_72 = arith.constant 1.000000e+00 : f32
    %247 = vector.broadcast %cst_72 : f32 to vector<8x128xf32>
    %248 = arith.addf %247, %246 : vector<8x128xf32>
    %249 = arith.divf %247, %248 : vector<8x128xf32>
    %250 = vector.extract_strided_slice %240 {offsets = [0, 128], sizes = [8, 128], strides = [1, 1]} : vector<8x384xf32> to vector<8x128xf32>
    %251 = vector.extract_strided_slice %241 {offsets = [0, 128], sizes = [8, 128], strides = [1, 1]} : vector<8x384xf32> to vector<8x128xf32>
    %252 = arith.addf %250, %251 : vector<8x128xf32>
    %253 = arith.negf %252 : vector<8x128xf32>
    %254 = math.exp %253 : vector<8x128xf32>
    %cst_73 = arith.constant 1.000000e+00 : f32
    %255 = vector.broadcast %cst_73 : f32 to vector<8x128xf32>
    %256 = arith.addf %255, %254 : vector<8x128xf32>
    %257 = arith.divf %255, %256 : vector<8x128xf32>
    %258 = vector.extract_strided_slice %240 {offsets = [0, 256], sizes = [8, 128], strides = [1, 1]} : vector<8x384xf32> to vector<8x128xf32>
    %259 = vector.extract_strided_slice %241 {offsets = [0, 256], sizes = [8, 128], strides = [1, 1]} : vector<8x384xf32> to vector<8x128xf32>
    %260 = arith.addf %259, %6 : vector<8x128xf32>
    %261 = arith.mulf %249, %260 : vector<8x128xf32>
    %262 = arith.addf %258, %261 : vector<8x128xf32>
    %263 = math.tanh %262 : vector<8x128xf32>
    %cst_74 = arith.constant 1.000000e+00 : f32
    %264 = vector.broadcast %cst_74 : f32 to vector<8x128xf32>
    %265 = arith.subf %264, %257 : vector<8x128xf32>
    %266 = arith.mulf %265, %263 : vector<8x128xf32>
    %267 = arith.mulf %257, %235 : vector<8x128xf32>
    %268 = arith.addf %266, %267 : vector<8x128xf32>
    %c0_75 = arith.constant 0 : index
    %c7_76 = arith.constant 7 : index
    %c0_77 = arith.constant 0 : index
    %269 = vector.load %arg5[%c0_75, %c7_76, %c0_77] : memref<8x8x128xf32, #tpu.memory_space<vmem>>, vector<8x1x128xf32>
    %270 = vector.shape_cast %269 : vector<8x1x128xf32> to vector<8x128xf32>
    %271 = vector.shape_cast %268 : vector<8x128xf32> to vector<8x1x128xf32>
    tpu.vector_store %arg5[%c0_75, %c7_76, %c0_77], %271 {strides = array<i32>} : memref<8x8x128xf32, #tpu.memory_space<vmem>>, vector<8x1x128xf32>,
    %c0_78 = arith.constant 0 : index
    %c0_79 = arith.constant 0 : index
    %272 = vector.load %arg6[%c0_78, %c0_79] : memref<8x128xf32, #tpu.memory_space<vmem>>, vector<8x128xf32>
    tpu.vector_store %arg6[%c0_78, %c0_79], %268 {strides = array<i32>} : memref<8x128xf32, #tpu.memory_space<vmem>>, vector<8x128xf32>,
    return
  }
  func.func @transform_0(%arg0: i32, %arg1: i32) -> (i32, i32, i32) {
    %c0_i32 = arith.constant 0 : i32
    %c0_i32_0 = arith.constant 0 : i32
    return %arg0, %arg1, %c0_i32 : i32, i32, i32
  }
  func.func @transform_1(%arg0: i32, %arg1: i32) -> (i32, i32) {
    %c0_i32 = arith.constant 0 : i32
    %c0_i32_0 = arith.constant 0 : i32
    %c0_i32_1 = arith.constant 0 : i32
    return %c0_i32, %c0_i32_0 : i32, i32
  }
  func.func @transform_2(%arg0: i32, %arg1: i32) -> (i32, i32) {
    %c0_i32 = arith.constant 0 : i32
    %c0_i32_0 = arith.constant 0 : i32
    %c0_i32_1 = arith.constant 0 : i32
    return %c0_i32, %c0_i32_0 : i32, i32
  }
  func.func @transform_3(%arg0: i32, %arg1: i32) -> (i32, i32, i32) {
    %c0_i32 = arith.constant 0 : i32
    %c0_i32_0 = arith.constant 0 : i32
    return %arg0, %arg1, %c0_i32 : i32, i32, i32
  }
}

</mosaic_0001>

<bundles_post_ra>
// kernel: _lambda_.3
= control target key start
LH: loop header
LB: loop body
LE: loop exit
PB: predicated region body
PF: predicated region fallthrough
CT: control target
= control target key end

     0   :  { %s763_s0 = inlined_call_operand.vmem [shape: f32[256,128], index: 0, kind: input, shape index: {}]   ;;  %s764_s1 = inlined_call_operand.vmem [shape: f32[128,128], index: 1, kind: input, shape index: {}]   ;;  %s765_s2 = inlined_call_operand.vmem [shape: f32[1,128], index: 2, kind: input, shape index: {}]   ;;  %s766_s3 = inlined_call_operand.hbm [shape: f32[256,128], index: 3, kind: output, shape index: {}]  }
   0x1   :  { %v47_v0 = vld [vmem:[%s764_s1] sm:$0xff]  ;;  %v48_v1 = vld [vmem:[%s764_s1 + $0x8] sm:$0xff]  ;;  %v49_v2 = vld [vmem:[%s764_s1 + $0x10] sm:$0xff] }
   0x2   :  { %v472_v3 = vpack.c.bf16 %v48_v1, %v47_v0  ;;  %v50_v4 = vld [vmem:[%s764_s1 + $0x18] sm:$0xff]  ;;  %v51_v6 = vld [vmem:[%s764_s1 + $0x20] sm:$0xff]  ;;  %v52_v7 = vld [vmem:[%s764_s1 + $0x28] sm:$0xff] }
   0x3   :  { %v476_v5 = vpack.c.bf16 %v50_v4, %v49_v2  ;;  %v480_v8 = vpack.c.bf16 %v52_v7, %v51_v6  ;;  %v15_v9 = vld [vmem:[%s763_s0] sm:$0xff]  ;;  %v53_v11 = vld [vmem:[%s764_s1 + $0x30] sm:$0xff]  ;;  %v54_v12 = vld [vmem:[%s764_s1 + $0x38] sm:$0xff] }
   0x4   :  { %473 = vmatprep.subr.bf16.mxu0 %v472_v3  ;;  %504 = vmatprep.subr.bf16.mxu1 %v472_v3  ;;  %v31_v10 = vld [vmem:[%s763_s0 + $0x80] sm:$0xff]  ;;  %v484_v13 = vpack.c.bf16 %v54_v12, %v53_v11  ;;  %v56_v15 = vld [vmem:[%s764_s1 + $0x48] sm:$0xff]  ;;  %v57_v17 = vld [vmem:[%s764_s1 + $0x50] sm:$0xff] }
   0x5   :  { %475 = vmatpush3.bf16.msra.mxu0 %v472_v3  ;;  %512 = vmatpush3.bf16.msra.mxu1 %v472_v3  ;;  %v55_v14 = vld [vmem:[%s764_s1 + $0x40] sm:$0xff]  ;;  %v58_v18 = vld [vmem:[%s764_s1 + $0x58] sm:$0xff] }
   0x6   :  { %477 = vmatprep.subr.bf16.mxu0 %v476_v5  ;;  %505 = vmatprep.subr.bf16.mxu1 %v476_v5  ;;  %v488_v16 = vpack.c.bf16 %v56_v15, %v55_v14 }
   0x7   :  { %424 = vmatprep.mubr.f32.mxu0 %v15_v9  ;;  %448 = vmatprep.mubr.f32.mxu1 %v31_v10 }
   0x9   :  { %479 = vmatpush3.bf16.msra.mxu0 %v476_v5  ;;  %513 = vmatpush3.bf16.msra.mxu1 %v476_v5 }
   0xa   :  { %481 = vmatprep.subr.bf16.mxu0 %v480_v8  ;;  %506 = vmatprep.subr.bf16.mxu1 %v480_v8 }
   0xd   :  { %483 = vmatpush3.bf16.msra.mxu0 %v480_v8  ;;  %514 = vmatpush3.bf16.msra.mxu1 %v480_v8 }
   0xe   :  { %485 = vmatprep.subr.bf16.mxu0 %v484_v13  ;;  %507 = vmatprep.subr.bf16.mxu1 %v484_v13 }
  0x11   :  { %487 = vmatpush3.bf16.msra.mxu0 %v484_v13  ;;  %515 = vmatpush3.bf16.msra.mxu1 %v484_v13 }
  0x12   :  { %8 = vsyncpa [#allocation3], 0  ;;  %489 = vmatprep.subr.bf16.mxu0 %v488_v16  ;;  %508 = vmatprep.subr.bf16.mxu1 %v488_v16  ;;  %v492_v19 = vpack.c.bf16 %v58_v18, %v57_v17  ;;  %v59_v20 = vld [vmem:[%s764_s1 + $0x60] sm:$0xff]  ;;  %v60_v21 = vld [vmem:[%s764_s1 + $0x68] sm:$0xff] }
  0x13   :  { %v496_v22 = vpack.c.bf16 %v60_v21, %v59_v20  ;;  %v61_v23 = vld [vmem:[%s764_s1 + $0x70] sm:$0xff]  ;;  %v62_v24 = vld [vmem:[%s764_s1 + $0x78] sm:$0xff]  ;;  %v16_v26 = vld [vmem:[%s763_s0 + $0x8] sm:$0xff] }
  0x14   :  { %v500_v25 = vpack.c.bf16 %v62_v24, %v61_v23  ;;  %v32_v27 = vld [vmem:[%s763_s0 + $0x88] sm:$0xff]  ;;  %v17_v28 = vld [vmem:[%s763_s0 + $0x10] sm:$0xff]  ;;  %v18_v30 = vld [vmem:[%s763_s0 + $0x18] sm:$0xff] }
  0x15   :  { %491 = vmatpush3.bf16.msra.mxu0 %v488_v16  ;;  %516 = vmatpush3.bf16.msra.mxu1 %v488_v16  ;;  %v33_v29 = vld [vmem:[%s763_s0 + $0x90] sm:$0xff]  ;;  %v34_v31 = vld [vmem:[%s763_s0 + $0x98] sm:$0xff]  ;;  %v19_v32 = vld [vmem:[%s763_s0 + $0x20] sm:$0xff] }
  0x16   :  { %493 = vmatprep.subr.bf16.mxu0 %v492_v19  ;;  %509 = vmatprep.subr.bf16.mxu1 %v492_v19  ;;  %v35_v33 = vld [vmem:[%s763_s0 + $0xa0] sm:$0xff]  ;;  %v20_v34 = vld [vmem:[%s763_s0 + $0x28] sm:$0xff]  ;;  %v21_v36 = vld [vmem:[%s763_s0 + $0x30] sm:$0xff] }
  0x17   :  { %v36_v35 = vld [vmem:[%s763_s0 + $0xa8] sm:$0xff]  ;;  %v37_v37 = vld [vmem:[%s763_s0 + $0xb0] sm:$0xff]  ;;  %v22_v38 = vld [vmem:[%s763_s0 + $0x38] sm:$0xff] }
  0x18   :  { %v38_v39 = vld [vmem:[%s763_s0 + $0xb8] sm:$0xff]  ;;  %v23_v40 = vld [vmem:[%s763_s0 + $0x40] sm:$0xff]  ;;  %v24_v42 = vld [vmem:[%s763_s0 + $0x48] sm:$0xff] }
  0x19   :  { %495 = vmatpush3.bf16.msra.mxu0 %v492_v19  ;;  %517 = vmatpush3.bf16.msra.mxu1 %v492_v19  ;;  %v39_v41 = vld [vmem:[%s763_s0 + $0xc0] sm:$0xff]  ;;  %v40_v43 = vld [vmem:[%s763_s0 + $0xc8] sm:$0xff]  ;;  %v25_v44 = vld [vmem:[%s763_s0 + $0x50] sm:$0xff] }
  0x1a   :  { %497 = vmatprep.subr.bf16.mxu0 %v496_v22  ;;  %510 = vmatprep.subr.bf16.mxu1 %v496_v22  ;;  %v41_v45 = vld [vmem:[%s763_s0 + $0xd0] sm:$0xff]  ;;  %v26_v46 = vld [vmem:[%s763_s0 + $0x58] sm:$0xff]  ;;  %v27_v48 = vld [vmem:[%s763_s0 + $0x60] sm:$0xff] }
  0x1b   :  { %v42_v47 = vld [vmem:[%s763_s0 + $0xd8] sm:$0xff]  ;;  %v43_v49 = vld [vmem:[%s763_s0 + $0xe0] sm:$0xff]  ;;  %v28_v50 = vld [vmem:[%s763_s0 + $0x68] sm:$0xff] }
  0x1c   :  { %v44_v51 = vld [vmem:[%s763_s0 + $0xe8] sm:$0xff]  ;;  %v29_v52 = vld [vmem:[%s763_s0 + $0x70] sm:$0xff]  ;;  %v30_v54 = vld [vmem:[%s763_s0 + $0x78] sm:$0xff] }
  0x1d   :  { %499 = vmatpush3.bf16.msra.mxu0 %v496_v22  ;;  %518 = vmatpush3.bf16.msra.mxu1 %v496_v22  ;;  %v45_v53 = vld [vmem:[%s763_s0 + $0xf0] sm:$0xff]  ;;  %v46_v55 = vld [vmem:[%s763_s0 + $0xf8] sm:$0xff]  ;;  %v717_v56 = vld [vmem:[%s765_s2] ss:$0 sm:$0xff]  ;;  %s547_s0 = smov [#allocation2]  }
  0x1e   :  { %501 = vmatprep.subr.bf16.mxu0 %v500_v25  ;;  %511 = vmatprep.subr.bf16.mxu1 %v500_v25  ;;  %s332_s2 = sshll.u32 %s547_s0, 4  ;;  %s333_s2 = int_to_ptr.vmem [resolvable:$true] %s332_s2 }
  0x1f   :  { %s523_s26 = scalar_lea.vmem %s333_s2, 4096  ;;  %p528_p1 = scmp.lt.s32.totalorder %s333_s2, %s333_s2 }
  0x20   :  { %p524_p0 = scmp.ne.s32.totalorder %s333_s2, %s523_s26  ;;  %p529_p2 = scmp.lt.s32.totalorder %s523_s26, %s523_s26 }
  0x21   :  { %503 = vmatpush3.bf16.msra.mxu0 %v500_v25  ;;  %519 = vmatpush3.bf16.msra.mxu1 %v500_v25 }
  0x22   :  { %p530_p3 = por %p529_p2, %p528_p1 }
  0x24   :  { %425 = vmatmul.mubr.f32.vlgmr.msra.gmra.mrb[0].mxu0 %v16_v26  ;;  %449 = vmatmul.mubr.f32.vlgmr.msra.gmra.mrb[0].mxu1 %v32_v27  ;;  %p531_p4 = pnand %p530_p3, %p524_p0 }
  0x25   :  { %427 = vmatprep.mubr.f32.mxu0 %v17_v28  ;;  %451 = vmatprep.mubr.f32.mxu1 %v33_v29 }
  0x28   :  { %428 = vmatmul.mubr.f32.gmra.mrb[2].mxu0 %v18_v30  ;;  %452 = vmatmul.mubr.f32.gmra.mrb[2].mxu1 %v34_v31 }
  0x29   :  { %430 = vmatprep.mubr.f32.mxu0 %v19_v32  ;;  %454 = vmatprep.mubr.f32.mxu1 %v35_v33 }
  0x2c   :  { %431 = vmatmul.mubr.f32.gmra.mrb[4].mxu0 %v20_v34  ;;  %455 = vmatmul.mubr.f32.gmra.mrb[4].mxu1 %v36_v35 }
  0x2d   :  { %433 = vmatprep.mubr.f32.mxu0 %v21_v36  ;;  %457 = vmatprep.mubr.f32.mxu1 %v37_v37 }
  0x30   :  { %434 = vmatmul.mubr.f32.gmra.mrb[6].mxu0 %v22_v38  ;;  %458 = vmatmul.mubr.f32.gmra.mrb[6].mxu1 %v38_v39 }
  0x31   :  { %436 = vmatprep.mubr.f32.mxu0 %v23_v40  ;;  %460 = vmatprep.mubr.f32.mxu1 %v39_v41 }
  0x34   :  { %437 = vmatmul.mubr.f32.gmra.mrb[8].mxu0 %v24_v42  ;;  %461 = vmatmul.mubr.f32.gmra.mrb[8].mxu1 %v40_v43 }
  0x35   :  { %439 = vmatprep.mubr.f32.mxu0 %v25_v44  ;;  %463 = vmatprep.mubr.f32.mxu1 %v41_v45 }
  0x38   :  { %440 = vmatmul.mubr.f32.gmra.mrb[10].mxu0 %v26_v46  ;;  %464 = vmatmul.mubr.f32.gmra.mrb[10].mxu1 %v42_v47 }
  0x39   :  { %442 = vmatprep.mubr.f32.mxu0 %v27_v48  ;;  %466 = vmatprep.mubr.f32.mxu1 %v43_v49 }
  0x3c   :  { %443 = vmatmul.mubr.f32.gmra.mrb[12].mxu0 %v28_v50  ;;  %467 = vmatmul.mubr.f32.gmra.mrb[12].mxu1 %v44_v51 }
  0x3d   :  { %445 = vmatprep.mubr.f32.mxu0 %v29_v52  ;;  %469 = vmatprep.mubr.f32.mxu1 %v45_v53 }
  0x40   :  { %446 = vmatmul.mubr.f32.gmra.mrb[14].mxu0 %v30_v54  ;;  %470 = vmatmul.mubr.f32.gmra.mrb[14].mxu1 %v46_v55 }
  0xf7   :  { %v426_v57 = vpop.f32.mrb[0].mxu0  ;;  %v450_v58 = vpop.f32.mrb[0].mxu1 }
  0xf8   :  { %v142_v59 = vadd.f32 %v426_v57, %v717_v56  ;;  %v222_v60 = vadd.f32 %v450_v58, %v717_v56  ;;  %v136_v61 = vpop.f32.mrb[1].mxu0  ;;  %v216_v62 = vpop.f32.mrb[1].mxu1 }
  0xf9   :  { %v137_v63 = vadd.f32 %v717_v56, %v136_v61  ;;  %v217_v0 = vadd.f32 %v717_v56, %v216_v62 }
  0xfa   :  { %296 = vst [vmem:[#allocation2 + $0x8] sm:$0xff] %v142_v59  ;;  %312 = vst [vmem:[#allocation2 + $0x88] sm:$0xff] %v222_v60 }
  0xfb   :  { %295 = vst [vmem:[#allocation2] sm:$0xff] %v137_v63  ;;  %311 = vst [vmem:[#allocation2 + $0x80] sm:$0xff] %v217_v0  ;;  %v429_v1 = vpop.f32.mrb[2].mxu0  ;;  %v453_v2 = vpop.f32.mrb[2].mxu1 }
  0xfc   :  { %v152_v3 = vadd.f32 %v429_v1, %v717_v56  ;;  %v232_v4 = vadd.f32 %v453_v2, %v717_v56  ;;  %v146_v5 = vpop.f32.mrb[3].mxu0  ;;  %v226_v6 = vpop.f32.mrb[3].mxu1 }
  0xfd   :  { %v147_v7 = vadd.f32 %v717_v56, %v146_v5  ;;  %v227_v8 = vadd.f32 %v717_v56, %v226_v6 }
  0xfe   :  { %298 = vst [vmem:[#allocation2 + $0x18] sm:$0xff] %v152_v3  ;;  %314 = vst [vmem:[#allocation2 + $0x98] sm:$0xff] %v232_v4 }
  0xff   :  { %297 = vst [vmem:[#allocation2 + $0x10] sm:$0xff] %v147_v7  ;;  %313 = vst [vmem:[#allocation2 + $0x90] sm:$0xff] %v227_v8  ;;  %v432_v9 = vpop.f32.mrb[4].mxu0  ;;  %v456_v10 = vpop.f32.mrb[4].mxu1 }
 0x100   :  { %v162_v11 = vadd.f32 %v432_v9, %v717_v56  ;;  %v242_v12 = vadd.f32 %v456_v10, %v717_v56  ;;  %v156_v13 = vpop.f32.mrb[5].mxu0  ;;  %v236_v14 = vpop.f32.mrb[5].mxu1 }
 0x101   :  { %v157_v15 = vadd.f32 %v717_v56, %v156_v13  ;;  %v237_v16 = vadd.f32 %v717_v56, %v236_v14 }
 0x102   :  { %300 = vst [vmem:[#allocation2 + $0x28] sm:$0xff] %v162_v11  ;;  %316 = vst [vmem:[#allocation2 + $0xa8] sm:$0xff] %v242_v12 }
 0x103   :  { %299 = vst [vmem:[#allocation2 + $0x20] sm:$0xff] %v157_v15  ;;  %315 = vst [vmem:[#allocation2 + $0xa0] sm:$0xff] %v237_v16  ;;  %v435_v17 = vpop.f32.mrb[6].mxu0  ;;  %v459_v18 = vpop.f32.mrb[6].mxu1 }
 0x104   :  { %v172_v19 = vadd.f32 %v435_v17, %v717_v56  ;;  %v252_v20 = vadd.f32 %v459_v18, %v717_v56  ;;  %v166_v21 = vpop.f32.mrb[7].mxu0  ;;  %v246_v22 = vpop.f32.mrb[7].mxu1 }
 0x105   :  { %v167_v23 = vadd.f32 %v717_v56, %v166_v21  ;;  %v247_v24 = vadd.f32 %v717_v56, %v246_v22 }
 0x106   :  { %302 = vst [vmem:[#allocation2 + $0x38] sm:$0xff] %v172_v19  ;;  %318 = vst [vmem:[#allocation2 + $0xb8] sm:$0xff] %v252_v20 }
 0x107   :  { %301 = vst [vmem:[#allocation2 + $0x30] sm:$0xff] %v167_v23  ;;  %317 = vst [vmem:[#allocation2 + $0xb0] sm:$0xff] %v247_v24  ;;  %v438_v25 = vpop.f32.mrb[8].mxu0  ;;  %v462_v26 = vpop.f32.mrb[8].mxu1 }
 0x108   :  { %v182_v27 = vadd.f32 %v438_v25, %v717_v56  ;;  %v262_v28 = vadd.f32 %v462_v26, %v717_v56  ;;  %v176_v29 = vpop.f32.mrb[9].mxu0  ;;  %v256_v30 = vpop.f32.mrb[9].mxu1 }
 0x109   :  { %v177_v31 = vadd.f32 %v717_v56, %v176_v29  ;;  %v257_v32 = vadd.f32 %v717_v56, %v256_v30 }
 0x10a   :  { %304 = vst [vmem:[#allocation2 + $0x48] sm:$0xff] %v182_v27  ;;  %320 = vst [vmem:[#allocation2 + $0xc8] sm:$0xff] %v262_v28 }
 0x10b   :  { %303 = vst [vmem:[#allocation2 + $0x40] sm:$0xff] %v177_v31  ;;  %319 = vst [vmem:[#allocation2 + $0xc0] sm:$0xff] %v257_v32  ;;  %v441_v33 = vpop.f32.mrb[10].mxu0  ;;  %v465_v34 = vpop.f32.mrb[10].mxu1 }
 0x10c   :  { %v192_v35 = vadd.f32 %v441_v33, %v717_v56  ;;  %v272_v36 = vadd.f32 %v465_v34, %v717_v56  ;;  %v186_v37 = vpop.f32.mrb[11].mxu0  ;;  %v266_v38 = vpop.f32.mrb[11].mxu1 }
 0x10d   :  { %v187_v39 = vadd.f32 %v717_v56, %v186_v37  ;;  %v267_v40 = vadd.f32 %v717_v56, %v266_v38 }
 0x10e   :  { %306 = vst [vmem:[#allocation2 + $0x58] sm:$0xff] %v192_v35  ;;  %322 = vst [vmem:[#allocation2 + $0xd8] sm:$0xff] %v272_v36 }
 0x10f   :  { %305 = vst [vmem:[#allocation2 + $0x50] sm:$0xff] %v187_v39  ;;  %321 = vst [vmem:[#allocation2 + $0xd0] sm:$0xff] %v267_v40  ;;  %v444_v41 = vpop.f32.mrb[12].mxu0  ;;  %v468_v42 = vpop.f32.mrb[12].mxu1 }
 0x110   :  { %v202_v43 = vadd.f32 %v444_v41, %v717_v56  ;;  %v282_v44 = vadd.f32 %v468_v42, %v717_v56  ;;  %v196_v45 = vpop.f32.mrb[13].mxu0  ;;  %v276_v46 = vpop.f32.mrb[13].mxu1 }
 0x111   :  { %v197_v47 = vadd.f32 %v717_v56, %v196_v45  ;;  %v277_v48 = vadd.f32 %v717_v56, %v276_v46 }
 0x112   :  { %308 = vst [vmem:[#allocation2 + $0x68] sm:$0xff] %v202_v43  ;;  %324 = vst [vmem:[#allocation2 + $0xe8] sm:$0xff] %v282_v44 }
 0x113   :  { %307 = vst [vmem:[#allocation2 + $0x60] sm:$0xff] %v197_v47  ;;  %323 = vst [vmem:[#allocation2 + $0xe0] sm:$0xff] %v277_v48  ;;  %v447_v49 = vpop.f32.mrb[14].mxu0  ;;  %v471_v50 = vpop.f32.mrb[14].mxu1 }
 0x114   :  { %v212_v51 = vadd.f32 %v447_v49, %v717_v56  ;;  %v292_v52 = vadd.f32 %v471_v50, %v717_v56  ;;  %v206_v53 = vpop.f32.mrb[15].mxu0  ;;  %v286_v54 = vpop.f32.mrb[15].mxu1 }
 0x115   :  { %v207_v55 = vadd.f32 %v717_v56, %v206_v53  ;;  %v287_v57 = vadd.f32 %v717_v56, %v286_v54 }
 0x116   :  { %310 = vst [vmem:[#allocation2 + $0x78] sm:$0xff] %v212_v51  ;;  %326 = vst [vmem:[#allocation2 + $0xf8] sm:$0xff] %v292_v52 }
 0x117   :  { %309 = vst [vmem:[#allocation2 + $0x70] sm:$0xff] %v207_v55  ;;  %325 = vst [vmem:[#allocation2 + $0xf0] sm:$0xff] %v287_v57 }
 0x118   :  { %534 = shalt.err (!%p531_p4)
}
 0x119   :  { %s535_s29 = scalar_lea.hbm %s766_s3, 4096 }
 0x11a   :  { %p536_p5 = scmp.ne.s32.totalorder %s766_s3, %s535_s29  ;;  %p539_p6 = scmp.lt.u32.totalorder %s535_s29, %s766_s3 }
 0x11c   :  { %p541_p7 = pnand %p539_p6, %p536_p5 }
 0x11e   :  { %544 = shalt.err (!%p541_p7)
}
 0x11f   :  { %s548_s7 = smov 128   ;;  %s549_s8 = smov 8  }
 0x120   :  { %338 = dma.vmem_to_hbm [thread:$0]  %s333_s2, 4096, %s766_s3, [#allocation3], %s548_s7, %s548_s7, %s549_s8  }
 0x121   :  { %545 = dma.done.wait [#allocation3], 4096  }
 0x122   :  { %546 = vsyncadd [#allocation3], 4294963200 }
 0x123   :  { %342 = vsyncpa [#allocation3], 1 }

// kernel: _lambda_.2
= control target key start
LH: loop header
LB: loop body
LE: loop exit
PB: predicated region body
PF: predicated region fallthrough
CT: control target
= control target key end

     0   :  { %s7227_s12 = smov 0   ;;  %s7229_s13 = smov 0   ;;  %s8823_s0 = inlined_call_operand.vmem [shape: f32[16,16,384], index: 0, kind: input, shape index: {}]   ;;  %s8824_s1 = inlined_call_operand.vmem [shape: f32[128,384], index: 1, kind: input, shape index: {}]   ;;  %s8825_s2 = inlined_call_operand.vmem [shape: f32[1,128], index: 2, kind: input, shape index: {}]   ;;  %s8826_s3 = inlined_call_operand.vmem [shape: f32[16,16,128], index: 3, kind: output, shape index: {}]  }
   0x1   :  { %s7231_s14 = smov 0   ;;  %s7233_s15 = smov 0  }
   0x2   :  { %s7235_s16 = smov 0   ;;  %s7237_s17 = smov 0  }
   0x3   :  { %s7239_s18 = smov 0  }
   0x4 LB: > { %s22_s19 = sadd.s32 1, %s7192_s16  ;;  %s25_s20 = sadd.s32 1, %s7196_s17  ;;  %s7200_s18 = sphi %s7239_s18, %s13_s18   ;;  %s7196_s17 = sphi %s7237_s17, %s8934_s17   ;;  %s7192_s16 = sphi %s7235_s16, %s8933_s16   ;;  %s7188_s15 = sphi %s7233_s15, %s8932_s15   ;;  %s7184_s14 = sphi %s7231_s14, %s8931_s14   ;;  %s7180_s13 = sphi %s7229_s13, %s8930_s13   ;;  %s7176_s12 = sphi %s7227_s12, %s8929_s12  }
   0x5   : > { %p23_p0 = scmp.ge.s32.totalorder %s22_s19, 2  ;;  %s5364_s21 = sadd.s32 4294967295, %s7200_s18  }
   0x6   : > { %p41_p1 = scmp.ne.s32.totalorder %s7180_s13, %s7176_s12  ;;  %p42_p2 = scmp.eq.s32.totalorder %s7200_s18, 0 }
   0x7   : > { %s8936_s19 = smov (%p23_p0, %s22_s19), 0  ;;  %s8938_s20 = smov (!%p23_p0, %s25_s20), %s7196_s17 }
   0x8   : > { %p27_p3 = scmp.ge.s32.totalorder %s8938_s20, 2  ;;  %p115_p4 = scmp.eq.s32.totalorder %s5364_s21, 3 }
   0x9   : > { %s30_s22 = ssub.s32 %s7192_s16, %s8936_s19  ;;  %p43_p5 = por %p42_p2, %p41_p1 }
   0xa   : > { %s8940_s20 = smov (%p27_p3, %s8938_s20), 0  ;;  %p7275_p6 = por %p115_p4, %p41_p1 }
   0xb   : > { %s29_s24 = ssub.s32 %s7196_s17, %s8940_s20  ;;  %s34_s26 = sadd.s32 1, %s7180_s13 }
   0xc   : > { %s31_s25 = sor.u32 %s30_s22, %s29_s24  ;;  %p5367_p8 = scmp.ge.s32.totalorder %s7200_s18, 4 }
   0xd   : > { %p32_p7 = scmp.eq.s32.totalorder %s31_s25, 0 }
   0xe   : > { %143 = sbr.rel (%p5367_p8) target bundleno = 42 (0x2a), region = 24 }
   0xf   : > { %s7283_s27 = scalar_select %p32_p7, %s7180_s13, %s34_s26  }
  0x15   : > { %146 = sbr.rel (!%p43_p5) target bundleno = 42 (0x2a), region = 28  ;;  %s148_s28 = sand.u32 (%p43_p5), 1, %s7180_s13  }
  0x16   : > { %s6438_s29 = smul.u32 (%p43_p5), 3, %s7192_s16 }
  0x17   : > { %s6437_s30 = smul.u32 (%p43_p5), 192, %s148_s28 }
  0x18   : > { %s6439_s4 = smul.u32 (%p43_p5), 48, %s7196_s17 }
  0x19   : > { %s7297_s10 = scalar_lea.vmem (%p43_p5), [#allocation3], %s6437_s30 }
  0x1a   : > { %s154_s5 = sadd.s32 (%p43_p5), %s6439_s4, %s6438_s29 }
  0x1b   : > { %s5370_s6 = sshll.u32 (%p43_p5), %s154_s5, 3 }
  0x1c   : > { %s7292_s9 = scalar_lea.vmem %s8823_s0, %s5370_s6 }
  0x1d   : > { %v169_v0 = vld [vmem:[%s7292_s9] sm:$0xff]  ;;  %v171_v1 = vld [vmem:[%s7292_s9 + $0x8] sm:$0xff]  ;;  %v173_v2 = vld [vmem:[%s7292_s9 + $0x10] sm:$0xff] }
  0x1e   : > { %170 = vst [vmem:[%s7297_s10] sm:$0xff] %v169_v0  ;;  %172 = vst [vmem:[%s7297_s10 + $0x8] sm:$0xff] %v171_v1  ;;  %v175_v3 = vld [vmem:[%s7292_s9 + $0x30] sm:$0xff]  ;;  %v177_v4 = vld [vmem:[%s7292_s9 + $0x38] sm:$0xff] }
  0x1f   : > { %174 = vst [vmem:[%s7297_s10 + $0x10] sm:$0xff] %v173_v2  ;;  %v179_v5 = vld [vmem:[%s7292_s9 + $0x40] sm:$0xff]  ;;  %176 = vst [vmem:[%s7297_s10 + $0x18] sm:$0xff] %v175_v3  ;;  %v183_v7 = vld [vmem:[%s7292_s9 + $0x68] sm:$0xff] }
  0x20   : > { %178 = vst [vmem:[%s7297_s10 + $0x20] sm:$0xff] %v177_v4  ;;  %180 = vst [vmem:[%s7297_s10 + $0x28] sm:$0xff] %v179_v5  ;;  %v181_v6 = vld [vmem:[%s7292_s9 + $0x60] sm:$0xff]  ;;  %v185_v8 = vld [vmem:[%s7292_s9 + $0x70] sm:$0xff] }
  0x21   : > { %182 = vst [vmem:[%s7297_s10 + $0x30] sm:$0xff] %v181_v6  ;;  %184 = vst [vmem:[%s7297_s10 + $0x38] sm:$0xff] %v183_v7  ;;  %v187_v9 = vld [vmem:[%s7292_s9 + $0x90] sm:$0xff]  ;;  %v189_v10 = vld [vmem:[%s7292_s9 + $0x98] sm:$0xff] }
  0x22   : > { %186 = vst [vmem:[%s7297_s10 + $0x40] sm:$0xff] %v185_v8  ;;  %v191_v11 = vld [vmem:[%s7292_s9 + $0xa0] sm:$0xff]  ;;  %188 = vst [vmem:[%s7297_s10 + $0x48] sm:$0xff] %v187_v9  ;;  %v195_v13 = vld [vmem:[%s7292_s9 + $0xc8] sm:$0xff] }
  0x23   : > { %190 = vst [vmem:[%s7297_s10 + $0x50] sm:$0xff] %v189_v10  ;;  %192 = vst [vmem:[%s7297_s10 + $0x58] sm:$0xff] %v191_v11  ;;  %v193_v12 = vld [vmem:[%s7292_s9 + $0xc0] sm:$0xff]  ;;  %v197_v14 = vld [vmem:[%s7292_s9 + $0xd0] sm:$0xff] }
  0x24   : > { %194 = vst [vmem:[%s7297_s10 + $0x60] sm:$0xff] %v193_v12  ;;  %196 = vst [vmem:[%s7297_s10 + $0x68] sm:$0xff] %v195_v13  ;;  %v199_v15 = vld [vmem:[%s7292_s9 + $0xf0] sm:$0xff]  ;;  %v201_v16 = vld [vmem:[%s7292_s9 + $0xf8] sm:$0xff] }
  0x25   : > { %198 = vst [vmem:[%s7297_s10 + $0x70] sm:$0xff] %v197_v14  ;;  %v203_v17 = vld [vmem:[%s7292_s9 + $0x100] sm:$0xff]  ;;  %200 = vst [vmem:[%s7297_s10 + $0x78] sm:$0xff] %v199_v15  ;;  %v207_v19 = vld [vmem:[%s7292_s9 + $0x128] sm:$0xff] }
  0x26   : > { %202 = vst [vmem:[%s7297_s10 + $0x80] sm:$0xff] %v201_v16  ;;  %204 = vst [vmem:[%s7297_s10 + $0x88] sm:$0xff] %v203_v17  ;;  %v205_v18 = vld [vmem:[%s7292_s9 + $0x120] sm:$0xff]  ;;  %v209_v20 = vld [vmem:[%s7292_s9 + $0x130] sm:$0xff] }
  0x27   : > { %206 = vst [vmem:[%s7297_s10 + $0x90] sm:$0xff] %v205_v18  ;;  %208 = vst [vmem:[%s7297_s10 + $0x98] sm:$0xff] %v207_v19  ;;  %v211_v21 = vld [vmem:[%s7292_s9 + $0x150] sm:$0xff]  ;;  %v213_v22 = vld [vmem:[%s7292_s9 + $0x158] sm:$0xff] }
  0x28   : > { %210 = vst [vmem:[%s7297_s10 + $0xa0] sm:$0xff] %v209_v20  ;;  %v215_v23 = vld [vmem:[%s7292_s9 + $0x160] sm:$0xff]  ;;  %212 = vst [vmem:[%s7297_s10 + $0xa8] sm:$0xff] %v211_v21 }
  0x29   : > { %214 = vst [vmem:[%s7297_s10 + $0xb0] sm:$0xff] %v213_v22  ;;  %216 = vst [vmem:[%s7297_s10 + $0xb8] sm:$0xff] %v215_v23 }
  0x2a PF: > { %p5371_p9 = scmp.ge.s32.totalorder %s7200_s18, 1  ;;  %p221_p10 = scmp.lt.s32.totalorder %s7200_s18, 5 }
  0x2c   : > { %p222_p11 = pnand %p5371_p9, %p221_p10 }
  0x2e   : > { %225 = sbr.rel (%p222_p11) target bundleno = 2421 (0x975), region = 51 }
  0x35   : > { %s228_s11 = sand.u32 1, %s7176_s12   ;;  %p5373_p12 = scmp.ne.s32.totalorder %s7184_s14, 0 }
  0x36   : > { %s6440_s21 = smul.u32 192, %s228_s11  ;;  %s5372_s22 = sshll.u32 %s228_s11, 6  ;;  %v7202_v24 = vmov (!%p5373_p12), 0.0  }
  0x37   : > { %s7349_s25 = scalar_lea.vmem [#allocation4], %s5372_s22  ;;  %255 = sbr.rel (%p5373_p12) target bundleno = 62 (0x3e), region = 59  ;;  %256 = vst [vmem:[#allocation2] sm:$0xff] (!%p5373_p12), %v7202_v24 }
  0x38   : > { %s7347_s24 = scalar_lea.vmem [#allocation3], %s6440_s21 }
  0x3e PF: > { %v258_v25 = vld [vmem:[%s8824_s1 + $0x8] sm:$0xff]  ;;  %v261_v26 = vld [vmem:[%s8824_s1 + $0x20] sm:$0xff]  ;;  %v260_v29 = vld [vmem:[%s8824_s1 + $0x18] sm:$0xff]  ;;  %v8829_v32 = vmov 0.0|0.0   ;;  %v8827_v33 = vmov 0.0   ;;  %vm7205_vm0 = vmmov 0  }
  0x3f   : > { %v257_v27 = vld [vmem:[%s8824_s1] sm:$0xff]  ;;  %v7361_v28 = vpack.c.bf16 %v261_v26, %v258_v25  ;;  %v264_v30 = vld [vmem:[%s8824_s1 + $0x38] sm:$0xff]  ;;  %v267_v31 = vld [vmem:[%s8824_s1 + $0x50] sm:$0xff]  ;;  %6021 = vmatprep.subr.bf16.mxu1 %v8829_v32  ;;  %392 = vmatprep.mubr.f32.mxu0 %v8827_v33 }
  0x40   : > { %v7374_v34 = vpack.c.bf16 %v260_v29, %v257_v27  ;;  %v7376_v35 = vpack.c.bf16 %v267_v31, %v264_v30  ;;  %v263_v36 = vld [vmem:[%s8824_s1 + $0x30] sm:$0xff]  ;;  %v266_v37 = vld [vmem:[%s8824_s1 + $0x48] sm:$0xff]  ;;  %5741 = vmatprep.mubr.msk.f32.mxu1 %vm7205_vm0, %v8827_v33  ;;  %v273_v39 = vld [vmem:[%s8824_s1 + $0x80] sm:$0xff] }
  0x41   : > { %8856 = vst [vmem:[#allocation5_spill] sm:$0xff] %v7361_v28  ;;  %v270_v38 = vld [vmem:[%s8824_s1 + $0x68] sm:$0xff]  ;;  %5990 = vmatprep.subr.bf16.mxu0 %v7361_v28  ;;  %v7394_v40 = vpack.c.bf16 %v266_v37, %v263_v36  ;;  %v269_v42 = vld [vmem:[%s8824_s1 + $0x60] sm:$0xff]  ;;  %v272_v43 = vld [vmem:[%s8824_s1 + $0x78] sm:$0xff] }
  0x42   : > { %5992 = vmatpush1.bf16.msra.mxu0 %v7374_v34  ;;  %v7397_v41 = vpack.c.bf16 %v273_v39, %v270_v38  ;;  %v276_v44 = vld [vmem:[%s8824_s1 + $0x98] sm:$0xff]  ;;  %v279_v45 = vld [vmem:[%s8824_s1 + $0xb0] sm:$0xff]  ;;  %v7412_v46 = vpack.c.bf16 %v272_v43, %v269_v42  ;;  %v278_v49 = vld [vmem:[%s8824_s1 + $0xa8] sm:$0xff]  ;;  %v7206_v43 = vmov 1966171168  }
  0x43   : > { %5994 = vmatprep.subr.bf16.mxu0 %v7376_v35  ;;  %v275_v47 = vld [vmem:[%s8824_s1 + $0x90] sm:$0xff]  ;;  %v7418_v48 = vpack.c.bf16 %v279_v45, %v276_v44  ;;  %v262_v51 = vld [vmem:[%s8824_s1 + $0x28] sm:$0xff]  ;;  %v285_v53 = vld [vmem:[%s8824_s1 + $0xe0] sm:$0xff]  ;;  %v472_v44 = vunpack.c.l.s4 %v7206_v43  ;;  %v474_v45 = vlaneseq }
  0x44   : > { %v259_v50 = vld [vmem:[%s8824_s1 + $0x10] sm:$0xff]  ;;  %v282_v52 = vld [vmem:[%s8824_s1 + $0xc8] sm:$0xff]  ;;  %v265_v55 = vld [vmem:[%s8824_s1 + $0x40] sm:$0xff]  ;;  %v7444_v57 = vpack.c.bf16 %v278_v49, %v275_v47 }
  0x45   : > { %v7435_v54 = vpack.c.bf16 %v262_v51, %v259_v50  ;;  %v268_v56 = vld [vmem:[%s8824_s1 + $0x58] sm:$0xff]  ;;  %v281_v58 = vld [vmem:[%s8824_s1 + $0xc0] sm:$0xff]  ;;  %v7453_v60 = vpack.c.bf16 %v285_v53, %v282_v52  ;;  %v271_v62 = vld [vmem:[%s8824_s1 + $0x70] sm:$0xff]  ;;  %v473_v47 = vunpack.c.0.s8 %v472_v44  ;;  %v475_v49 = vshrl.u32 %v474_v45, 7 }
  0x46   : > { %5996 = vmatpush1.bf16.msra.mxu0 %v7394_v40  ;;  %v7450_v59 = vpack.c.bf16 %v268_v56, %v265_v55  ;;  %v284_v61 = vld [vmem:[%s8824_s1 + $0xd8] sm:$0xff]  ;;  %v274_v63 = vld [vmem:[%s8824_s1 + $0x88] sm:$0xff]  ;;  %v291_v1 = vld [vmem:[%s8824_s1 + $0x110] sm:$0xff] }
  0x47   : > { %5998 = vmatprep.subr.bf16.mxu0 %v7397_v41  ;;  %6023 = vmatpush3.bf16.msra.mxu1 %v7435_v54  ;;  %v288_v0 = vld [vmem:[%s8824_s1 + $0xf8] sm:$0xff]  ;;  %v7472_v2 = vpack.c.bf16 %v284_v61, %v281_v58  ;;  %v287_v3 = vld [vmem:[%s8824_s1 + $0xf0] sm:$0xff]  ;;  %v7478_v4 = vpack.c.bf16 %v274_v63, %v271_v62  ;;  %v290_v6 = vld [vmem:[%s8824_s1 + $0x108] sm:$0xff]  ;;  %v7620_v50 = vsub.s32 %v473_v47, %v475_v49 }
  0x48   : > { %6024 = vmatprep.subr.bf16.mxu1 %v8829_v32  ;;  %v7481_v5 = vpack.c.bf16 %v291_v1, %v288_v0  ;;  %v277_v7 = vld [vmem:[%s8824_s1 + $0xa0] sm:$0xff]  ;;  %v280_v8 = vld [vmem:[%s8824_s1 + $0xb8] sm:$0xff]  ;;  %v294_v9 = vld [vmem:[%s8824_s1 + $0x128] sm:$0xff]  ;;  %v7500_v11 = vpack.c.bf16 %v290_v6, %v287_v3 }
  0x49   : > { %v297_v10 = vld [vmem:[%s8824_s1 + $0x140] sm:$0xff]  ;;  %v7506_v13 = vpack.c.bf16 %v280_v8, %v277_v7  ;;  %v296_v15 = vld [vmem:[%s8824_s1 + $0x138] sm:$0xff]  ;;  %v283_v16 = vld [vmem:[%s8824_s1 + $0xd0] sm:$0xff] }
  0x4a   : > { %6000 = vmatpush1.bf16.msra.mxu0 %v7412_v46  ;;  %8857 = vst [vmem:[#allocation6_spill] sm:$0xff] %v7481_v5  ;;  %8858 = vst [vmem:[#allocation7_spill] sm:$0xff] %v7500_v11  ;;  %v293_v12 = vld [vmem:[%s8824_s1 + $0x120] sm:$0xff]  ;;  %v7509_v14 = vpack.c.bf16 %v297_v10, %v294_v9  ;;  %v286_v17 = vld [vmem:[%s8824_s1 + $0xe8] sm:$0xff] }
  0x4b   : > { %6002 = vmatprep.subr.bf16.mxu0 %v7418_v48  ;;  %6026 = vmatpush3.bf16.msra.mxu1 %v7450_v59  ;;  %v300_v18 = vld [vmem:[%s8824_s1 + $0x158] sm:$0xff]  ;;  %v303_v19 = vld [vmem:[%s8824_s1 + $0x170] sm:$0xff]  ;;  %v7528_v20 = vpack.c.bf16 %v296_v15, %v293_v12  ;;  %v7534_v22 = vpack.c.bf16 %v286_v17, %v283_v16  ;;  %v302_v24 = vld [vmem:[%s8824_s1 + $0x168] sm:$0xff] }
  0x4c   : > { %6027 = vmatprep.subr.bf16.mxu1 %v8829_v32  ;;  %8859 = vst [vmem:[#allocation8_spill] sm:$0xff] %v7509_v14  ;;  %v299_v21 = vld [vmem:[%s8824_s1 + $0x150] sm:$0xff]  ;;  %v7537_v23 = vpack.c.bf16 %v303_v19, %v300_v18  ;;  %v289_v25 = vld [vmem:[%s8824_s1 + $0x100] sm:$0xff]  ;;  %v292_v26 = vld [vmem:[%s8824_s1 + $0x118] sm:$0xff] }
  0x4d   : > { %8860 = vst [vmem:[#allocation9_spill] sm:$0xff] %v7528_v20  ;;  %8861 = vst [vmem:[#allocation10_spill] sm:$0xff] %v7534_v22  ;;  %v7550_v27 = vpack.c.bf16 %v302_v24, %v299_v21  ;;  %v7553_v29 = vpack.c.bf16 %v292_v26, %v289_v25  ;;  %v295_v30 = vld [vmem:[%s8824_s1 + $0x130] sm:$0xff]  ;;  %v298_v31 = vld [vmem:[%s8824_s1 + $0x148] sm:$0xff] }
  0x4e   : > { %6004 = vmatpush1.bf16.msra.mxu0 %v7444_v57  ;;  %8862 = vst [vmem:[#allocation11_spill] sm:$0xff] %v7537_v23  ;;  %v7564_v36 = vld [vmem:[#allocation2] sm:$0xff]  ;;  %v7567_v37 = vpack.c.bf16 %v298_v31, %v295_v30  ;;  %v304_v39 = vld [vmem:[%s8824_s1 + $0x178] sm:$0xff] }
  0x4f   : > { %6006 = vmatprep.subr.bf16.mxu0 %v7453_v60  ;;  %6029 = vmatpush3.bf16.msra.mxu1 %v7478_v4  ;;  %8863 = vst [vmem:[#allocation12_spill] sm:$0xff] %v7550_v27  ;;  %8864 = vst [vmem:[#allocation13_spill] sm:$0xff] %v7553_v29  ;;  %v301_v38 = vld [vmem:[%s8824_s1 + $0x160] sm:$0xff]  ;;  %v7623_v51 = vld [vmem:[%s7347_s24] ss:$8 sm:$0x7] }
  0x50   : > { %6030 = vmatprep.subr.bf16.mxu1 %v8829_v32  ;;  %8865 = vst [vmem:[#allocation14_spill] sm:$0xff] %v7567_v37  ;;  %v7579_v42 = vpack.c.bf16 %v304_v39, %v301_v38  ;;  %v7626_v52 = vld [vmem:[%s7347_s24 + $0x18] ss:$8 sm:$0x7]  ;;  %v591_v8 = vrot.slane %v7623_v51, 1 }
  0x51   : > { %v7629_v53 = vld [vmem:[%s7347_s24 + $0x30] ss:$8 sm:$0x7]  ;;  %v592_v9 = vrot.slane %v7626_v52, 1 }
  0x52   : > { %6008 = vmatpush1.bf16.msra.mxu0 %v7472_v2  ;;  %8866 = vst [vmem:[#allocation15_spill] sm:$0xff] %v7579_v42  ;;  %v7632_v56 = vld [vmem:[%s7347_s24 + $0x60] ss:$8 sm:$0x7]  ;;  %v593_v10 = vrot.slane %v7629_v53, 1 }
  0x53   : > { %6010 = vmatprep.subr.bf16.mxu0 %v7481_v5  ;;  %6032 = vmatpush3.bf16.msra.mxu1 %v7506_v13  ;;  %v7637_v1 = vld [vmem:[%s7347_s24 + $0x48] ss:$8 sm:$0x7]  ;;  %v595_v12 = vrot.slane %v7632_v56, 1 }
  0x54   : > { %6033 = vmatprep.subr.bf16.mxu1 %v8829_v32  ;;  %v7646_v16 = vld [vmem:[%s7347_s24 + $0x78] ss:$8 sm:$0x7]  ;;  %v594_v26 = vrot.slane %v7637_v1, 1 }
  0x55   : > { %v7651_v24 = vld [vmem:[%s7347_s24 + $0x90] ss:$8 sm:$0x7] }
  0x56   : > { %6012 = vmatpush1.bf16.msra.mxu0 %v7500_v11  ;;  %v7660_v45 = vld [vmem:[%s7347_s24 + $0xa8] ss:$8 sm:$0x7] }
  0x57   : > { %6014 = vmatprep.subr.bf16.mxu0 %v7509_v14  ;;  %6035 = vmatpush3.bf16.msra.mxu1 %v7534_v22 }
  0x58   : > { %6036 = vmatprep.subr.bf16.mxu1 %v8829_v32 }
  0x5a   : > { %6016 = vmatpush1.bf16.msra.mxu0 %v7528_v20 }
  0x5b   : > { %6018 = vmatprep.subr.bf16.mxu0 %v7537_v23  ;;  %6038 = vmatpush3.bf16.msra.mxu1 %v7553_v29 }
  0x5c   : > { %6039 = vmatprep.subr.bf16.mxu1 %v8829_v32 }
  0x5e   : > { %6020 = vmatpush1.bf16.msra.mxu0 %v7550_v27 }
  0x5f   : > { %6046 = vmatprep.subr.bf16.mxu0 %v7361_v28  ;;  %6041 = vmatpush3.bf16.msra.mxu1 %v7567_v37 }
  0x60   : > { %6042 = vmatprep.subr.bf16.mxu1 %v8829_v32 }
  0x61   : > { %393 = vmatmul.mubr.f32.vlgmr.msra.gmra.mrb[0].mxu0 %v7564_v36 }
  0x62   : > { %6048 = vmatpush1.bf16.msra.mxu0 %v7374_v34  ;;  %1056 = vmatprep.mubr.f32.mxu0 %v8827_v33 }
  0x63   : > { %6050 = vmatprep.subr.bf16.mxu0 %v7376_v35  ;;  %6044 = vmatpush3.bf16.msra.mxu1 %v7579_v42 }
  0x64   : > { %6077 = vmatprep.subr.bf16.mxu1 %v8829_v32 }
  0x66   : > { %6052 = vmatpush1.bf16.msra.mxu0 %v7394_v40  ;;  %5742 = vmatmul.mubr.f32.vlgmr.msra.gmra.mrb[0].mxu1 %v7564_v36 }
  0x67   : > { %6054 = vmatprep.subr.bf16.mxu0 %v7397_v41  ;;  %6079 = vmatpush3.bf16.msra.mxu1 %v7435_v54 }
  0x68   : > { %6080 = vmatprep.subr.bf16.mxu1 %v8829_v32  ;;  %5776 = vmatprep.mubr.msk.f32.mxu1 %vm7205_vm0, %v8827_v33 }
  0x6a   : > { %6056 = vmatpush1.bf16.msra.mxu0 %v7412_v46 }
  0x6b   : > { %6058 = vmatprep.subr.bf16.mxu0 %v7418_v48  ;;  %6082 = vmatpush3.bf16.msra.mxu1 %v7450_v59 }
  0x6c   : > { %6083 = vmatprep.subr.bf16.mxu1 %v8829_v32 }
  0x6e   : > { %6060 = vmatpush1.bf16.msra.mxu0 %v7444_v57 }
  0x6f   : > { %6062 = vmatprep.subr.bf16.mxu0 %v7453_v60  ;;  %6085 = vmatpush3.bf16.msra.mxu1 %v7478_v4 }
  0x70   : > { %6086 = vmatprep.subr.bf16.mxu1 %v8829_v32 }
  0x72   : > { %6064 = vmatpush1.bf16.msra.mxu0 %v7472_v2 }
  0x73   : > { %6066 = vmatprep.subr.bf16.mxu0 %v7481_v5  ;;  %6088 = vmatpush3.bf16.msra.mxu1 %v7506_v13 }
  0x74   : > { %6089 = vmatprep.subr.bf16.mxu1 %v8829_v32 }
  0x76   : > { %6068 = vmatpush1.bf16.msra.mxu0 %v7500_v11 }
  0x77   : > { %6070 = vmatprep.subr.bf16.mxu0 %v7509_v14  ;;  %6091 = vmatpush3.bf16.msra.mxu1 %v7534_v22 }
  0x78   : > { %6092 = vmatprep.subr.bf16.mxu1 %v8829_v32 }
  0x7a   : > { %6072 = vmatpush1.bf16.msra.mxu0 %v7528_v20 }
  0x7b   : > { %6074 = vmatprep.subr.bf16.mxu0 %v7537_v23  ;;  %6094 = vmatpush3.bf16.msra.mxu1 %v7553_v29 }
  0x7c   : > { %6095 = vmatprep.subr.bf16.mxu1 %v8829_v32 }
  0x7e   : > { %6076 = vmatpush1.bf16.msra.mxu0 %v7550_v27 }
  0x7f   : > { %6102 = vmatprep.subr.bf16.mxu0 %v7361_v28  ;;  %6097 = vmatpush3.bf16.msra.mxu1 %v7567_v37 }
  0x80   : > { %6098 = vmatprep.subr.bf16.mxu1 %v8829_v32 }
  0x83   : > { %6100 = vmatpush3.bf16.msra.mxu1 %v7579_v42 }
  0x84   : > { %6133 = vmatprep.subr.bf16.mxu1 %v8829_v32 }
 0x134   : > { %v394_v55 = vpop.f32.mrb[0].mxu0 }
 0x135   : > { %v470_v58 = vcombine.high %v394_v55, %v394_v55  ;;  %v477_v61 = vrot.slane %v394_v55, %v7620_v50  ;;  %v396_v62 = vpop.f32.mrb[1].mxu0 }
 0x136   : > { %v608_v63 = vcombine.high %v396_v62, %v396_v62  ;;  %v615_v0 = vrot.slane %v396_v62, %v7620_v50 }
 0x137   : > { %v484_v3 = vrot.slane %v470_v58, %v7620_v50  ;;  %v485_v6 = vcombine.high %v477_v61, %v477_v61  ;;  %v493_v7 = vrot.slane %v477_v61, %v7620_v50 }
 0x138   : > { %v623_v15 = vcombine.high %v615_v0, %v615_v0  ;;  %v622_v30 = vrot.slane %v608_v63, %v7620_v50  ;;  %v631_v31 = vrot.slane %v615_v0, %v7620_v50 }
 0x139   : > { %v486_v17 = vcombine.high %v484_v3, %v484_v3  ;;  %v500_v18 = vrot.slane %v484_v3, %v7620_v50  ;;  %v507_v19 = vrot.slane %v485_v6, %v7620_v50  ;;  %v515_v21 = vcombine.high %v493_v7, %v493_v7  ;;  %v465_v61 = vpop.f32.mrb[0].mxu1 }
 0x13a   : > { %v527_v25 = vadd.f32 %v493_v7, %v7623_v51  ;;  %v645_v58 = vrot.slane %v623_v15, %v7620_v50  ;;  %v5743_v6 = vpop.f32.mrb[1].mxu1  ;;  %v653_v32 = vcombine.high %v631_v31, %v631_v31  ;;  %v665_v42 = vadd.f32 %v631_v31, %v591_v8 }
 0x13b   : > { %v514_v38 = vrot.slane %v486_v17, %v7620_v50  ;;  %v516_v39 = vcombine.high %v500_v18, %v500_v18  ;;  %v517_v43 = vcombine.high %v507_v19, %v507_v19  ;;  %v528_v44 = vadd.f32 %v7626_v52, %v507_v19 }
 0x13c   : > { %v529_v47 = vadd.f32 %v7629_v53, %v515_v21  ;;  %v531_v49 = vadd.f32 %v7632_v56, %v500_v18  ;;  %v5382_v55 = vmul.f32 -1.442695, %v527_v25  ;;  %v624_v19 = vcombine.high %v622_v30, %v622_v30 }
 0x13d   : > { %v518_v62 = vcombine.high %v514_v38, %v514_v38  ;;  %v530_v63 = vadd.f32 %v7637_v1, %v517_v43  ;;  %v532_v0 = vadd.f32 %v7646_v16, %v514_v38  ;;  %v533_v3 = vadd.f32 %v7651_v24, %v516_v39 }
 0x13e   : > { %6503 = vpow2.f32 %v5382_v55  ;;  %v5383_v7 = vmul.f32 -1.442695, %v528_v44  ;;  %v5384_v17 = vmul.f32 -1.442695, %v529_v47  ;;  %v5386_v18 = vmul.f32 -1.442695, %v531_v49 }
 0x13f   : > { %v534_v21 = vadd.f32 %v7660_v45, %v518_v62  ;;  %v5385_v33 = vmul.f32 -1.442695, %v530_v63  ;;  %v638_v25 = vrot.slane %v622_v30, %v7620_v50  ;;  %v5387_v15 = vmul.f32 -1.442695, %v532_v0  ;;  %v7673_v30 = vld [vmem:[%s8825_s2] ss:$0 sm:$0xff] }
 0x140   : > { %6505 = vpow2.f32 %v5383_v7  ;;  %v655_v28 = vcombine.high %v645_v58, %v645_v58  ;;  %v5388_v43 = vmul.f32 -1.442695, %v533_v3  ;;  %v666_v39 = vadd.f32 %v645_v58, %v592_v9 }
 0x141   : > { %6507 = vpow2.f32 %v5384_v17  ;;  %v5389_v38 = vmul.f32 -1.442695, %v534_v21  ;;  %v667_v55 = vadd.f32 %v653_v32, %v593_v10  ;;  %v669_v47 = vadd.f32 %v638_v25, %v595_v12 }
 0x142   : > { %6509 = vpow2.f32 %v5385_v33  ;;  %v668_v44 = vadd.f32 %v655_v28, %v594_v26  ;;  %v5390_v62 = vmul.f32 -1.442695, %v665_v42  ;;  %v5391_v63 = vmul.f32 -1.442695, %v666_v39 }
 0x143   : > { %6511 = vpow2.f32 %v5386_v18  ;;  %v5392_v49 = vmul.f32 -1.442695, %v667_v55  ;;  %v652_v0 = vrot.slane %v624_v19, %v7620_v50  ;;  %v596_v33 = vrot.slane %v7646_v16, 1 }
 0x144   : > { %6513 = vpow2.f32 %v5387_v15  ;;  %v5393_v8 = vmul.f32 -1.442695, %v668_v44  ;;  %v721_v28 = vadd.f32 %v7673_v30, %v465_v61  ;;  %v597_v42 = vrot.slane %v7651_v24, 1 }
 0x145   : > { %6515 = vpow2.f32 %v5388_v43  ;;  %v654_v9 = vcombine.high %v638_v25, %v638_v25  ;;  %v5394_v10 = vmul.f32 -1.442695, %v669_v47  ;;  %v598_v58 = vrot.slane %v7660_v45, 1 }
 0x146   : > { %6517 = vpow2.f32 %v5389_v38  ;;  %v723_v26 = vcombine.high %v721_v28, %v721_v28  ;;  %v656_v3 = vcombine.high %v652_v0, %v652_v0  ;;  %v730_v6 = vrot.slane %v721_v28, %v7620_v50 }
 0x147   : > { %6519 = vpow2.f32 %v5390_v62  ;;  %v670_v21 = vadd.f32 %v652_v0, %v596_v33  ;;  %v671_v18 = vadd.f32 %v654_v9, %v597_v42 }
 0x148   : > { %v6504_v32 = vpop.eup %6503  ;;  %6521 = vpow2.f32 %v5391_v63  ;;  %v737_v43 = vrot.slane %v723_v26, %v7620_v50  ;;  %v672_v55 = vadd.f32 %v656_v3, %v598_v58  ;;  %v738_v44 = vcombine.high %v730_v6, %v730_v6 }
 0x149   : > { %v559_v12 = vadd.f32 1.0, %v6504_v32  ;;  %6523 = vpow2.f32 %v5392_v49  ;;  %v5396_v0 = vmul.f32 -1.442695, %v671_v18  ;;  %v746_v42 = vrot.slane %v730_v6, %v7620_v50 }
 0x14a   : > { %v6506_v31 = vpop.eup %6505  ;;  %6525 = vpow2.f32 %v5393_v8  ;;  %v5395_v8 = vmul.f32 -1.442695, %v670_v21  ;;  %v739_v32 = vcombine.high %v737_v43, %v737_v43 }
 0x14b   : > { %v6508_v7 = vpop.eup %6507  ;;  %v560_v17 = vadd.f32 1.0, %v6506_v31  ;;  %6527 = vrcp.f32 %v559_v12  ;;  %v760_v12 = vrot.slane %v738_v44, %v7620_v50  ;;  %v788_v31 = vrot.slane %v7623_v51, 2 }
 0x14c   : > { %v6510_v61 = vpop.eup %6509  ;;  %v561_v19 = vadd.f32 1.0, %v6508_v7  ;;  %6529 = vpow2.f32 %v5394_v10  ;;  %v5397_v10 = vmul.f32 -1.442695, %v672_v55  ;;  %v789_v7 = vrot.slane %v7626_v52, 2 }
 0x14d   : > { %v6512_v25 = vpop.eup %6511  ;;  %v562_v15 = vadd.f32 1.0, %v6510_v61  ;;  %6531 = vrcp.f32 %v560_v17  ;;  %v753_v61 = vrot.slane %v737_v43, %v7620_v50  ;;  %v767_v21 = vrot.slane %v739_v32, %v7620_v50 }
 0x14e   : > { %v6514_v38 = vpop.eup %6513  ;;  %v563_v39 = vadd.f32 1.0, %v6512_v25  ;;  %6533 = vrcp.f32 %v561_v19  ;;  %v768_v18 = vcombine.high %v746_v42, %v746_v42  ;;  %v844_v55 = vrot.slane %v7564_v36, %v7620_v50 }
 0x14f   : > { %v6516_v47 = vpop.eup %6515  ;;  %v564_v62 = vadd.f32 1.0, %v6514_v38  ;;  %6535 = vrcp.f32 %v562_v15  ;;  %v770_v38 = vcombine.high %v760_v12, %v760_v12  ;;  %v790_v52 = vrot.slane %v7629_v53, 2 }
 0x150   : > { %v6518_v63 = vpop.eup %6517  ;;  %v565_v49 = vadd.f32 1.0, %v6516_v47  ;;  %6537 = vrcp.f32 %v563_v39  ;;  %v791_v47 = vrot.slane %v7637_v1, 2  ;;  %v771_v32 = vcombine.high %v767_v21, %v767_v21 }
 0x151   : > { %v6520_v33 = vpop.eup %6519  ;;  %v566_v28 = vadd.f32 1.0, %v6518_v63  ;;  %6539 = vrcp.f32 %v564_v62 }
 0x152   : > { %v6522_v9 = vpop.eup %6521  ;;  %6541 = vrcp.f32 %v565_v49  ;;  %v697_v58 = vadd.f32 1.0, %v6520_v33 }
 0x153   : > { %v6524_v26 = vpop.eup %6523  ;;  %6543 = vrcp.f32 %v566_v28  ;;  %v698_v17 = vadd.f32 1.0, %v6522_v9 }
 0x154   : > { %v6526_v3 = vpop.eup %6525  ;;  %6545 = vpow2.f32 %v5395_v8  ;;  %v699_v6 = vadd.f32 1.0, %v6524_v26  ;;  %v792_v8 = vrot.slane %v7632_v56, 2 }
 0x155   : > { %v6528_v19 = vpop.eup %6527  ;;  %6547 = vpow2.f32 %v5396_v0  ;;  %v700_v15 = vadd.f32 1.0, %v6526_v3  ;;  %v769_v0 = vcombine.high %v753_v61, %v753_v61 }
 0x156   : > { %v6530_v25 = vpop.eup %6529  ;;  %6549 = vpow2.f32 %v5397_v10  ;;  %v780_v39 = vmul.f32 %v6528_v19, %v746_v42  ;;  %v837_v10 = vcombine.high %v7564_v36, %v7564_v36 }
 0x157   : > { %v6532_v51 = vpop.eup %6531  ;;  %v701_v44 = vadd.f32 1.0, %v6530_v25  ;;  %6551 = vrcp.f32 %v697_v58  ;;  %v795_v25 = vrot.slane %v7660_v45, 2 }
 0x158   : > { %v6534_v43 = vpop.eup %6533  ;;  %6553 = vrcp.f32 %v698_v17  ;;  %v781_v62 = vmul.f32 %v6532_v51, %v760_v12  ;;  %v804_v63 = vadd.f32 %v788_v31, %v780_v39  ;;  %v793_v31 = vrot.slane %v7646_v16, 2 }
 0x159   : > { %v6536_v49 = vpop.eup %6535  ;;  %6555 = vrcp.f32 %v699_v6  ;;  %v782_v33 = vmul.f32 %v6534_v43, %v768_v18  ;;  %v794_v17 = vrot.slane %v7651_v24, 2  ;;  %v852_v18 = vcombine.high %v844_v55, %v844_v55 }
 0x15a   : > { %v6538_v28 = vpop.eup %6537  ;;  %6557 = vrcp.f32 %v700_v15  ;;  %v783_v42 = vmul.f32 %v6536_v49, %v770_v38  ;;  %v805_v9 = vadd.f32 %v789_v7, %v781_v62  ;;  %v851_v16 = vrot.slane %v837_v10, %v7620_v50 }
 0x15b   : > { %v6540_v53 = vpop.eup %6539  ;;  %6559 = vrcp.f32 %v701_v44  ;;  %v784_v1 = vmul.f32 %v6538_v28, %v753_v61  ;;  %v806_v26 = vadd.f32 %v790_v52, %v782_v33  ;;  %v860_v24 = vrot.slane %v844_v55, %v7620_v50 }
 0x15c   : > { %v6542_v12 = vpop.eup %6541  ;;  %v785_v58 = vmul.f32 %v6540_v53, %v767_v21  ;;  %v807_v56 = vadd.f32 %v791_v47, %v783_v42  ;;  %6561 = vtanh.f32 %v804_v63  ;;  %v874_v45 = vrot.slane %v852_v18, %v7620_v50 }
 0x15d   : > { %v6544_v3 = vpop.eup %6543  ;;  %v786_v19 = vmul.f32 %v6542_v12, %v769_v0  ;;  %v808_v6 = vadd.f32 %v792_v8, %v784_v1  ;;  %6563 = vtanh.f32 %v805_v9  ;;  %v853_v49 = vcombine.high %v851_v16, %v851_v16 }
 0x15e   : > { %v6546_v7 = vpop.eup %6545  ;;  %v787_v36 = vmul.f32 %v6544_v3, %v771_v32  ;;  %6565 = vtanh.f32 %v806_v26  ;;  %v809_v39 = vadd.f32 %v793_v31, %v785_v58  ;;  %v882_v0 = vcombine.high %v860_v24, %v860_v24 }
 0x15f   : > { %v6548_v61 = vpop.eup %6547  ;;  %v702_v15 = vadd.f32 1.0, %v6546_v7  ;;  %6567 = vtanh.f32 %v807_v56  ;;  %v810_v44 = vadd.f32 %v794_v17, %v786_v19  ;;  %v884_v32 = vcombine.high %v874_v45, %v874_v45 }
 0x160   : > { %v6550_v38 = vpop.eup %6549  ;;  %v703_v21 = vadd.f32 1.0, %v6548_v61  ;;  %6569 = vtanh.f32 %v808_v6  ;;  %v811_v47 = vadd.f32 %v795_v25, %v787_v36  ;;  %v867_v9 = vrot.slane %v851_v16, %v7620_v50 }
 0x161   : > { %v6552_v51 = vpop.eup %6551  ;;  %v704_v52 = vadd.f32 1.0, %v6550_v38  ;;  %6571 = vrcp.f32 %v702_v15  ;;  %v881_v12 = vrot.slane %v853_v49, %v7620_v50 }
 0x162   : > { %v6554_v43 = vpop.eup %6553  ;;  %6573 = vrcp.f32 %v703_v21  ;;  %v820_v33 = vsub.f32 1.0, %v6552_v51  ;;  %v894_v10 = vmul.f32 %v6552_v51, %v860_v24  ;;  %v883_v51 = vcombine.high %v867_v9, %v867_v9 }
 0x163   : > { %v6556_v62 = vpop.eup %6555  ;;  %6575 = vrcp.f32 %v704_v52  ;;  %v821_v55 = vsub.f32 1.0, %v6554_v43  ;;  %v895_v56 = vmul.f32 %v6554_v43, %v874_v45 }
 0x164   : > { %v6558_v63 = vpop.eup %6557  ;;  %6577 = vtanh.f32 %v809_v39  ;;  %v822_v53 = vsub.f32 1.0, %v6556_v62  ;;  %v896_v6 = vmul.f32 %v6556_v62, %v882_v0 }
 0x165   : > { %v6560_v8 = vpop.eup %6559  ;;  %6579 = vtanh.f32 %v810_v44  ;;  %v823_v31 = vsub.f32 1.0, %v6558_v63  ;;  %v897_v36 = vmul.f32 %v6558_v63, %v884_v32  ;;  %v885_v44 = vcombine.high %v881_v12, %v881_v12 }
 0x166   : > { %v6562_v28 = vpop.eup %6561  ;;  %6581 = vtanh.f32 %v811_v47  ;;  %v824_v17 = vsub.f32 1.0, %v6560_v8  ;;  %v898_v16 = vmul.f32 %v6560_v8, %v867_v9 }
 0x167   : > { %v6564_v42 = vpop.eup %6563  ;;  %v828_v1 = vmul.f32 %v6562_v28, %v820_v33 }
 0x168   : > { %v6566_v26 = vpop.eup %6565  ;;  %v829_v58 = vmul.f32 %v6564_v42, %v821_v55 }
 0x169   : > { %v6568_v3 = vpop.eup %6567  ;;  %v830_v19 = vmul.f32 %v6566_v26, %v822_v53  ;;  %v7703_v7 = vadd.f32 %v894_v10, %v828_v1 }
 0x16a   : > { %v6570_v18 = vpop.eup %6569  ;;  %v831_v25 = vmul.f32 %v6568_v3, %v823_v31  ;;  %v7705_v61 = vadd.f32 %v895_v56, %v829_v58 }
 0x16b   : > { %v6572_v15 = vpop.eup %6571  ;;  %v832_v38 = vmul.f32 %v6570_v18, %v824_v17  ;;  %v7707_v21 = vadd.f32 %v896_v6, %v830_v19  ;;  %910 = vst [vmem:[%s7349_s25] sm:$0x1] %v7703_v7 }
 0x16c   : > { %v6574_v39 = vpop.eup %6573  ;;  %v7711_v24 = vadd.f32 %v897_v36, %v831_v25  ;;  %911 = vst [vmem:[%s7349_s25 + $0x8] sm:$0x1] %v7705_v61  ;;  %v825_v43 = vsub.f32 1.0, %v6572_v15  ;;  %v899_v0 = vmul.f32 %v6572_v15, %v881_v12  ;;  %v942_v10 = vcombine.low %v7703_v7, %v7705_v61 }
 0x16d   : > { %v6576_v52 = vpop.eup %6575  ;;  %v7715_v45 = vadd.f32 %v898_v16, %v832_v38  ;;  %912 = vst [vmem:[%s7349_s25 + $0x10] sm:$0x1] %v7707_v21  ;;  %v826_v62 = vsub.f32 1.0, %v6574_v39  ;;  %v900_v55 = vmul.f32 %v6574_v39, %v883_v51  ;;  %v8867_v15 = vmov 0.0|0.0   ;;  %v8869_v16 = vld [vmem:[#allocation15_spill] sm:$0xff]  ;;  %v8870_v39 = vld [vmem:[#allocation5_spill] sm:$0xff] }
 0x16e   : > { %v6578_v47 = vpop.eup %6577  ;;  %913 = vst [vmem:[%s7349_s25 + $0x18] sm:$0x1] %v7711_v24  ;;  %v827_v49 = vsub.f32 1.0, %v6576_v52  ;;  %v943_v33 = vcombine.low %v7707_v21, %v7711_v24  ;;  %v901_v9 = vmul.f32 %v6576_v52, %v885_v44  ;;  %v952_v56 = vrot.slane %v942_v10, %v7620_v50 }
 0x16f   : > { %v6580_v63 = vpop.eup %6579  ;;  %v833_v8 = vmul.f32 %v6578_v47, %v825_v43  ;;  %914 = vst [vmem:[%s7349_s25 + $0x20] sm:$0x1] %v7715_v45  ;;  %v8868_v38 = vmov 0.0  }
 0x170   : > { %v6582_v28 = vpop.eup %6581  ;;  %v834_v32 = vmul.f32 %v6580_v63, %v826_v62  ;;  %v959_v31 = vrot.slane %v943_v33, %v7620_v50  ;;  %v7786_v63 = vld [vmem:[%s7347_s24 + $0x1] ss:$8 sm:$0x7] }
 0x171   : > { %v835_v42 = vmul.f32 %v6582_v28, %v827_v49  ;;  %v7725_v53 = vadd.f32 %v899_v0, %v833_v8  ;;  %v7791_v33 = vld [vmem:[%s7347_s24 + $0x19] ss:$8 sm:$0x7] }
 0x172   : > { %v7729_v1 = vadd.f32 %v900_v55, %v834_v32  ;;  %v974_v19 = vcombine.low %v952_v56, %v959_v31  ;;  %v7794_v28 = vld [vmem:[%s7347_s24 + $0x31] ss:$8 sm:$0x7] }
 0x173   : > { %v7731_v26 = vadd.f32 %v901_v9, %v835_v42  ;;  %915 = vst [vmem:[%s7349_s25 + $0x28] sm:$0x1] %v7725_v53  ;;  %v944_v12 = vcombine.low %v7715_v45, %v7725_v53  ;;  %v7797_v32 = vld [vmem:[%s7347_s24 + $0x49] ss:$8 sm:$0x7] }
 0x174   : > { %916 = vst [vmem:[%s7349_s25 + $0x30] sm:$0x1] %v7729_v1  ;;  %v982_v18 = vrot.slane %v974_v19, %v7620_v50  ;;  %v7800_v55 = vld [vmem:[%s7347_s24 + $0x61] ss:$8 sm:$0x7] }
 0x175   : > { %917 = vst [vmem:[%s7349_s25 + $0x38] sm:$0x1] %v7731_v26  ;;  %v945_v58 = vcombine.low %v7729_v1, %v7731_v26  ;;  %v966_v3 = vrot.slane %v944_v12, %v7620_v50  ;;  %v7805_v31 = vld [vmem:[%s7347_s24 + $0x79] ss:$8 sm:$0x7] }
 0x177   : > { %v973_v17 = vrot.slane %v945_v58, %v7620_v50  ;;  %v7808_v58 = vld [vmem:[%s7347_s24 + $0x91] ss:$8 sm:$0x7] }
 0x179   : > { %v975_v6 = vcombine.low %v966_v3, %v973_v17 }
 0x17b   : > { %v989_v25 = vrot.slane %v975_v6, %v7620_v50 }
 0x17d   : > { %v990_v36 = vcombine.low %v982_v18, %v989_v25  ;;  %v7815_v25 = vld [vmem:[%s7347_s24 + $0xa9] ss:$8 sm:$0x7] }
 0x17f   : > { %1057 = vmatmul.mubr.f32.vlgmr.msra.gmra.mrb[2].mxu0 %v990_v36  ;;  %5777 = vmatmul.mubr.f32.vlgmr.msra.gmra.mrb[2].mxu1 %v990_v36 }
 0x180   : > { %6104 = vmatpush1.bf16.msra.mxu0 %v7374_v34  ;;  %6135 = vmatpush3.bf16.msra.mxu1 %v7435_v54 }
 0x181   : > { %6106 = vmatprep.subr.bf16.mxu0 %v7376_v35  ;;  %6136 = vmatprep.subr.bf16.mxu1 %v8867_v15 }
 0x182   : > { %1662 = vmatprep.mubr.f32.mxu0 %v8868_v38  ;;  %5811 = vmatprep.mubr.msk.f32.mxu1 %vm7205_vm0, %v8868_v38 }
 0x184   : > { %6108 = vmatpush1.bf16.msra.mxu0 %v7394_v40  ;;  %6138 = vmatpush3.bf16.msra.mxu1 %v7450_v59 }
 0x185   : > { %6110 = vmatprep.subr.bf16.mxu0 %v7397_v41  ;;  %6139 = vmatprep.subr.bf16.mxu1 %v8867_v15 }
 0x188   : > { %6112 = vmatpush1.bf16.msra.mxu0 %v7412_v46  ;;  %6141 = vmatpush3.bf16.msra.mxu1 %v7478_v4 }
 0x189   : > { %6114 = vmatprep.subr.bf16.mxu0 %v7418_v48  ;;  %6142 = vmatprep.subr.bf16.mxu1 %v8867_v15 }
 0x18c   : > { %6116 = vmatpush1.bf16.msra.mxu0 %v7444_v57  ;;  %6144 = vmatpush3.bf16.msra.mxu1 %v7506_v13 }
 0x18d   : > { %6118 = vmatprep.subr.bf16.mxu0 %v7453_v60  ;;  %6145 = vmatprep.subr.bf16.mxu1 %v8867_v15 }
 0x190   : > { %6120 = vmatpush1.bf16.msra.mxu0 %v7472_v2  ;;  %6147 = vmatpush3.bf16.msra.mxu1 %v7534_v22 }
 0x191   : > { %6122 = vmatprep.subr.bf16.mxu0 %v7481_v5  ;;  %6148 = vmatprep.subr.bf16.mxu1 %v8867_v15 }
 0x194   : > { %6124 = vmatpush1.bf16.msra.mxu0 %v7500_v11  ;;  %6150 = vmatpush3.bf16.msra.mxu1 %v7553_v29 }
 0x195   : > { %6126 = vmatprep.subr.bf16.mxu0 %v7509_v14  ;;  %6151 = vmatprep.subr.bf16.mxu1 %v8867_v15 }
 0x198   : > { %6128 = vmatpush1.bf16.msra.mxu0 %v7528_v20  ;;  %6153 = vmatpush3.bf16.msra.mxu1 %v7567_v37 }
 0x199   : > { %6130 = vmatprep.subr.bf16.mxu0 %v7537_v23  ;;  %6154 = vmatprep.subr.bf16.mxu1 %v8867_v15 }
 0x19c   : > { %6132 = vmatpush1.bf16.msra.mxu0 %v7550_v27  ;;  %6156 = vmatpush3.bf16.msra.mxu1 %v8869_v16 }
 0x19d   : > { %6158 = vmatprep.subr.bf16.mxu0 %v8870_v39  ;;  %6189 = vmatprep.subr.bf16.mxu1 %v8867_v15 }
 0x252   : > { %v1058_v51 = vpop.f32.mrb[2].mxu0  ;;  %v1129_v52 = vpop.f32.mrb[2].mxu1 }
 0x253   : > { %v1134_v44 = vcombine.high %v1058_v51, %v1058_v51  ;;  %v1141_v43 = vrot.slane %v1058_v51, %v7620_v50  ;;  %v1060_v47 = vpop.f32.mrb[3].mxu0  ;;  %v5778_v62 = vpop.f32.mrb[3].mxu1 }
 0x254   : > { %v1279_v3 = vrot.slane %v1060_v47, %v7620_v50 }
 0x255   : > { %v1148_v49 = vrot.slane %v1134_v44, %v7620_v50  ;;  %v1149_v8 = vcombine.high %v1141_v43, %v1141_v43  ;;  %v1157_v0 = vrot.slane %v1141_v43, %v7620_v50  ;;  %v1272_v43 = vcombine.high %v1060_v47, %v1060_v47 }
 0x256   : > { %v1287_v23 = vcombine.high %v1279_v3, %v1279_v3  ;;  %v1295_v47 = vrot.slane %v1279_v3, %v7620_v50  ;;  %v1259_v3 = vrot.slane %v7800_v55, 1 }
 0x257   : > { %v1150_v42 = vcombine.high %v1148_v49, %v1148_v49  ;;  %v1164_v9 = vrot.slane %v1148_v49, %v7620_v50  ;;  %v1171_v10 = vrot.slane %v1149_v8, %v7620_v50  ;;  %v1179_v12 = vcombine.high %v1157_v0, %v1157_v0 }
 0x258   : > { %v1191_v56 = vadd.f32 %v7786_v63, %v1157_v0 }
 0x259   : > { %v1178_v17 = vrot.slane %v1150_v42, %v7620_v50  ;;  %v1180_v19 = vcombine.high %v1164_v9, %v1164_v9  ;;  %v1181_v6 = vcombine.high %v1171_v10, %v1171_v10  ;;  %v1192_v18 = vadd.f32 %v7791_v33, %v1171_v10 }
 0x25a   : > { %v1193_v36 = vadd.f32 %v7794_v28, %v1179_v12  ;;  %v1195_v51 = vadd.f32 %v7800_v55, %v1164_v9  ;;  %v5406_v44 = vmul.f32 -1.442695, %v1191_v56  ;;  %v1255_v9 = vrot.slane %v7786_v63, 1 }
 0x25b   : > { %v1182_v62 = vcombine.high %v1178_v17, %v1178_v17  ;;  %v1194_v49 = vadd.f32 %v7797_v32, %v1181_v6  ;;  %v1196_v8 = vadd.f32 %v7805_v31, %v1178_v17  ;;  %v1197_v0 = vadd.f32 %v7808_v58, %v1180_v19 }
 0x25c   : > { %6583 = vpow2.f32 %v5406_v44  ;;  %v5407_v42 = vmul.f32 -1.442695, %v1192_v18  ;;  %v5408_v39 = vmul.f32 -1.442695, %v1193_v36  ;;  %v5410_v27 = vmul.f32 -1.442695, %v1195_v51 }
 0x25d   : > { %v1198_v10 = vadd.f32 %v7815_v25, %v1182_v62  ;;  %v5409_v16 = vmul.f32 -1.442695, %v1194_v49  ;;  %v5411_v12 = vmul.f32 -1.442695, %v1196_v8  ;;  %v5412_v56 = vmul.f32 -1.442695, %v1197_v0 }
 0x25e   : > { %6585 = vpow2.f32 %v5407_v42  ;;  %v1286_v17 = vrot.slane %v1272_v43, %v7620_v50  ;;  %v1256_v6 = vrot.slane %v7791_v33, 1  ;;  %v1309_v18 = vrot.slane %v1287_v23, %v7620_v50 }
 0x25f   : > { %6587 = vpow2.f32 %v5408_v39  ;;  %v5413_v19 = vmul.f32 -1.442695, %v1198_v10  ;;  %v1329_v36 = vadd.f32 %v1295_v47, %v1255_v9  ;;  %v1385_v44 = vadd.f32 %v7673_v30, %v1129_v52 }
 0x260   : > { %6589 = vpow2.f32 %v5409_v16  ;;  %v1288_v51 = vcombine.high %v1286_v17, %v1286_v17  ;;  %v1330_v62 = vadd.f32 %v1309_v18, %v1256_v6  ;;  %v1257_v39 = vrot.slane %v7794_v28, 1 }
 0x261   : > { %6591 = vpow2.f32 %v5410_v27  ;;  %v1302_v16 = vrot.slane %v1286_v17, %v7620_v50  ;;  %v1317_v49 = vcombine.high %v1295_v47, %v1295_v47  ;;  %v5414_v8 = vmul.f32 -1.442695, %v1329_v36 }
 0x262   : > { %6593 = vpow2.f32 %v5411_v12  ;;  %v5415_v27 = vmul.f32 -1.442695, %v1330_v62  ;;  %v1258_v23 = vrot.slane %v7797_v32, 1  ;;  %v1316_v42 = vrot.slane %v1288_v51, %v7620_v50 }
 0x263   : > { %6595 = vpow2.f32 %v5412_v56  ;;  %v1319_v10 = vcombine.high %v1309_v18, %v1309_v18  ;;  %v1387_v9 = vcombine.high %v1385_v44, %v1385_v44  ;;  %v1260_v30 = vrot.slane %v7805_v31, 1 }
 0x264   : > { %6597 = vpow2.f32 %v5413_v19  ;;  %v1261_v52 = vrot.slane %v7808_v58, 1  ;;  %v1394_v47 = vrot.slane %v1385_v44, %v7620_v50  ;;  %v1262_v17 = vrot.slane %v7815_v25, 1 }
 0x265   : > { %6599 = vpow2.f32 %v5414_v8  ;;  %v1318_v62 = vcombine.high %v1302_v16, %v1302_v16  ;;  %v1320_v37 = vcombine.high %v1316_v42, %v1316_v42  ;;  %v1332_v20 = vadd.f32 %v1319_v10, %v1258_v23 }
 0x266   : > { %v6584_v43 = vpop.eup %6583  ;;  %v1401_v8 = vrot.slane %v1387_v9, %v7620_v50  ;;  %v1402_v11 = vcombine.high %v1394_v47, %v1394_v47  ;;  %v1334_v5 = vadd.f32 %v1316_v42, %v1260_v30  ;;  %v1452_v10 = vrot.slane %v7786_v63, 2 }
 0x267   : > { %v1223_v0 = vadd.f32 1.0, %v6584_v43  ;;  %v1331_v43 = vadd.f32 %v1317_v49, %v1257_v39  ;;  %v1335_v39 = vadd.f32 %v1318_v62, %v1261_v52  ;;  %v5417_v23 = vmul.f32 -1.442695, %v1332_v20 }
 0x268   : > { %v6586_v12 = vpop.eup %6585  ;;  %v1453_v42 = vrot.slane %v7791_v33, 2  ;;  %v1455_v20 = vrot.slane %v7797_v32, 2 }
 0x269   : > { %v6588_v56 = vpop.eup %6587  ;;  %v1224_v19 = vadd.f32 1.0, %v6586_v12  ;;  %6601 = vrcp.f32 %v1223_v0  ;;  %v1333_v0 = vadd.f32 %v1302_v16, %v1259_v3  ;;  %v5416_v49 = vmul.f32 -1.442695, %v1331_v43 }
 0x26a   : > { %v6590_v6 = vpop.eup %6589  ;;  %v1225_v36 = vadd.f32 1.0, %v6588_v56  ;;  %6603 = vpow2.f32 %v5415_v27  ;;  %v1403_v3 = vcombine.high %v1401_v8, %v1401_v8  ;;  %v5419_v16 = vmul.f32 -1.442695, %v1334_v5 }
 0x26b   : > { %v6592_v18 = vpop.eup %6591  ;;  %v1226_v51 = vadd.f32 1.0, %v6590_v6  ;;  %6605 = vrcp.f32 %v1224_v19  ;;  %v1336_v19 = vadd.f32 %v1320_v37, %v1262_v17  ;;  %v5418_v6 = vmul.f32 -1.442695, %v1333_v0 }
 0x26c   : > { %v6594_v14 = vpop.eup %6593  ;;  %v1227_v29 = vadd.f32 1.0, %v6592_v18  ;;  %6607 = vrcp.f32 %v1225_v36  ;;  %v5420_v30 = vmul.f32 -1.442695, %v1335_v39  ;;  %v1454_v37 = vrot.slane %v7794_v28, 2 }
 0x26d   : > { %v6596_v12 = vpop.eup %6595  ;;  %v1228_v44 = vadd.f32 1.0, %v6594_v14  ;;  %6609 = vrcp.f32 %v1226_v51  ;;  %v1410_v14 = vrot.slane %v1394_v47, %v7620_v50  ;;  %v1456_v17 = vrot.slane %v7800_v55, 2 }
 0x26e   : > { %v6598_v56 = vpop.eup %6597  ;;  %v1229_v22 = vadd.f32 1.0, %v6596_v12  ;;  %6611 = vrcp.f32 %v1227_v29  ;;  %v1424_v29 = vrot.slane %v1402_v11, %v7620_v50  ;;  %v1417_v47 = vrot.slane %v1401_v8, %v7620_v50 }
 0x26f   : > { %v1230_v27 = vadd.f32 1.0, %v6598_v56  ;;  %6613 = vrcp.f32 %v1228_v44  ;;  %v6600_v9 = vpop.eup %6599  ;;  %v1431_v33 = vrot.slane %v1403_v3, %v7620_v50  ;;  %v1432_v11 = vcombine.high %v1410_v14, %v1410_v14 }
 0x270   : > { %6615 = vrcp.f32 %v1229_v22  ;;  %v5421_v22 = vmul.f32 -1.442695, %v1336_v19  ;;  %v1361_v62 = vadd.f32 1.0, %v6600_v9  ;;  %v1434_v18 = vcombine.high %v1424_v29, %v1424_v29 }
 0x271   : > { %6617 = vrcp.f32 %v1230_v27  ;;  %v1457_v0 = vrot.slane %v7805_v31, 2  ;;  %v1458_v55 = vrot.slane %v7808_v58, 2  ;;  %v1459_v44 = vrot.slane %v7815_v25, 2 }
 0x272   : > { %6619 = vpow2.f32 %v5416_v49  ;;  %v1433_v27 = vcombine.high %v1417_v47, %v1417_v47 }
 0x273   : > { %v6602_v52 = vpop.eup %6601  ;;  %6621 = vpow2.f32 %v5417_v23 }
 0x274   : > { %v6604_v63 = vpop.eup %6603  ;;  %v1444_v5 = vmul.f32 %v6602_v52, %v1410_v14  ;;  %6623 = vpow2.f32 %v5418_v6  ;;  %v1435_v6 = vcombine.high %v1431_v33, %v1431_v33 }
 0x275   : > { %v6606_v36 = vpop.eup %6605  ;;  %6625 = vpow2.f32 %v5419_v16  ;;  %v1362_v52 = vadd.f32 1.0, %v6604_v63 }
 0x276   : > { %v6608_v43 = vpop.eup %6607  ;;  %v1445_v28 = vmul.f32 %v6606_v36, %v1424_v29  ;;  %v1468_v51 = vadd.f32 %v1452_v10, %v1444_v5  ;;  %6627 = vpow2.f32 %v5420_v30 }
 0x277   : > { %v6610_v32 = vpop.eup %6609  ;;  %v1446_v12 = vmul.f32 %v6608_v43, %v1432_v11  ;;  %6629 = vpow2.f32 %v5421_v22 }
 0x278   : > { %v6612_v8 = vpop.eup %6611  ;;  %v1447_v56 = vmul.f32 %v6610_v32, %v1434_v18  ;;  %v1469_v39 = vadd.f32 %v1453_v42, %v1445_v28  ;;  %6631 = vtanh.f32 %v1468_v51 }
 0x279   : > { %v6614_v49 = vpop.eup %6613  ;;  %v1448_v19 = vmul.f32 %v6612_v8, %v1417_v47  ;;  %v1470_v23 = vadd.f32 %v1454_v37, %v1446_v12  ;;  %6633 = vrcp.f32 %v1361_v62 }
 0x27a   : > { %v6616_v10 = vpop.eup %6615  ;;  %v1449_v3 = vmul.f32 %v6614_v49, %v1431_v33  ;;  %v1471_v14 = vadd.f32 %v1455_v20, %v1447_v56  ;;  %6635 = vtanh.f32 %v1469_v39 }
 0x27b   : > { %v6618_v31 = vpop.eup %6617  ;;  %v1450_v58 = vmul.f32 %v6616_v10, %v1433_v27  ;;  %v1472_v16 = vadd.f32 %v1456_v17, %v1448_v19  ;;  %6637 = vtanh.f32 %v1470_v23 }
 0x27c   : > { %v6620_v9 = vpop.eup %6619  ;;  %v1451_v29 = vmul.f32 %v6618_v31, %v1435_v6  ;;  %v1473_v25 = vadd.f32 %v1457_v0, %v1449_v3  ;;  %6639 = vtanh.f32 %v1471_v14 }
 0x27d   : > { %v6622_v42 = vpop.eup %6621  ;;  %v1474_v30 = vadd.f32 %v1458_v55, %v1450_v58  ;;  %6641 = vtanh.f32 %v1472_v16  ;;  %v1363_v47 = vadd.f32 1.0, %v6620_v9 }
 0x27e   : > { %v6624_v22 = vpop.eup %6623  ;;  %v1475_v37 = vadd.f32 %v1459_v44, %v1451_v29  ;;  %6643 = vtanh.f32 %v1473_v25  ;;  %v1364_v20 = vadd.f32 1.0, %v6622_v42 }
 0x27f   : > { %v6626_v5 = vpop.eup %6625  ;;  %6645 = vtanh.f32 %v1474_v30  ;;  %v1365_v33 = vadd.f32 1.0, %v6624_v22 }
 0x280   : > { %v6628_v36 = vpop.eup %6627  ;;  %6647 = vtanh.f32 %v1475_v37  ;;  %v1366_v11 = vadd.f32 1.0, %v6626_v5 }
 0x281   : > { %v6630_v17 = vpop.eup %6629  ;;  %6649 = vrcp.f32 %v1362_v52  ;;  %v1367_v43 = vadd.f32 1.0, %v6628_v36 }
 0x282   : > { %v6632_v62 = vpop.eup %6631  ;;  %6651 = vrcp.f32 %v1363_v47  ;;  %v1368_v28 = vadd.f32 1.0, %v6630_v17 }
 0x283   : > { %v6634_v18 = vpop.eup %6633  ;;  %6653 = vrcp.f32 %v1364_v20 }
 0x284   : > { %v6636_v63 = vpop.eup %6635  ;;  %6655 = vrcp.f32 %v1365_v33  ;;  %v1484_v51 = vsub.f32 1.0, %v6634_v18  ;;  %v1500_v55 = vmul.f32 %v6634_v18, %v7703_v7 }
 0x285   : > { %v6638_v32 = vpop.eup %6637  ;;  %6657 = vrcp.f32 %v1366_v11 }
 0x286   : > { %v6640_v0 = vpop.eup %6639  ;;  %6659 = vrcp.f32 %v1367_v43  ;;  %v1492_v12 = vmul.f32 %v6632_v62, %v1484_v51 }
 0x287   : > { %v6642_v8 = vpop.eup %6641  ;;  %6661 = vrcp.f32 %v1368_v28 }
 0x288   : > { %v6644_v44 = vpop.eup %6643  ;;  %v7852_v56 = vadd.f32 %v1500_v55, %v1492_v12 }
 0x289   : > { %v6646_v39 = vpop.eup %6645 }
 0x28a   : > { %v6648_v49 = vpop.eup %6647  ;;  %1516 = vst [vmem:[%s7349_s25 + $0x1] sm:$0x1] %v7852_v56 }
 0x28b   : > { %v6650_v27 = vpop.eup %6649 }
 0x28c   : > { %v6652_v19 = vpop.eup %6651  ;;  %v1485_v23 = vsub.f32 1.0, %v6650_v27  ;;  %v1501_v7 = vmul.f32 %v6650_v27, %v7705_v61 }
 0x28d   : > { %v6654_v10 = vpop.eup %6653  ;;  %v1486_v6 = vsub.f32 1.0, %v6652_v19  ;;  %v1502_v29 = vmul.f32 %v6652_v19, %v7707_v21  ;;  %v8871_v19 = vld [vmem:[#allocation10_spill] sm:$0xff] }
 0x28e   : > { %v6656_v3 = vpop.eup %6655  ;;  %v1487_v14 = vsub.f32 1.0, %v6654_v10  ;;  %v1493_v31 = vmul.f32 %v6636_v63, %v1485_v23  ;;  %v1503_v52 = vmul.f32 %v6654_v10, %v7711_v24  ;;  %v8872_v23 = vld [vmem:[#allocation6_spill] sm:$0xff]  ;;  %v8873_v10 = vld [vmem:[#allocation7_spill] sm:$0xff] }
 0x28f   : > { %v6658_v58 = vpop.eup %6657  ;;  %v1488_v16 = vsub.f32 1.0, %v6656_v3  ;;  %v1494_v9 = vmul.f32 %v6638_v32, %v1486_v6  ;;  %v1504_v61 = vmul.f32 %v6656_v3, %v7715_v45  ;;  %v8874_v6 = vld [vmem:[#allocation13_spill] sm:$0xff]  ;;  %v8875_v3 = vld [vmem:[#allocation8_spill] sm:$0xff] }
 0x290   : > { %v6660_v25 = vpop.eup %6659  ;;  %v1489_v42 = vsub.f32 1.0, %v6658_v58  ;;  %v1495_v30 = vmul.f32 %v6640_v0, %v1487_v14  ;;  %v7859_v22 = vadd.f32 %v1501_v7, %v1493_v31  ;;  %v1505_v21 = vmul.f32 %v6658_v58, %v7725_v53  ;;  %v8876_v14 = vld [vmem:[#allocation9_spill] sm:$0xff]  ;;  %v8877_v31 = vld [vmem:[#allocation14_spill] sm:$0xff]  ;;  %v8878_v7 = vld [vmem:[#allocation11_spill] sm:$0xff] }
 0x291   : > { %v6662_v37 = vpop.eup %6661  ;;  %v1490_v47 = vsub.f32 1.0, %v6660_v25  ;;  %v1496_v5 = vmul.f32 %v6642_v8, %v1488_v16  ;;  %v7862_v20 = vadd.f32 %v1502_v29, %v1494_v9  ;;  %v1506_v11 = vmul.f32 %v6660_v25, %v7729_v1  ;;  %v8879_v58 = vld [vmem:[#allocation12_spill] sm:$0xff]  ;;  %v8880_v16 = vld [vmem:[#allocation15_spill] sm:$0xff]  ;;  %v8881_v9 = vld [vmem:[#allocation5_spill] sm:$0xff] }
 0x292   : > { %v1491_v36 = vsub.f32 1.0, %v6662_v37  ;;  %v1497_v33 = vmul.f32 %v6644_v44, %v1489_v42  ;;  %v7865_v17 = vadd.f32 %v1503_v52, %v1495_v30  ;;  %1517 = vst [vmem:[%s7349_s25 + $0x9] sm:$0x1] %v7859_v22  ;;  %v1507_v62 = vmul.f32 %v6662_v37, %v7731_v26 }
 0x293   : > { %v1498_v24 = vmul.f32 %v6646_v39, %v1490_v47  ;;  %v7871_v45 = vadd.f32 %v1504_v61, %v1496_v5  ;;  %1518 = vst [vmem:[%s7349_s25 + $0x11] sm:$0x1] %v7862_v20  ;;  %v1548_v53 = vcombine.low %v7852_v56, %v7859_v22  ;;  %v7942_v47 = vld [vmem:[%s7347_s24 + $0x2] ss:$8 sm:$0x7] }
 0x294   : > { %v1499_v43 = vmul.f32 %v6648_v49, %v1491_v36  ;;  %v7875_v18 = vadd.f32 %v1505_v21, %v1497_v33  ;;  %1519 = vst [vmem:[%s7349_s25 + $0x19] sm:$0x1] %v7865_v17  ;;  %v1549_v28 = vcombine.low %v7862_v20, %v7865_v17  ;;  %v7947_v33 = vld [vmem:[%s7347_s24 + $0x1a] ss:$8 sm:$0x7] }
 0x295   : > { %v7883_v63 = vadd.f32 %v1506_v11, %v1498_v24  ;;  %1520 = vst [vmem:[%s7349_s25 + $0x21] sm:$0x1] %v7871_v45  ;;  %v1558_v0 = vrot.slane %v1548_v53, %v7620_v50  ;;  %v7950_v21 = vld [vmem:[%s7347_s24 + $0x32] ss:$8 sm:$0x7] }
 0x296   : > { %v7887_v1 = vadd.f32 %v1507_v62, %v1499_v43  ;;  %1521 = vst [vmem:[%s7349_s25 + $0x29] sm:$0x1] %v7875_v18  ;;  %v1550_v26 = vcombine.low %v7871_v45, %v7875_v18  ;;  %v1565_v51 = vrot.slane %v1549_v28, %v7620_v50  ;;  %v7953_v24 = vld [vmem:[%s7347_s24 + $0x4a] ss:$8 sm:$0x7] }
 0x297   : > { %1522 = vst [vmem:[%s7349_s25 + $0x31] sm:$0x1] %v7883_v63  ;;  %v7956_v11 = vld [vmem:[%s7347_s24 + $0x62] ss:$8 sm:$0x7] }
 0x298   : > { %1523 = vst [vmem:[%s7349_s25 + $0x39] sm:$0x1] %v7887_v1  ;;  %v1551_v32 = vcombine.low %v7883_v63, %v7887_v1  ;;  %v1572_v55 = vrot.slane %v1550_v26, %v7620_v50  ;;  %v1580_v8 = vcombine.low %v1558_v0, %v1565_v51  ;;  %v7961_v26 = vld [vmem:[%s7347_s24 + $0x7a] ss:$8 sm:$0x7] }
 0x299   : > { %v7964_v51 = vld [vmem:[%s7347_s24 + $0x92] ss:$8 sm:$0x7] }
 0x29a   : > { %v1579_v12 = vrot.slane %v1551_v32, %v7620_v50  ;;  %v1588_v39 = vrot.slane %v1580_v8, %v7620_v50 }
 0x29c   : > { %v1581_v44 = vcombine.low %v1572_v55, %v1579_v12 }
 0x29e   : > { %v1595_v49 = vrot.slane %v1581_v44, %v7620_v50 }
 0x2a0   : > { %v1596_v27 = vcombine.low %v1588_v39, %v1595_v49  ;;  %v7971_v39 = vld [vmem:[%s7347_s24 + $0xaa] ss:$8 sm:$0x7] }
 0x2a2   : > { %1663 = vmatmul.mubr.f32.vlgmr.msra.gmra.mrb[4].mxu0 %v1596_v27  ;;  %5812 = vmatmul.mubr.f32.vlgmr.msra.gmra.mrb[4].mxu1 %v1596_v27 }
 0x2a3   : > { %6160 = vmatpush1.bf16.msra.mxu0 %v7374_v34  ;;  %6191 = vmatpush3.bf16.msra.mxu1 %v7435_v54 }
 0x2a4   : > { %6162 = vmatprep.subr.bf16.mxu0 %v7376_v35  ;;  %6192 = vmatprep.subr.bf16.mxu1 %v8867_v15 }
 0x2a5   : > { %2268 = vmatprep.mubr.f32.mxu0 %v8868_v38  ;;  %5846 = vmatprep.mubr.msk.f32.mxu1 %vm7205_vm0, %v8868_v38 }
 0x2a7   : > { %6164 = vmatpush1.bf16.msra.mxu0 %v7394_v40  ;;  %6194 = vmatpush3.bf16.msra.mxu1 %v7450_v59 }
 0x2a8   : > { %6166 = vmatprep.subr.bf16.mxu0 %v7397_v41  ;;  %6195 = vmatprep.subr.bf16.mxu1 %v8867_v15 }
 0x2ab   : > { %6168 = vmatpush1.bf16.msra.mxu0 %v7412_v46  ;;  %6197 = vmatpush3.bf16.msra.mxu1 %v7478_v4 }
 0x2ac   : > { %6170 = vmatprep.subr.bf16.mxu0 %v7418_v48  ;;  %6198 = vmatprep.subr.bf16.mxu1 %v8867_v15 }
 0x2af   : > { %6172 = vmatpush1.bf16.msra.mxu0 %v7444_v57  ;;  %6200 = vmatpush3.bf16.msra.mxu1 %v7506_v13 }
 0x2b0   : > { %6174 = vmatprep.subr.bf16.mxu0 %v7453_v60  ;;  %6201 = vmatprep.subr.bf16.mxu1 %v8867_v15 }
 0x2b3   : > { %6176 = vmatpush1.bf16.msra.mxu0 %v7472_v2  ;;  %6203 = vmatpush3.bf16.msra.mxu1 %v8871_v19 }
 0x2b4   : > { %6178 = vmatprep.subr.bf16.mxu0 %v8872_v23  ;;  %6204 = vmatprep.subr.bf16.mxu1 %v8867_v15 }
 0x2b7   : > { %6180 = vmatpush1.bf16.msra.mxu0 %v8873_v10  ;;  %6206 = vmatpush3.bf16.msra.mxu1 %v8874_v6 }
 0x2b8   : > { %6182 = vmatprep.subr.bf16.mxu0 %v8875_v3  ;;  %6207 = vmatprep.subr.bf16.mxu1 %v8867_v15 }
 0x2bb   : > { %6184 = vmatpush1.bf16.msra.mxu0 %v8876_v14  ;;  %6209 = vmatpush3.bf16.msra.mxu1 %v8877_v31 }
 0x2bc   : > { %6186 = vmatprep.subr.bf16.mxu0 %v8878_v7  ;;  %6210 = vmatprep.subr.bf16.mxu1 %v8867_v15 }
 0x2bf   : > { %6188 = vmatpush1.bf16.msra.mxu0 %v8879_v58  ;;  %6212 = vmatpush3.bf16.msra.mxu1 %v8880_v16 }
 0x2c0   : > { %6214 = vmatprep.subr.bf16.mxu0 %v8881_v9  ;;  %6245 = vmatprep.subr.bf16.mxu1 %v8867_v15 }
 0x375   : > { %v1664_v29 = vpop.f32.mrb[4].mxu0  ;;  %v1735_v25 = vpop.f32.mrb[4].mxu1 }
 0x376   : > { %v1740_v42 = vcombine.high %v1664_v29, %v1664_v29  ;;  %v1747_v30 = vrot.slane %v1664_v29, %v7620_v50  ;;  %v1666_v52 = vpop.f32.mrb[5].mxu0  ;;  %v5813_v37 = vpop.f32.mrb[5].mxu1 }
 0x377   : > { %v1885_v0 = vrot.slane %v1666_v52, %v7620_v50 }
 0x378   : > { %v1754_v5 = vrot.slane %v1740_v42, %v7620_v50  ;;  %v1755_v61 = vcombine.high %v1747_v30, %v1747_v30  ;;  %v1763_v36 = vrot.slane %v1747_v30, %v7620_v50  ;;  %v1878_v42 = vcombine.high %v1666_v52, %v1666_v52 }
 0x379   : > { %v1893_v58 = vcombine.high %v1885_v0, %v1885_v0  ;;  %v1901_v52 = vrot.slane %v1885_v0, %v7620_v50  ;;  %v7987_v0 = vld [vmem:[%s8825_s2] ss:$0 sm:$0xff] }
 0x37a   : > { %v1756_v62 = vcombine.high %v1754_v5, %v1754_v5  ;;  %v1770_v43 = vrot.slane %v1754_v5, %v7620_v50  ;;  %v1777_v53 = vrot.slane %v1755_v61, %v7620_v50  ;;  %v1785_v28 = vcombine.high %v1763_v36, %v1763_v36  ;;  %8882 = vst [vmem:[#allocation16_spill] sm:$0xff] %v7987_v0 }
 0x37b   : > { %v1797_v32 = vadd.f32 %v7942_v47, %v1763_v36 }
 0x37c   : > { %v1784_v55 = vrot.slane %v1756_v62, %v7620_v50  ;;  %v1786_v12 = vcombine.high %v1770_v43, %v1770_v43  ;;  %v1787_v8 = vcombine.high %v1777_v53, %v1777_v53  ;;  %v1798_v44 = vadd.f32 %v7947_v33, %v1777_v53 }
 0x37d   : > { %v1799_v49 = vadd.f32 %v7950_v21, %v1785_v28  ;;  %v1801_v27 = vadd.f32 %v7956_v11, %v1770_v43  ;;  %v5430_v29 = vmul.f32 -1.442695, %v1797_v32  ;;  %v1861_v43 = vrot.slane %v7942_v47, 1 }
 0x37e   : > { %v1788_v30 = vcombine.high %v1784_v55, %v1784_v55  ;;  %v1800_v37 = vadd.f32 %v7953_v24, %v1787_v8  ;;  %v1802_v5 = vadd.f32 %v7961_v26, %v1784_v55  ;;  %v1803_v61 = vadd.f32 %v7964_v51, %v1786_v12 }
 0x37f   : > { %6663 = vpow2.f32 %v5430_v29  ;;  %v5431_v36 = vmul.f32 -1.442695, %v1798_v44  ;;  %v5432_v62 = vmul.f32 -1.442695, %v1799_v49  ;;  %v5434_v16 = vmul.f32 -1.442695, %v1801_v27 }
 0x380   : > { %v1804_v53 = vadd.f32 %v7971_v39, %v1788_v30  ;;  %v5433_v9 = vmul.f32 -1.442695, %v1800_v37  ;;  %v5435_v28 = vmul.f32 -1.442695, %v1802_v5  ;;  %v5436_v32 = vmul.f32 -1.442695, %v1803_v61 }
 0x381   : > { %6665 = vpow2.f32 %v5431_v36  ;;  %v1892_v55 = vrot.slane %v1878_v42, %v7620_v50  ;;  %v1862_v8 = vrot.slane %v7947_v33, 1  ;;  %v1915_v44 = vrot.slane %v1893_v58, %v7620_v50 }
 0x382   : > { %6667 = vpow2.f32 %v5432_v62  ;;  %v5437_v12 = vmul.f32 -1.442695, %v1804_v53  ;;  %v1935_v49 = vadd.f32 %v1901_v52, %v1861_v43  ;;  %v1991_v29 = vadd.f32 %v7987_v0, %v1735_v25 }
 0x383   : > { %6669 = vpow2.f32 %v5433_v9  ;;  %v1894_v27 = vcombine.high %v1892_v55, %v1892_v55  ;;  %v1936_v42 = vadd.f32 %v1915_v44, %v1862_v8  ;;  %v1863_v9 = vrot.slane %v7950_v21, 1 }
 0x384   : > { %6671 = vpow2.f32 %v5434_v16  ;;  %v1865_v30 = vrot.slane %v7956_v11, 1  ;;  %v1908_v58 = vrot.slane %v1892_v55, %v7620_v50  ;;  %v1923_v37 = vcombine.high %v1901_v52, %v1901_v52 }
 0x385   : > { %6673 = vpow2.f32 %v5435_v28  ;;  %v5438_v5 = vmul.f32 -1.442695, %v1935_v49  ;;  %v5439_v61 = vmul.f32 -1.442695, %v1936_v42  ;;  %v1864_v62 = vrot.slane %v7953_v24, 1 }
 0x386   : > { %6675 = vpow2.f32 %v5436_v32  ;;  %v1922_v53 = vrot.slane %v1894_v27, %v7620_v50  ;;  %v1925_v28 = vcombine.high %v1915_v44, %v1915_v44  ;;  %v1993_v32 = vcombine.high %v1991_v29, %v1991_v29 }
 0x387   : > { %6677 = vpow2.f32 %v5437_v12  ;;  %v1866_v25 = vrot.slane %v7961_v26, 1  ;;  %v1867_v12 = vrot.slane %v7964_v51, 1  ;;  %v2000_v52 = vrot.slane %v1991_v29, %v7620_v50 }
 0x388   : > { %6679 = vpow2.f32 %v5438_v5  ;;  %v1868_v55 = vrot.slane %v7971_v39, 1  ;;  %v1937_v7 = vadd.f32 %v1923_v37, %v1863_v9  ;;  %v1926_v31 = vcombine.high %v1922_v53, %v1922_v53 }
 0x389   : > { %v6664_v16 = vpop.eup %6663  ;;  %v1938_v14 = vadd.f32 %v1925_v28, %v1864_v62  ;;  %v2007_v5 = vrot.slane %v1993_v32, %v7620_v50  ;;  %v2008_v10 = vcombine.high %v2000_v52, %v2000_v52  ;;  %v1940_v23 = vadd.f32 %v1922_v53, %v1866_v25 }
 0x38a   : > { %v1829_v36 = vadd.f32 1.0, %v6664_v16  ;;  %v1924_v16 = vcombine.high %v1908_v58, %v1908_v58  ;;  %v5440_v37 = vmul.f32 -1.442695, %v1937_v7  ;;  %v2058_v28 = vrot.slane %v7942_v47, 2 }
 0x38b   : > { %v6666_v43 = vpop.eup %6665  ;;  %v5441_v62 = vmul.f32 -1.442695, %v1938_v14  ;;  %v2059_v53 = vrot.slane %v7947_v33, 2 }
 0x38c   : > { %v6668_v8 = vpop.eup %6667  ;;  %v1830_v0 = vadd.f32 1.0, %v6666_v43  ;;  %6681 = vrcp.f32 %v1829_v36  ;;  %v1939_v36 = vadd.f32 %v1908_v58, %v1865_v30  ;;  %v1941_v9 = vadd.f32 %v1924_v16, %v1867_v12 }
 0x38d   : > { %v6670_v49 = vpop.eup %6669  ;;  %v1831_v42 = vadd.f32 1.0, %v6668_v8  ;;  %6683 = vpow2.f32 %v5439_v61  ;;  %v2009_v30 = vcombine.high %v2007_v5, %v2007_v5  ;;  %v5443_v58 = vmul.f32 -1.442695, %v1940_v23 }
 0x38e   : > { %v6672_v44 = vpop.eup %6671  ;;  %v1832_v27 = vadd.f32 1.0, %v6670_v49  ;;  %6685 = vrcp.f32 %v1830_v0  ;;  %v1942_v0 = vadd.f32 %v1926_v31, %v1868_v55  ;;  %v5442_v49 = vmul.f32 -1.442695, %v1939_v36 }
 0x38f   : > { %v6674_v3 = vpop.eup %6673  ;;  %v1833_v6 = vadd.f32 1.0, %v6672_v44  ;;  %6687 = vrcp.f32 %v1831_v42  ;;  %v5444_v7 = vmul.f32 -1.442695, %v1941_v9  ;;  %v2060_v31 = vrot.slane %v7950_v21, 2 }
 0x390   : > { %v6676_v43 = vpop.eup %6675  ;;  %v1834_v29 = vadd.f32 1.0, %v6674_v3  ;;  %6689 = vrcp.f32 %v1832_v27  ;;  %v2016_v3 = vrot.slane %v2000_v52, %v7620_v50  ;;  %v5445_v14 = vmul.f32 -1.442695, %v1942_v0 }
 0x391   : > { %v6678_v8 = vpop.eup %6677  ;;  %v1835_v19 = vadd.f32 1.0, %v6676_v43  ;;  %6691 = vrcp.f32 %v1833_v6  ;;  %v2030_v6 = vrot.slane %v2008_v10, %v7620_v50  ;;  %v2062_v12 = vrot.slane %v7956_v11, 2 }
 0x392   : > { %v1836_v61 = vadd.f32 1.0, %v6678_v8  ;;  %6693 = vrcp.f32 %v1834_v29  ;;  %v6680_v32 = vpop.eup %6679  ;;  %v2023_v52 = vrot.slane %v2007_v5, %v7620_v50  ;;  %v2037_v33 = vrot.slane %v2009_v30, %v7620_v50 }
 0x393   : > { %6695 = vrcp.f32 %v1835_v19  ;;  %v2061_v19 = vrot.slane %v7953_v24, 2  ;;  %v2038_v10 = vcombine.high %v2016_v3, %v2016_v3  ;;  %v1967_v42 = vadd.f32 1.0, %v6680_v32 }
 0x394   : > { %6697 = vrcp.f32 %v1836_v61  ;;  %v2040_v44 = vcombine.high %v2030_v6, %v2030_v6  ;;  %v2063_v36 = vrot.slane %v7961_v26, 2  ;;  %v2064_v11 = vrot.slane %v7964_v51, 2 }
 0x395   : > { %6699 = vpow2.f32 %v5440_v37  ;;  %v2065_v29 = vrot.slane %v7971_v39, 2  ;;  %v2039_v61 = vcombine.high %v2023_v52, %v2023_v52 }
 0x396   : > { %v6682_v25 = vpop.eup %6681  ;;  %6701 = vpow2.f32 %v5441_v62 }
 0x397   : > { %v6684_v47 = vpop.eup %6683  ;;  %v2050_v23 = vmul.f32 %v6682_v25, %v2016_v3  ;;  %6703 = vpow2.f32 %v5442_v49  ;;  %v2041_v49 = vcombine.high %v2037_v33, %v2037_v33 }
 0x398   : > { %v6686_v55 = vpop.eup %6685  ;;  %6705 = vpow2.f32 %v5443_v58  ;;  %v1968_v25 = vadd.f32 1.0, %v6684_v47 }
 0x399   : > { %v6688_v16 = vpop.eup %6687  ;;  %v2051_v21 = vmul.f32 %v6686_v55, %v2030_v6  ;;  %v2074_v27 = vadd.f32 %v2058_v28, %v2050_v23  ;;  %6707 = vpow2.f32 %v5444_v7 }
 0x39a   : > { %v6690_v24 = vpop.eup %6689  ;;  %v2052_v43 = vmul.f32 %v6688_v16, %v2038_v10  ;;  %6709 = vpow2.f32 %v5445_v14 }
 0x39b   : > { %v6692_v5 = vpop.eup %6691  ;;  %v2053_v8 = vmul.f32 %v6690_v24, %v2040_v44  ;;  %v2075_v9 = vadd.f32 %v2059_v53, %v2051_v21  ;;  %6711 = vtanh.f32 %v2074_v27 }
 0x39c   : > { %v6694_v37 = vpop.eup %6693  ;;  %v2054_v0 = vmul.f32 %v6692_v5, %v2023_v52  ;;  %v2076_v62 = vadd.f32 %v2060_v31, %v2052_v43  ;;  %6713 = vrcp.f32 %v1967_v42 }
 0x39d   : > { %v6696_v28 = vpop.eup %6695  ;;  %v2055_v30 = vmul.f32 %v6694_v37, %v2037_v33  ;;  %v2077_v3 = vadd.f32 %v2061_v19, %v2053_v8  ;;  %6715 = vtanh.f32 %v2075_v9 }
 0x39e   : > { %v6698_v26 = vpop.eup %6697  ;;  %v2056_v51 = vmul.f32 %v6696_v28, %v2039_v61  ;;  %v2078_v58 = vadd.f32 %v2062_v12, %v2054_v0  ;;  %6717 = vtanh.f32 %v2076_v62 }
 0x39f   : > { %v6700_v32 = vpop.eup %6699  ;;  %v2057_v6 = vmul.f32 %v6698_v26, %v2041_v49  ;;  %v2079_v39 = vadd.f32 %v2063_v36, %v2055_v30  ;;  %6719 = vtanh.f32 %v2077_v3 }
 0x3a0   : > { %v6702_v53 = vpop.eup %6701  ;;  %v2080_v7 = vadd.f32 %v2064_v11, %v2056_v51  ;;  %6721 = vtanh.f32 %v2078_v58  ;;  %v1969_v52 = vadd.f32 1.0, %v6700_v32 }
 0x3a1   : > { %v6704_v14 = vpop.eup %6703  ;;  %v2081_v31 = vadd.f32 %v2065_v29, %v2057_v6  ;;  %6723 = vtanh.f32 %v2079_v39  ;;  %v1970_v19 = vadd.f32 1.0, %v6702_v53 }
 0x3a2   : > { %v6706_v23 = vpop.eup %6705  ;;  %6725 = vtanh.f32 %v2080_v7  ;;  %v1971_v33 = vadd.f32 1.0, %v6704_v14 }
 0x3a3   : > { %v6708_v55 = vpop.eup %6707  ;;  %6727 = vtanh.f32 %v2081_v31  ;;  %v1972_v10 = vadd.f32 1.0, %v6706_v23 }
 0x3a4   : > { %v6710_v12 = vpop.eup %6709  ;;  %6729 = vrcp.f32 %v1968_v25  ;;  %v1973_v16 = vadd.f32 1.0, %v6708_v55 }
 0x3a5   : > { %v6712_v42 = vpop.eup %6711  ;;  %6731 = vrcp.f32 %v1969_v52  ;;  %v1974_v21 = vadd.f32 1.0, %v6710_v12 }
 0x3a6   : > { %v6714_v44 = vpop.eup %6713  ;;  %6733 = vrcp.f32 %v1970_v19 }
 0x3a7   : > { %v6716_v47 = vpop.eup %6715  ;;  %6735 = vrcp.f32 %v1971_v33  ;;  %v2090_v27 = vsub.f32 1.0, %v6714_v44  ;;  %v2106_v11 = vmul.f32 %v6714_v44, %v7852_v56 }
 0x3a8   : > { %v6718_v24 = vpop.eup %6717  ;;  %6737 = vrcp.f32 %v1972_v10 }
 0x3a9   : > { %v6720_v36 = vpop.eup %6719  ;;  %6739 = vrcp.f32 %v1973_v16  ;;  %v2098_v43 = vmul.f32 %v6712_v42, %v2090_v27 }
 0x3aa   : > { %v6722_v5 = vpop.eup %6721  ;;  %6741 = vrcp.f32 %v1974_v21 }
 0x3ab   : > { %v6724_v29 = vpop.eup %6723  ;;  %v8013_v8 = vadd.f32 %v2106_v11, %v2098_v43 }
 0x3ac   : > { %v6726_v9 = vpop.eup %6725 }
 0x3ad   : > { %v6728_v37 = vpop.eup %6727  ;;  %2122 = vst [vmem:[%s7349_s25 + $0x2] sm:$0x1] %v8013_v8 }
 0x3ae   : > { %v6730_v61 = vpop.eup %6729 }
 0x3af   : > { %v6732_v0 = vpop.eup %6731  ;;  %v2091_v62 = vsub.f32 1.0, %v6730_v61  ;;  %v2107_v56 = vmul.f32 %v6730_v61, %v7859_v22 }
 0x3b0   : > { %v6734_v28 = vpop.eup %6733  ;;  %v2092_v49 = vsub.f32 1.0, %v6732_v0  ;;  %v2108_v6 = vmul.f32 %v6732_v0, %v7862_v20  ;;  %v8883_v0 = vld [vmem:[#allocation10_spill] sm:$0xff] }
 0x3b1   : > { %v6736_v30 = vpop.eup %6735  ;;  %v2093_v3 = vsub.f32 1.0, %v6734_v28  ;;  %v2099_v26 = vmul.f32 %v6716_v47, %v2091_v62  ;;  %v2109_v25 = vmul.f32 %v6734_v28, %v7865_v17  ;;  %v8884_v62 = vld [vmem:[#allocation6_spill] sm:$0xff]  ;;  %v8885_v28 = vld [vmem:[#allocation7_spill] sm:$0xff] }
 0x3b2   : > { %v6738_v51 = vpop.eup %6737  ;;  %v2094_v58 = vsub.f32 1.0, %v6736_v30  ;;  %v2100_v32 = vmul.f32 %v6718_v24, %v2092_v49  ;;  %v2110_v22 = vmul.f32 %v6736_v30, %v7871_v45  ;;  %v8886_v49 = vld [vmem:[#allocation13_spill] sm:$0xff]  ;;  %v8887_v30 = vld [vmem:[#allocation8_spill] sm:$0xff] }
 0x3b3   : > { %v6740_v39 = vpop.eup %6739  ;;  %v2095_v53 = vsub.f32 1.0, %v6738_v51  ;;  %v2101_v7 = vmul.f32 %v6720_v36, %v2093_v3  ;;  %v8020_v14 = vadd.f32 %v2107_v56, %v2099_v26  ;;  %v2111_v20 = vmul.f32 %v6738_v51, %v7875_v18  ;;  %v8888_v3 = vld [vmem:[#allocation9_spill] sm:$0xff]  ;;  %v8889_v26 = vld [vmem:[#allocation14_spill] sm:$0xff]  ;;  %v8890_v56 = vld [vmem:[#allocation11_spill] sm:$0xff] }
 0x3b4   : > { %v6742_v31 = vpop.eup %6741  ;;  %v2096_v52 = vsub.f32 1.0, %v6740_v39  ;;  %v2102_v23 = vmul.f32 %v6722_v5, %v2094_v58  ;;  %v8023_v19 = vadd.f32 %v2108_v6, %v2100_v32  ;;  %v2112_v10 = vmul.f32 %v6740_v39, %v7883_v63  ;;  %v8891_v51 = vld [vmem:[#allocation12_spill] sm:$0xff]  ;;  %v8892_v58 = vld [vmem:[#allocation15_spill] sm:$0xff]  ;;  %v8893_v32 = vld [vmem:[#allocation5_spill] sm:$0xff] }
 0x3b5   : > { %v2097_v55 = vsub.f32 1.0, %v6742_v31  ;;  %v2103_v33 = vmul.f32 %v6724_v29, %v2095_v53  ;;  %v8026_v12 = vadd.f32 %v2109_v25, %v2101_v7  ;;  %2123 = vst [vmem:[%s7349_s25 + $0xa] sm:$0x1] %v8020_v14  ;;  %v2113_v42 = vmul.f32 %v6742_v31, %v7887_v1 }
 0x3b6   : > { %v2104_v17 = vmul.f32 %v6726_v9, %v2096_v52  ;;  %v8032_v45 = vadd.f32 %v2110_v22, %v2102_v23  ;;  %2124 = vst [vmem:[%s7349_s25 + $0x12] sm:$0x1] %v8023_v19  ;;  %v2154_v18 = vcombine.low %v8013_v8, %v8020_v14  ;;  %v8103_v52 = vld [vmem:[%s7347_s24 + $0x3] ss:$8 sm:$0x7] }
 0x3b7   : > { %v2105_v16 = vmul.f32 %v6728_v37, %v2097_v55  ;;  %v8036_v44 = vadd.f32 %v2111_v20, %v2103_v33  ;;  %2125 = vst [vmem:[%s7349_s25 + $0x1a] sm:$0x1] %v8026_v12  ;;  %v2155_v21 = vcombine.low %v8023_v19, %v8026_v12  ;;  %v8108_v33 = vld [vmem:[%s7347_s24 + $0x1b] ss:$8 sm:$0x7] }
 0x3b8   : > { %v8044_v47 = vadd.f32 %v2112_v10, %v2104_v17  ;;  %2126 = vst [vmem:[%s7349_s25 + $0x22] sm:$0x1] %v8032_v45  ;;  %v2164_v36 = vrot.slane %v2154_v18, %v7620_v50  ;;  %v8111_v20 = vld [vmem:[%s7347_s24 + $0x33] ss:$8 sm:$0x7] }
 0x3b9   : > { %v8048_v63 = vadd.f32 %v2113_v42, %v2105_v16  ;;  %2127 = vst [vmem:[%s7349_s25 + $0x2a] sm:$0x1] %v8036_v44  ;;  %v2156_v1 = vcombine.low %v8032_v45, %v8036_v44  ;;  %v2171_v27 = vrot.slane %v2155_v21, %v7620_v50  ;;  %v8114_v17 = vld [vmem:[%s7347_s24 + $0x4b] ss:$8 sm:$0x7] }
 0x3ba   : > { %2128 = vst [vmem:[%s7349_s25 + $0x32] sm:$0x1] %v8044_v47  ;;  %v8117_v10 = vld [vmem:[%s7347_s24 + $0x63] ss:$8 sm:$0x7] }
 0x3bb   : > { %2129 = vst [vmem:[%s7349_s25 + $0x3a] sm:$0x1] %v8048_v63  ;;  %v2157_v24 = vcombine.low %v8044_v47, %v8048_v63  ;;  %v2178_v11 = vrot.slane %v2156_v1, %v7620_v50  ;;  %v2186_v5 = vcombine.low %v2164_v36, %v2171_v27  ;;  %v8122_v1 = vld [vmem:[%s7347_s24 + $0x7b] ss:$8 sm:$0x7] }
 0x3bc   : > { %v8125_v27 = vld [vmem:[%s7347_s24 + $0x93] ss:$8 sm:$0x7] }
 0x3bd   : > { %v2185_v43 = vrot.slane %v2157_v24, %v7620_v50  ;;  %v2194_v9 = vrot.slane %v2186_v5, %v7620_v50 }
 0x3bf   : > { %v2187_v29 = vcombine.low %v2178_v11, %v2185_v43 }
 0x3c1   : > { %v2201_v37 = vrot.slane %v2187_v29, %v7620_v50 }
 0x3c3   : > { %v2202_v61 = vcombine.low %v2194_v9, %v2201_v37  ;;  %v8132_v9 = vld [vmem:[%s7347_s24 + $0xab] ss:$8 sm:$0x7] }
 0x3c5   : > { %2269 = vmatmul.mubr.f32.vlgmr.msra.gmra.mrb[6].mxu0 %v2202_v61  ;;  %5847 = vmatmul.mubr.f32.vlgmr.msra.gmra.mrb[6].mxu1 %v2202_v61 }
 0x3c6   : > { %6216 = vmatpush1.bf16.msra.mxu0 %v7374_v34  ;;  %6247 = vmatpush3.bf16.msra.mxu1 %v7435_v54 }
 0x3c7   : > { %6218 = vmatprep.subr.bf16.mxu0 %v7376_v35  ;;  %6248 = vmatprep.subr.bf16.mxu1 %v8867_v15 }
 0x3c8   : > { %2874 = vmatprep.mubr.f32.mxu0 %v8868_v38  ;;  %5881 = vmatprep.mubr.msk.f32.mxu1 %vm7205_vm0, %v8868_v38 }
 0x3ca   : > { %6220 = vmatpush1.bf16.msra.mxu0 %v7394_v40  ;;  %6250 = vmatpush3.bf16.msra.mxu1 %v7450_v59 }
 0x3cb   : > { %6222 = vmatprep.subr.bf16.mxu0 %v7397_v41  ;;  %6251 = vmatprep.subr.bf16.mxu1 %v8867_v15 }
 0x3ce   : > { %6224 = vmatpush1.bf16.msra.mxu0 %v7412_v46  ;;  %6253 = vmatpush3.bf16.msra.mxu1 %v7478_v4 }
 0x3cf   : > { %6226 = vmatprep.subr.bf16.mxu0 %v7418_v48  ;;  %6254 = vmatprep.subr.bf16.mxu1 %v8867_v15 }
 0x3d2   : > { %6228 = vmatpush1.bf16.msra.mxu0 %v7444_v57  ;;  %6256 = vmatpush3.bf16.msra.mxu1 %v7506_v13 }
 0x3d3   : > { %6230 = vmatprep.subr.bf16.mxu0 %v7453_v60  ;;  %6257 = vmatprep.subr.bf16.mxu1 %v8867_v15 }
 0x3d6   : > { %6232 = vmatpush1.bf16.msra.mxu0 %v7472_v2  ;;  %6259 = vmatpush3.bf16.msra.mxu1 %v8883_v0 }
 0x3d7   : > { %6234 = vmatprep.subr.bf16.mxu0 %v8884_v62  ;;  %6260 = vmatprep.subr.bf16.mxu1 %v8867_v15 }
 0x3da   : > { %6236 = vmatpush1.bf16.msra.mxu0 %v8885_v28  ;;  %6262 = vmatpush3.bf16.msra.mxu1 %v8886_v49 }
 0x3db   : > { %6238 = vmatprep.subr.bf16.mxu0 %v8887_v30  ;;  %6263 = vmatprep.subr.bf16.mxu1 %v8867_v15 }
 0x3de   : > { %6240 = vmatpush1.bf16.msra.mxu0 %v8888_v3  ;;  %6265 = vmatpush3.bf16.msra.mxu1 %v8889_v26 }
 0x3df   : > { %6242 = vmatprep.subr.bf16.mxu0 %v8890_v56  ;;  %6266 = vmatprep.subr.bf16.mxu1 %v8867_v15 }
 0x3e2   : > { %6244 = vmatpush1.bf16.msra.mxu0 %v8891_v51  ;;  %6268 = vmatpush3.bf16.msra.mxu1 %v8892_v58 }
 0x3e3   : > { %6270 = vmatprep.subr.bf16.mxu0 %v8893_v32  ;;  %6301 = vmatprep.subr.bf16.mxu1 %v8867_v15 }
 0x498   : > { %v2270_v6 = vpop.f32.mrb[6].mxu0  ;;  %v2341_v39 = vpop.f32.mrb[6].mxu1 }
 0x499   : > { %v2346_v53 = vcombine.high %v2270_v6, %v2270_v6  ;;  %v2353_v7 = vrot.slane %v2270_v6, %v7620_v50  ;;  %v2272_v25 = vpop.f32.mrb[7].mxu0  ;;  %v5848_v31 = vpop.f32.mrb[7].mxu1 }
 0x49a   : > { %v2491_v36 = vrot.slane %v2272_v25, %v7620_v50 }
 0x49b   : > { %v2360_v23 = vrot.slane %v2346_v53, %v7620_v50  ;;  %v2361_v22 = vcombine.high %v2353_v7, %v2353_v7  ;;  %v2369_v55 = vrot.slane %v2353_v7, %v7620_v50  ;;  %v2484_v53 = vcombine.high %v2272_v25, %v2272_v25 }
 0x49c   : > { %v2499_v51 = vcombine.high %v2491_v36, %v2491_v36  ;;  %v2507_v25 = vrot.slane %v2491_v36, %v7620_v50  ;;  %v2469_v36 = vrot.slane %v8111_v20, 1 }
 0x49d   : > { %v2362_v42 = vcombine.high %v2360_v23, %v2360_v23  ;;  %v2376_v16 = vrot.slane %v2360_v23, %v7620_v50  ;;  %v2383_v18 = vrot.slane %v2361_v22, %v7620_v50  ;;  %v2391_v21 = vcombine.high %v2369_v55, %v2369_v55 }
 0x49e   : > { %v2403_v24 = vadd.f32 %v8103_v52, %v2369_v55 }
 0x49f   : > { %v2390_v11 = vrot.slane %v2362_v42, %v7620_v50  ;;  %v2392_v43 = vcombine.high %v2376_v16, %v2376_v16  ;;  %v2393_v5 = vcombine.high %v2383_v18, %v2383_v18  ;;  %v2404_v29 = vadd.f32 %v8108_v33, %v2383_v18 }
 0x4a0   : > { %v2405_v37 = vadd.f32 %v8111_v20, %v2391_v21  ;;  %v2407_v61 = vadd.f32 %v8117_v10, %v2376_v16  ;;  %v5454_v6 = vmul.f32 -1.442695, %v2403_v24  ;;  %v2467_v16 = vrot.slane %v8103_v52, 1 }
 0x4a1   : > { %v2394_v7 = vcombine.high %v2390_v11, %v2390_v11  ;;  %v2406_v31 = vadd.f32 %v8114_v17, %v2393_v5  ;;  %v2408_v23 = vadd.f32 %v8122_v1, %v2390_v11  ;;  %v2409_v22 = vadd.f32 %v8125_v27, %v2392_v43 }
 0x4a2   : > { %6743 = vpow2.f32 %v5454_v6  ;;  %v5455_v55 = vmul.f32 -1.442695, %v2404_v29  ;;  %v5456_v42 = vmul.f32 -1.442695, %v2405_v37  ;;  %v5458_v58 = vmul.f32 -1.442695, %v2407_v61 }
 0x4a3   : > { %v2410_v18 = vadd.f32 %v8132_v9, %v2394_v7  ;;  %v5457_v32 = vmul.f32 -1.442695, %v2406_v31  ;;  %v5459_v21 = vmul.f32 -1.442695, %v2408_v23  ;;  %v5460_v24 = vmul.f32 -1.442695, %v2409_v22 }
 0x4a4   : > { %6745 = vpow2.f32 %v5455_v55  ;;  %v2498_v11 = vrot.slane %v2484_v53, %v7620_v50  ;;  %v2468_v5 = vrot.slane %v8108_v33, 1  ;;  %v2521_v29 = vrot.slane %v2499_v51, %v7620_v50  ;;  %v8894_v6 = vld [vmem:[#allocation16_spill] sm:$0xff] }
 0x4a5   : > { %6747 = vpow2.f32 %v5456_v42  ;;  %v5461_v43 = vmul.f32 -1.442695, %v2410_v18  ;;  %v2541_v37 = vadd.f32 %v2507_v25, %v2467_v16  ;;  %v2597_v7 = vadd.f32 %v8894_v6, %v2341_v39 }
 0x4a6   : > { %6749 = vpow2.f32 %v5457_v32  ;;  %v2500_v61 = vcombine.high %v2498_v11, %v2498_v11  ;;  %v2542_v31 = vadd.f32 %v2521_v29, %v2468_v5  ;;  %v2471_v23 = vrot.slane %v8117_v10, 1 }
 0x4a7   : > { %6751 = vpow2.f32 %v5458_v58  ;;  %v2514_v32 = vrot.slane %v2498_v11, %v7620_v50  ;;  %v2529_v22 = vcombine.high %v2507_v25, %v2507_v25  ;;  %v5462_v55 = vmul.f32 -1.442695, %v2541_v37 }
 0x4a8   : > { %6753 = vpow2.f32 %v5459_v21  ;;  %v5463_v58 = vmul.f32 -1.442695, %v2542_v31  ;;  %v2470_v51 = vrot.slane %v8114_v17, 1  ;;  %v2528_v18 = vrot.slane %v2500_v61, %v7620_v50 }
 0x4a9   : > { %6755 = vpow2.f32 %v5460_v24  ;;  %v2531_v21 = vcombine.high %v2521_v29, %v2521_v29  ;;  %v2599_v24 = vcombine.high %v2597_v7, %v2597_v7  ;;  %v2472_v39 = vrot.slane %v8122_v1, 1 }
 0x4aa   : > { %6757 = vpow2.f32 %v5461_v43  ;;  %v2473_v43 = vrot.slane %v8125_v27, 1  ;;  %v2606_v25 = vrot.slane %v2597_v7, %v7620_v50  ;;  %v2474_v11 = vrot.slane %v8132_v9, 1 }
 0x4ab   : > { %6759 = vpow2.f32 %v5462_v55  ;;  %v2543_v56 = vadd.f32 %v2529_v22, %v2469_v36  ;;  %v2532_v26 = vcombine.high %v2528_v18, %v2528_v18  ;;  %v2544_v3 = vadd.f32 %v2531_v21, %v2470_v51 }
 0x4ac   : > { %v6744_v53 = vpop.eup %6743  ;;  %v2613_v55 = vrot.slane %v2599_v24, %v7620_v50  ;;  %v2614_v28 = vcombine.high %v2606_v25, %v2606_v25  ;;  %v2546_v62 = vadd.f32 %v2528_v18, %v2472_v39  ;;  %v2664_v21 = vrot.slane %v8103_v52, 2 }
 0x4ad   : > { %v2435_v42 = vadd.f32 1.0, %v6744_v53  ;;  %v2530_v53 = vcombine.high %v2514_v32, %v2514_v32  ;;  %v5464_v22 = vmul.f32 -1.442695, %v2543_v56  ;;  %v5465_v51 = vmul.f32 -1.442695, %v2544_v3 }
 0x4ae   : > { %v6746_v16 = vpop.eup %6745  ;;  %v2665_v18 = vrot.slane %v8108_v33, 2 }
 0x4af   : > { %v6748_v5 = vpop.eup %6747  ;;  %v2436_v6 = vadd.f32 1.0, %v6746_v16  ;;  %6761 = vrcp.f32 %v2435_v42  ;;  %v2545_v42 = vadd.f32 %v2514_v32, %v2471_v23  ;;  %v2547_v36 = vadd.f32 %v2530_v53, %v2473_v43 }
 0x4b0   : > { %v6750_v37 = vpop.eup %6749  ;;  %v2437_v31 = vadd.f32 1.0, %v6748_v5  ;;  %6763 = vpow2.f32 %v5463_v58  ;;  %v2615_v23 = vcombine.high %v2613_v55, %v2613_v55  ;;  %v5467_v32 = vmul.f32 -1.442695, %v2546_v62 }
 0x4b1   : > { %v6752_v29 = vpop.eup %6751  ;;  %v2438_v61 = vadd.f32 1.0, %v6750_v37  ;;  %6765 = vrcp.f32 %v2436_v6  ;;  %v2548_v6 = vadd.f32 %v2532_v26, %v2474_v11  ;;  %v5466_v37 = vmul.f32 -1.442695, %v2545_v42 }
 0x4b2   : > { %v6754_v30 = vpop.eup %6753  ;;  %v2439_v49 = vadd.f32 1.0, %v6752_v29  ;;  %6767 = vrcp.f32 %v2437_v31  ;;  %v5468_v56 = vmul.f32 -1.442695, %v2547_v36  ;;  %v2666_v26 = vrot.slane %v8111_v20, 2 }
 0x4b3   : > { %v6756_v16 = vpop.eup %6755  ;;  %v2440_v7 = vadd.f32 1.0, %v6754_v30  ;;  %6769 = vrcp.f32 %v2438_v61  ;;  %v2622_v30 = vrot.slane %v2606_v25, %v7620_v50  ;;  %v5469_v3 = vmul.f32 -1.442695, %v2548_v6 }
 0x4b4   : > { %v6758_v5 = vpop.eup %6757  ;;  %v2441_v0 = vadd.f32 1.0, %v6756_v16  ;;  %6771 = vrcp.f32 %v2439_v49  ;;  %v2636_v49 = vrot.slane %v2614_v28, %v7620_v50  ;;  %v2668_v43 = vrot.slane %v8117_v10, 2 }
 0x4b5   : > { %v2442_v58 = vadd.f32 1.0, %v6758_v5  ;;  %6773 = vrcp.f32 %v2440_v7  ;;  %v6760_v24 = vpop.eup %6759  ;;  %v2629_v25 = vrot.slane %v2613_v55, %v7620_v50  ;;  %v2643_v33 = vrot.slane %v2615_v23, %v7620_v50 }
 0x4b6   : > { %6775 = vrcp.f32 %v2441_v0  ;;  %v2667_v0 = vrot.slane %v8114_v17, 2  ;;  %v2644_v28 = vcombine.high %v2622_v30, %v2622_v30  ;;  %v2573_v31 = vadd.f32 1.0, %v6760_v24 }
 0x4b7   : > { %6777 = vrcp.f32 %v2442_v58  ;;  %v2646_v29 = vcombine.high %v2636_v49, %v2636_v49  ;;  %v2669_v42 = vrot.slane %v8122_v1, 2  ;;  %v2670_v10 = vrot.slane %v8125_v27, 2 }
 0x4b8   : > { %6779 = vpow2.f32 %v5464_v22  ;;  %v2671_v7 = vrot.slane %v8132_v9, 2  ;;  %v2645_v58 = vcombine.high %v2629_v25, %v2629_v25 }
 0x4b9   : > { %v6762_v39 = vpop.eup %6761  ;;  %6781 = vpow2.f32 %v5465_v51 }
 0x4ba   : > { %v6764_v52 = vpop.eup %6763  ;;  %v2656_v62 = vmul.f32 %v6762_v39, %v2622_v30  ;;  %6783 = vpow2.f32 %v5466_v37  ;;  %v2647_v37 = vcombine.high %v2643_v33, %v2643_v33 }
 0x4bb   : > { %v6766_v11 = vpop.eup %6765  ;;  %6785 = vpow2.f32 %v5467_v32  ;;  %v2574_v39 = vadd.f32 1.0, %v6764_v52 }
 0x4bc   : > { %v6768_v53 = vpop.eup %6767  ;;  %v2657_v20 = vmul.f32 %v6766_v11, %v2636_v49  ;;  %v2680_v61 = vadd.f32 %v2664_v21, %v2656_v62  ;;  %6787 = vpow2.f32 %v5468_v56 }
 0x4bd   : > { %v6770_v17 = vpop.eup %6769  ;;  %v2658_v16 = vmul.f32 %v6768_v53, %v2644_v28  ;;  %6789 = vpow2.f32 %v5469_v3 }
 0x4be   : > { %v6772_v55 = vpop.eup %6771  ;;  %v2659_v5 = vmul.f32 %v6770_v17, %v2646_v29  ;;  %v2681_v36 = vadd.f32 %v2665_v18, %v2657_v20  ;;  %6791 = vtanh.f32 %v2680_v61 }
 0x4bf   : > { %v6774_v22 = vpop.eup %6773  ;;  %v2660_v6 = vmul.f32 %v6772_v55, %v2629_v25  ;;  %v2682_v51 = vadd.f32 %v2666_v26, %v2658_v16  ;;  %6793 = vrcp.f32 %v2573_v31 }
 0x4c0   : > { %v6776_v21 = vpop.eup %6775  ;;  %v2661_v23 = vmul.f32 %v6774_v22, %v2643_v33  ;;  %v2683_v30 = vadd.f32 %v2667_v0, %v2659_v5  ;;  %6795 = vtanh.f32 %v2681_v36 }
 0x4c1   : > { %v6778_v1 = vpop.eup %6777  ;;  %v2662_v27 = vmul.f32 %v6776_v21, %v2645_v58  ;;  %v2684_v32 = vadd.f32 %v2668_v43, %v2660_v6  ;;  %6797 = vtanh.f32 %v2682_v51 }
 0x4c2   : > { %v6780_v24 = vpop.eup %6779  ;;  %v2663_v49 = vmul.f32 %v6778_v1, %v2647_v37  ;;  %v2685_v9 = vadd.f32 %v2669_v42, %v2661_v23  ;;  %6799 = vtanh.f32 %v2683_v30 }
 0x4c3   : > { %v6782_v18 = vpop.eup %6781  ;;  %v2686_v56 = vadd.f32 %v2670_v10, %v2662_v27  ;;  %6801 = vtanh.f32 %v2684_v32  ;;  %v2575_v25 = vadd.f32 1.0, %v6780_v24 }
 0x4c4   : > { %v6784_v3 = vpop.eup %6783  ;;  %v2687_v26 = vadd.f32 %v2671_v7, %v2663_v49  ;;  %6803 = vtanh.f32 %v2685_v9  ;;  %v2576_v0 = vadd.f32 1.0, %v6782_v18 }
 0x4c5   : > { %v6786_v62 = vpop.eup %6785  ;;  %6805 = vtanh.f32 %v2686_v56  ;;  %v2577_v33 = vadd.f32 1.0, %v6784_v3 }
 0x4c6   : > { %v6788_v11 = vpop.eup %6787  ;;  %6807 = vtanh.f32 %v2687_v26  ;;  %v2578_v28 = vadd.f32 1.0, %v6786_v62 }
 0x4c7   : > { %v6790_v43 = vpop.eup %6789  ;;  %6809 = vrcp.f32 %v2574_v39  ;;  %v2579_v53 = vadd.f32 1.0, %v6788_v11 }
 0x4c8   : > { %v6792_v31 = vpop.eup %6791  ;;  %6811 = vrcp.f32 %v2575_v25  ;;  %v2580_v20 = vadd.f32 1.0, %v6790_v43 }
 0x4c9   : > { %v6794_v29 = vpop.eup %6793  ;;  %6813 = vrcp.f32 %v2576_v0 }
 0x4ca   : > { %v6796_v52 = vpop.eup %6795  ;;  %6815 = vrcp.f32 %v2577_v33  ;;  %v2696_v61 = vsub.f32 1.0, %v6794_v29  ;;  %v2712_v10 = vmul.f32 %v6794_v29, %v8013_v8 }
 0x4cb   : > { %v6798_v17 = vpop.eup %6797  ;;  %6817 = vrcp.f32 %v2578_v28 }
 0x4cc   : > { %v6800_v42 = vpop.eup %6799  ;;  %6819 = vrcp.f32 %v2579_v53  ;;  %v2704_v16 = vmul.f32 %v6792_v31, %v2696_v61 }
 0x4cd   : > { %v6802_v55 = vpop.eup %6801  ;;  %6821 = vrcp.f32 %v2580_v20 }
 0x4ce   : > { %v6804_v7 = vpop.eup %6803  ;;  %v8169_v5 = vadd.f32 %v2712_v10, %v2704_v16 }
 0x4cf   : > { %v6806_v36 = vpop.eup %6805 }
 0x4d0   : > { %v6808_v22 = vpop.eup %6807  ;;  %2728 = vst [vmem:[%s7349_s25 + $0x3] sm:$0x1] %v8169_v5 }
 0x4d1   : > { %v6810_v58 = vpop.eup %6809 }
 0x4d2   : > { %v6812_v6 = vpop.eup %6811  ;;  %v2697_v51 = vsub.f32 1.0, %v6810_v58  ;;  %v2713_v8 = vmul.f32 %v6810_v58, %v8020_v14 }
 0x4d3   : > { %v6814_v21 = vpop.eup %6813  ;;  %v2698_v37 = vsub.f32 1.0, %v6812_v6  ;;  %v2714_v49 = vmul.f32 %v6812_v6, %v8023_v19  ;;  %v8895_v6 = vld [vmem:[#allocation10_spill] sm:$0xff] }
 0x4d4   : > { %v6816_v23 = vpop.eup %6815  ;;  %v2699_v30 = vsub.f32 1.0, %v6814_v21  ;;  %v2705_v1 = vmul.f32 %v6796_v52, %v2697_v51  ;;  %v2715_v39 = vmul.f32 %v6814_v21, %v8026_v12  ;;  %v8896_v51 = vld [vmem:[#allocation6_spill] sm:$0xff]  ;;  %v8897_v21 = vld [vmem:[#allocation7_spill] sm:$0xff] }
 0x4d5   : > { %v6818_v27 = vpop.eup %6817  ;;  %v2700_v32 = vsub.f32 1.0, %v6816_v23  ;;  %v2706_v24 = vmul.f32 %v6798_v17, %v2698_v37  ;;  %v2716_v14 = vmul.f32 %v6816_v23, %v8032_v45  ;;  %v8898_v37 = vld [vmem:[#allocation13_spill] sm:$0xff]  ;;  %v8899_v23 = vld [vmem:[#allocation8_spill] sm:$0xff] }
 0x4d6   : > { %v6820_v9 = vpop.eup %6819  ;;  %v2701_v18 = vsub.f32 1.0, %v6818_v27  ;;  %v2707_v56 = vmul.f32 %v6800_v42, %v2699_v30  ;;  %v8176_v3 = vadd.f32 %v2713_v8, %v2705_v1  ;;  %v2717_v19 = vmul.f32 %v6818_v27, %v8036_v44  ;;  %v8900_v30 = vld [vmem:[#allocation9_spill] sm:$0xff]  ;;  %v8901_v1 = vld [vmem:[#allocation14_spill] sm:$0xff]  ;;  %v8902_v8 = vld [vmem:[#allocation11_spill] sm:$0xff] }
 0x4d7   : > { %v6822_v26 = vpop.eup %6821  ;;  %v2702_v25 = vsub.f32 1.0, %v6820_v9  ;;  %v2708_v62 = vmul.f32 %v6802_v55, %v2700_v32  ;;  %v8179_v0 = vadd.f32 %v2714_v49, %v2706_v24  ;;  %v2718_v28 = vmul.f32 %v6820_v9, %v8044_v47  ;;  %v8903_v27 = vld [vmem:[#allocation12_spill] sm:$0xff]  ;;  %v8904_v32 = vld [vmem:[#allocation15_spill] sm:$0xff]  ;;  %v8905_v24 = vld [vmem:[#allocation5_spill] sm:$0xff] }
 0x4d8   : > { %v2703_v11 = vsub.f32 1.0, %v6822_v26  ;;  %v2709_v33 = vmul.f32 %v6804_v7, %v2701_v18  ;;  %v8182_v43 = vadd.f32 %v2715_v39, %v2707_v56  ;;  %2729 = vst [vmem:[%s7349_s25 + $0xb] sm:$0x1] %v8176_v3  ;;  %v2719_v31 = vmul.f32 %v6822_v26, %v8048_v63 }
 0x4d9   : > { %v2710_v12 = vmul.f32 %v6806_v36, %v2702_v25  ;;  %v8188_v45 = vadd.f32 %v2716_v14, %v2708_v62  ;;  %2730 = vst [vmem:[%s7349_s25 + $0x13] sm:$0x1] %v8179_v0  ;;  %v2760_v44 = vcombine.low %v8169_v5, %v8176_v3  ;;  %v8259_v25 = vld [vmem:[%s7347_s24 + $0x4] ss:$8 sm:$0x7] }
 0x4da   : > { %v2711_v53 = vmul.f32 %v6808_v22, %v2703_v11  ;;  %v8192_v29 = vadd.f32 %v2717_v19, %v2709_v33  ;;  %2731 = vst [vmem:[%s7349_s25 + $0x1b] sm:$0x1] %v8182_v43  ;;  %v2761_v20 = vcombine.low %v8179_v0, %v8182_v43  ;;  %v8264_v33 = vld [vmem:[%s7347_s24 + $0x1c] ss:$8 sm:$0x7] }
 0x4db   : > { %v8200_v52 = vadd.f32 %v2718_v28, %v2710_v12  ;;  %2732 = vst [vmem:[%s7349_s25 + $0x23] sm:$0x1] %v8188_v45  ;;  %v2770_v42 = vrot.slane %v2760_v44, %v7620_v50  ;;  %v8267_v19 = vld [vmem:[%s7347_s24 + $0x34] ss:$8 sm:$0x7] }
 0x4dc   : > { %v8204_v47 = vadd.f32 %v2719_v31, %v2711_v53  ;;  %2733 = vst [vmem:[%s7349_s25 + $0x2b] sm:$0x1] %v8192_v29  ;;  %v2762_v63 = vcombine.low %v8188_v45, %v8192_v29  ;;  %v2777_v61 = vrot.slane %v2761_v20, %v7620_v50  ;;  %v8270_v12 = vld [vmem:[%s7347_s24 + $0x4c] ss:$8 sm:$0x7] }
 0x4dd   : > { %2734 = vst [vmem:[%s7349_s25 + $0x33] sm:$0x1] %v8200_v52  ;;  %v8273_v28 = vld [vmem:[%s7347_s24 + $0x64] ss:$8 sm:$0x7] }
 0x4de   : > { %2735 = vst [vmem:[%s7349_s25 + $0x3b] sm:$0x1] %v8204_v47  ;;  %v2763_v17 = vcombine.low %v8200_v52, %v8204_v47  ;;  %v2784_v10 = vrot.slane %v2762_v63, %v7620_v50  ;;  %v2792_v55 = vcombine.low %v2770_v42, %v2777_v61  ;;  %v8278_v63 = vld [vmem:[%s7347_s24 + $0x7c] ss:$8 sm:$0x7] }
 0x4df   : > { %v8281_v61 = vld [vmem:[%s7347_s24 + $0x94] ss:$8 sm:$0x7] }
 0x4e0   : > { %v2791_v16 = vrot.slane %v2763_v17, %v7620_v50  ;;  %v2800_v36 = vrot.slane %v2792_v55, %v7620_v50 }
 0x4e2   : > { %v2793_v7 = vcombine.low %v2784_v10, %v2791_v16 }
 0x4e4   : > { %v2807_v22 = vrot.slane %v2793_v7, %v7620_v50 }
 0x4e6   : > { %v2808_v58 = vcombine.low %v2800_v36, %v2807_v22  ;;  %v8288_v36 = vld [vmem:[%s7347_s24 + $0xac] ss:$8 sm:$0x7] }
 0x4e8   : > { %2875 = vmatmul.mubr.f32.vlgmr.msra.gmra.mrb[8].mxu0 %v2808_v58  ;;  %5882 = vmatmul.mubr.f32.vlgmr.msra.gmra.mrb[8].mxu1 %v2808_v58 }
 0x4e9   : > { %6272 = vmatpush1.bf16.msra.mxu0 %v7374_v34  ;;  %6303 = vmatpush3.bf16.msra.mxu1 %v7435_v54 }
 0x4ea   : > { %6274 = vmatprep.subr.bf16.mxu0 %v7376_v35  ;;  %6304 = vmatprep.subr.bf16.mxu1 %v8867_v15 }
 0x4eb   : > { %3480 = vmatprep.mubr.f32.mxu0 %v8868_v38  ;;  %5916 = vmatprep.mubr.msk.f32.mxu1 %vm7205_vm0, %v8868_v38 }
 0x4ed   : > { %6276 = vmatpush1.bf16.msra.mxu0 %v7394_v40  ;;  %6306 = vmatpush3.bf16.msra.mxu1 %v7450_v59 }
 0x4ee   : > { %6278 = vmatprep.subr.bf16.mxu0 %v7397_v41  ;;  %6307 = vmatprep.subr.bf16.mxu1 %v8867_v15 }
 0x4f1   : > { %6280 = vmatpush1.bf16.msra.mxu0 %v7412_v46  ;;  %6309 = vmatpush3.bf16.msra.mxu1 %v7478_v4 }
 0x4f2   : > { %6282 = vmatprep.subr.bf16.mxu0 %v7418_v48  ;;  %6310 = vmatprep.subr.bf16.mxu1 %v8867_v15 }
 0x4f5   : > { %6284 = vmatpush1.bf16.msra.mxu0 %v7444_v57  ;;  %6312 = vmatpush3.bf16.msra.mxu1 %v7506_v13 }
 0x4f6   : > { %6286 = vmatprep.subr.bf16.mxu0 %v7453_v60  ;;  %6313 = vmatprep.subr.bf16.mxu1 %v8867_v15 }
 0x4f9   : > { %6288 = vmatpush1.bf16.msra.mxu0 %v7472_v2  ;;  %6315 = vmatpush3.bf16.msra.mxu1 %v8895_v6 }
 0x4fa   : > { %6290 = vmatprep.subr.bf16.mxu0 %v8896_v51  ;;  %6316 = vmatprep.subr.bf16.mxu1 %v8867_v15 }
 0x4fd   : > { %6292 = vmatpush1.bf16.msra.mxu0 %v8897_v21  ;;  %6318 = vmatpush3.bf16.msra.mxu1 %v8898_v37 }
 0x4fe   : > { %6294 = vmatprep.subr.bf16.mxu0 %v8899_v23  ;;  %6319 = vmatprep.subr.bf16.mxu1 %v8867_v15 }
 0x501   : > { %6296 = vmatpush1.bf16.msra.mxu0 %v8900_v30  ;;  %6321 = vmatpush3.bf16.msra.mxu1 %v8901_v1 }
 0x502   : > { %6298 = vmatprep.subr.bf16.mxu0 %v8902_v8  ;;  %6322 = vmatprep.subr.bf16.mxu1 %v8867_v15 }
 0x505   : > { %6300 = vmatpush1.bf16.msra.mxu0 %v8903_v27  ;;  %6324 = vmatpush3.bf16.msra.mxu1 %v8904_v32 }
 0x506   : > { %6326 = vmatprep.subr.bf16.mxu0 %v8905_v24  ;;  %6357 = vmatprep.subr.bf16.mxu1 %v8867_v15 }
 0x5bb   : > { %v2876_v49 = vpop.f32.mrb[8].mxu0  ;;  %v2947_v9 = vpop.f32.mrb[8].mxu1 }
 0x5bc   : > { %v2952_v18 = vcombine.high %v2876_v49, %v2876_v49  ;;  %v2959_v56 = vrot.slane %v2876_v49, %v7620_v50  ;;  %v2878_v39 = vpop.f32.mrb[9].mxu0  ;;  %v5883_v26 = vpop.f32.mrb[9].mxu1 }
 0x5bd   : > { %v3097_v42 = vrot.slane %v2878_v39, %v7620_v50 }
 0x5be   : > { %v2966_v62 = vrot.slane %v2952_v18, %v7620_v50  ;;  %v2967_v14 = vcombine.high %v2959_v56, %v2959_v56  ;;  %v2975_v11 = vrot.slane %v2959_v56, %v7620_v50  ;;  %v3090_v18 = vcombine.high %v2878_v39, %v2878_v39 }
 0x5bf   : > { %v3105_v27 = vcombine.high %v3097_v42, %v3097_v42  ;;  %v3113_v39 = vrot.slane %v3097_v42, %v7620_v50  ;;  %v8304_v42 = vld [vmem:[%s8825_s2] ss:$0 sm:$0xff] }
 0x5c0   : > { %v2968_v31 = vcombine.high %v2966_v62, %v2966_v62  ;;  %v2982_v53 = vrot.slane %v2966_v62, %v7620_v50  ;;  %v2989_v44 = vrot.slane %v2967_v14, %v7620_v50  ;;  %v2997_v20 = vcombine.high %v2975_v11, %v2975_v11  ;;  %8906 = vst [vmem:[#allocation16_spill] sm:$0xff] %v8304_v42 }
 0x5c1   : > { %v3009_v17 = vadd.f32 %v8259_v25, %v2975_v11 }
 0x5c2   : > { %v2996_v10 = vrot.slane %v2968_v31, %v7620_v50  ;;  %v2998_v16 = vcombine.high %v2982_v53, %v2982_v53  ;;  %v2999_v55 = vcombine.high %v2989_v44, %v2989_v44  ;;  %v3010_v7 = vadd.f32 %v8264_v33, %v2989_v44 }
 0x5c3   : > { %v3011_v22 = vadd.f32 %v8267_v19, %v2997_v20  ;;  %v3013_v58 = vadd.f32 %v8273_v28, %v2982_v53  ;;  %v5478_v49 = vmul.f32 -1.442695, %v3009_v17  ;;  %v3073_v53 = vrot.slane %v8259_v25, 1 }
 0x5c4   : > { %v3000_v56 = vcombine.high %v2996_v10, %v2996_v10  ;;  %v3012_v26 = vadd.f32 %v8270_v12, %v2999_v55  ;;  %v3014_v62 = vadd.f32 %v8278_v63, %v2996_v10  ;;  %v3015_v14 = vadd.f32 %v8281_v61, %v2998_v16 }
 0x5c5   : > { %6823 = vpow2.f32 %v5478_v49  ;;  %v5479_v11 = vmul.f32 -1.442695, %v3010_v7  ;;  %v5480_v31 = vmul.f32 -1.442695, %v3011_v22  ;;  %v5482_v32 = vmul.f32 -1.442695, %v3013_v58 }
 0x5c6   : > { %v3016_v44 = vadd.f32 %v8288_v36, %v3000_v56  ;;  %v5481_v24 = vmul.f32 -1.442695, %v3012_v26  ;;  %v5483_v20 = vmul.f32 -1.442695, %v3014_v62  ;;  %v5484_v17 = vmul.f32 -1.442695, %v3015_v14 }
 0x5c7   : > { %6825 = vpow2.f32 %v5479_v11  ;;  %v3104_v10 = vrot.slane %v3090_v18, %v7620_v50  ;;  %v3074_v55 = vrot.slane %v8264_v33, 1  ;;  %v3127_v7 = vrot.slane %v3105_v27, %v7620_v50 }
 0x5c8   : > { %6827 = vpow2.f32 %v5480_v31  ;;  %v5485_v16 = vmul.f32 -1.442695, %v3016_v44  ;;  %v3147_v22 = vadd.f32 %v3113_v39, %v3073_v53  ;;  %v3203_v49 = vadd.f32 %v8304_v42, %v2947_v9 }
 0x5c9   : > { %6829 = vpow2.f32 %v5481_v24  ;;  %v3106_v58 = vcombine.high %v3104_v10, %v3104_v10  ;;  %v3148_v18 = vadd.f32 %v3127_v7, %v3074_v55  ;;  %v3075_v24 = vrot.slane %v8267_v19, 1 }
 0x5ca   : > { %6831 = vpow2.f32 %v5482_v32  ;;  %v3077_v56 = vrot.slane %v8273_v28, 1  ;;  %v3120_v27 = vrot.slane %v3104_v10, %v7620_v50  ;;  %v3135_v26 = vcombine.high %v3113_v39, %v3113_v39 }
 0x5cb   : > { %6833 = vpow2.f32 %v5483_v20  ;;  %v5486_v62 = vmul.f32 -1.442695, %v3147_v22  ;;  %v5487_v14 = vmul.f32 -1.442695, %v3148_v18  ;;  %v3076_v31 = vrot.slane %v8270_v12, 1 }
 0x5cc   : > { %6835 = vpow2.f32 %v5484_v17  ;;  %v3134_v44 = vrot.slane %v3106_v58, %v7620_v50  ;;  %v3137_v20 = vcombine.high %v3127_v7, %v3127_v7  ;;  %v3205_v17 = vcombine.high %v3203_v49, %v3203_v49 }
 0x5cd   : > { %6837 = vpow2.f32 %v5485_v16  ;;  %v3078_v9 = vrot.slane %v8278_v63, 1  ;;  %v3079_v16 = vrot.slane %v8281_v61, 1  ;;  %v3212_v39 = vrot.slane %v3203_v49, %v7620_v50 }
 0x5ce   : > { %6839 = vpow2.f32 %v5486_v62  ;;  %v3080_v10 = vrot.slane %v8288_v36, 1  ;;  %v3149_v8 = vadd.f32 %v3135_v26, %v3075_v24  ;;  %v3138_v1 = vcombine.high %v3134_v44, %v3134_v44 }
 0x5cf   : > { %v6824_v32 = vpop.eup %6823  ;;  %v3150_v30 = vadd.f32 %v3137_v20, %v3076_v31  ;;  %v3219_v62 = vrot.slane %v3205_v17, %v7620_v50  ;;  %v3220_v21 = vcombine.high %v3212_v39, %v3212_v39  ;;  %v3152_v51 = vadd.f32 %v3134_v44, %v3078_v9 }
 0x5d0   : > { %v3041_v11 = vadd.f32 1.0, %v6824_v32  ;;  %v3136_v32 = vcombine.high %v3120_v27, %v3120_v27  ;;  %v5488_v26 = vmul.f32 -1.442695, %v3149_v8  ;;  %v3270_v20 = vrot.slane %v8259_v25, 2 }
 0x5d1   : > { %v6826_v53 = vpop.eup %6825  ;;  %v5489_v31 = vmul.f32 -1.442695, %v3150_v30  ;;  %v3271_v44 = vrot.slane %v8264_v33, 2 }
 0x5d2   : > { %v6828_v55 = vpop.eup %6827  ;;  %v3042_v42 = vadd.f32 1.0, %v6826_v53  ;;  %6841 = vrcp.f32 %v3041_v11  ;;  %v3151_v11 = vadd.f32 %v3120_v27, %v3077_v56  ;;  %v3153_v24 = vadd.f32 %v3136_v32, %v3079_v16 }
 0x5d3   : > { %v6830_v22 = vpop.eup %6829  ;;  %v3043_v18 = vadd.f32 1.0, %v6828_v55  ;;  %6843 = vpow2.f32 %v5487_v14  ;;  %v3221_v56 = vcombine.high %v3219_v62, %v3219_v62  ;;  %v5491_v27 = vmul.f32 -1.442695, %v3152_v51 }
 0x5d4   : > { %v6832_v7 = vpop.eup %6831  ;;  %v3044_v58 = vadd.f32 1.0, %v6830_v22  ;;  %6845 = vrcp.f32 %v3042_v42  ;;  %v3154_v42 = vadd.f32 %v3138_v1, %v3080_v10  ;;  %v5490_v22 = vmul.f32 -1.442695, %v3151_v11 }
 0x5d5   : > { %v6834_v23 = vpop.eup %6833  ;;  %v3045_v37 = vadd.f32 1.0, %v6832_v7  ;;  %6847 = vrcp.f32 %v3043_v18  ;;  %v5492_v8 = vmul.f32 -1.442695, %v3153_v24  ;;  %v3272_v1 = vrot.slane %v8267_v19, 2 }
 0x5d6   : > { %v6836_v53 = vpop.eup %6835  ;;  %v3046_v49 = vadd.f32 1.0, %v6834_v23  ;;  %6849 = vrcp.f32 %v3044_v58  ;;  %v3228_v23 = vrot.slane %v3212_v39, %v7620_v50  ;;  %v5493_v30 = vmul.f32 -1.442695, %v3154_v42 }
 0x5d7   : > { %v6838_v55 = vpop.eup %6837  ;;  %v3047_v6 = vadd.f32 1.0, %v6836_v53  ;;  %6851 = vrcp.f32 %v3045_v37  ;;  %v3242_v37 = vrot.slane %v3220_v21, %v7620_v50  ;;  %v3274_v16 = vrot.slane %v8273_v28, 2 }
 0x5d8   : > { %v3048_v14 = vadd.f32 1.0, %v6838_v55  ;;  %6853 = vrcp.f32 %v3046_v49  ;;  %v6840_v17 = vpop.eup %6839  ;;  %v3235_v39 = vrot.slane %v3219_v62, %v7620_v50  ;;  %v3249_v33 = vrot.slane %v3221_v56, %v7620_v50 }
 0x5d9   : > { %6855 = vrcp.f32 %v3047_v6  ;;  %v3273_v6 = vrot.slane %v8270_v12, 2  ;;  %v3250_v21 = vcombine.high %v3228_v23, %v3228_v23  ;;  %v3179_v18 = vadd.f32 1.0, %v6840_v17 }
 0x5da   : > { %6857 = vrcp.f32 %v3048_v14  ;;  %v3252_v7 = vcombine.high %v3242_v37, %v3242_v37  ;;  %v3275_v11 = vrot.slane %v8278_v63, 2  ;;  %v3276_v28 = vrot.slane %v8281_v61, 2 }
 0x5db   : > { %6859 = vpow2.f32 %v5488_v26  ;;  %v3277_v49 = vrot.slane %v8288_v36, 2  ;;  %v3251_v14 = vcombine.high %v3235_v39, %v3235_v39 }
 0x5dc   : > { %v6842_v9 = vpop.eup %6841  ;;  %6861 = vpow2.f32 %v5489_v31 }
 0x5dd   : > { %v6844_v25 = vpop.eup %6843  ;;  %v3262_v51 = vmul.f32 %v6842_v9, %v3228_v23  ;;  %6863 = vpow2.f32 %v5490_v22  ;;  %v3253_v22 = vcombine.high %v3249_v33, %v3249_v33 }
 0x5de   : > { %v6846_v10 = vpop.eup %6845  ;;  %6865 = vpow2.f32 %v5491_v27  ;;  %v3180_v9 = vadd.f32 1.0, %v6844_v25 }
 0x5df   : > { %v6848_v32 = vpop.eup %6847  ;;  %v3263_v19 = vmul.f32 %v6846_v10, %v3242_v37  ;;  %v3286_v58 = vadd.f32 %v3270_v20, %v3262_v51  ;;  %6867 = vpow2.f32 %v5492_v8 }
 0x5e0   : > { %v6850_v12 = vpop.eup %6849  ;;  %v3264_v53 = vmul.f32 %v6848_v32, %v3250_v21  ;;  %6869 = vpow2.f32 %v5493_v30 }
 0x5e1   : > { %v6852_v62 = vpop.eup %6851  ;;  %v3265_v55 = vmul.f32 %v6850_v12, %v3252_v7  ;;  %v3287_v24 = vadd.f32 %v3271_v44, %v3263_v19  ;;  %6871 = vtanh.f32 %v3286_v58 }
 0x5e2   : > { %v6854_v26 = vpop.eup %6853  ;;  %v3266_v42 = vmul.f32 %v6852_v62, %v3235_v39  ;;  %v3288_v31 = vadd.f32 %v3272_v1, %v3264_v53  ;;  %6873 = vrcp.f32 %v3179_v18 }
 0x5e3   : > { %v6856_v20 = vpop.eup %6855  ;;  %v3267_v56 = vmul.f32 %v6854_v26, %v3249_v33  ;;  %v3289_v23 = vadd.f32 %v3273_v6, %v3265_v55  ;;  %6875 = vtanh.f32 %v3287_v24 }
 0x5e4   : > { %v6858_v63 = vpop.eup %6857  ;;  %v3268_v61 = vmul.f32 %v6856_v20, %v3251_v14  ;;  %v3290_v27 = vadd.f32 %v3274_v16, %v3266_v42  ;;  %6877 = vtanh.f32 %v3288_v31 }
 0x5e5   : > { %v6860_v17 = vpop.eup %6859  ;;  %v3269_v37 = vmul.f32 %v6858_v63, %v3253_v22  ;;  %v3291_v36 = vadd.f32 %v3275_v11, %v3267_v56  ;;  %6879 = vtanh.f32 %v3289_v23 }
 0x5e6   : > { %v6862_v44 = vpop.eup %6861  ;;  %v3292_v8 = vadd.f32 %v3276_v28, %v3268_v61  ;;  %6881 = vtanh.f32 %v3290_v27  ;;  %v3181_v39 = vadd.f32 1.0, %v6860_v17 }
 0x5e7   : > { %v6864_v30 = vpop.eup %6863  ;;  %v3293_v1 = vadd.f32 %v3277_v49, %v3269_v37  ;;  %6883 = vtanh.f32 %v3291_v36  ;;  %v3182_v6 = vadd.f32 1.0, %v6862_v44 }
 0x5e8   : > { %v6866_v51 = vpop.eup %6865  ;;  %6885 = vtanh.f32 %v3292_v8  ;;  %v3183_v33 = vadd.f32 1.0, %v6864_v30 }
 0x5e9   : > { %v6868_v10 = vpop.eup %6867  ;;  %6887 = vtanh.f32 %v3293_v1  ;;  %v3184_v21 = vadd.f32 1.0, %v6866_v51 }
 0x5ea   : > { %v6870_v16 = vpop.eup %6869  ;;  %6889 = vrcp.f32 %v3180_v9  ;;  %v3185_v32 = vadd.f32 1.0, %v6868_v10 }
 0x5eb   : > { %v6872_v18 = vpop.eup %6871  ;;  %6891 = vrcp.f32 %v3181_v39  ;;  %v3186_v19 = vadd.f32 1.0, %v6870_v16 }
 0x5ec   : > { %v6874_v7 = vpop.eup %6873  ;;  %6893 = vrcp.f32 %v3182_v6 }
 0x5ed   : > { %v6876_v25 = vpop.eup %6875  ;;  %6895 = vrcp.f32 %v3183_v33  ;;  %v3302_v58 = vsub.f32 1.0, %v6874_v7  ;;  %v3318_v28 = vmul.f32 %v6874_v7, %v8169_v5 }
 0x5ee   : > { %v6878_v12 = vpop.eup %6877  ;;  %6897 = vrcp.f32 %v3184_v21 }
 0x5ef   : > { %v6880_v11 = vpop.eup %6879  ;;  %6899 = vrcp.f32 %v3185_v32  ;;  %v3310_v53 = vmul.f32 %v6872_v18, %v3302_v58 }
 0x5f0   : > { %v6882_v62 = vpop.eup %6881  ;;  %6901 = vrcp.f32 %v3186_v19 }
 0x5f1   : > { %v6884_v49 = vpop.eup %6883  ;;  %v8330_v55 = vadd.f32 %v3318_v28, %v3310_v53 }
 0x5f2   : > { %v6886_v24 = vpop.eup %6885 }
 0x5f3   : > { %v6888_v26 = vpop.eup %6887  ;;  %3334 = vst [vmem:[%s7349_s25 + $0x4] sm:$0x1] %v8330_v55 }
 0x5f4   : > { %v6890_v14 = vpop.eup %6889 }
 0x5f5   : > { %v6892_v42 = vpop.eup %6891  ;;  %v3303_v31 = vsub.f32 1.0, %v6890_v14  ;;  %v3319_v5 = vmul.f32 %v6890_v14, %v8176_v3 }
 0x5f6   : > { %v6894_v20 = vpop.eup %6893  ;;  %v3304_v22 = vsub.f32 1.0, %v6892_v42  ;;  %v3320_v37 = vmul.f32 %v6892_v42, %v8179_v0  ;;  %v8907_v42 = vld [vmem:[#allocation10_spill] sm:$0xff] }
 0x5f7   : > { %v6896_v56 = vpop.eup %6895  ;;  %v3305_v23 = vsub.f32 1.0, %v6894_v20  ;;  %v3311_v63 = vmul.f32 %v6876_v25, %v3303_v31  ;;  %v3321_v9 = vmul.f32 %v6894_v20, %v8182_v43  ;;  %v8908_v31 = vld [vmem:[#allocation6_spill] sm:$0xff]  ;;  %v8909_v20 = vld [vmem:[#allocation7_spill] sm:$0xff] }
 0x5f8   : > { %v6898_v61 = vpop.eup %6897  ;;  %v3306_v27 = vsub.f32 1.0, %v6896_v56  ;;  %v3312_v17 = vmul.f32 %v6878_v12, %v3304_v22  ;;  %v3322_v3 = vmul.f32 %v6896_v56, %v8188_v45  ;;  %v8910_v22 = vld [vmem:[#allocation13_spill] sm:$0xff]  ;;  %v8911_v56 = vld [vmem:[#allocation8_spill] sm:$0xff] }
 0x5f9   : > { %v6900_v36 = vpop.eup %6899  ;;  %v3307_v44 = vsub.f32 1.0, %v6898_v61  ;;  %v3313_v8 = vmul.f32 %v6880_v11, %v3305_v23  ;;  %v8337_v30 = vadd.f32 %v3319_v5, %v3311_v63  ;;  %v3323_v0 = vmul.f32 %v6898_v61, %v8192_v29  ;;  %v8912_v23 = vld [vmem:[#allocation9_spill] sm:$0xff]  ;;  %v8913_v63 = vld [vmem:[#allocation14_spill] sm:$0xff]  ;;  %v8914_v5 = vld [vmem:[#allocation11_spill] sm:$0xff] }
 0x5fa   : > { %v6902_v1 = vpop.eup %6901  ;;  %v3308_v39 = vsub.f32 1.0, %v6900_v36  ;;  %v3314_v51 = vmul.f32 %v6882_v62, %v3306_v27  ;;  %v8340_v6 = vadd.f32 %v3320_v37, %v3312_v17  ;;  %v3324_v21 = vmul.f32 %v6900_v36, %v8200_v52  ;;  %v8915_v61 = vld [vmem:[#allocation12_spill] sm:$0xff]  ;;  %v8916_v27 = vld [vmem:[#allocation15_spill] sm:$0xff]  ;;  %v8917_v17 = vld [vmem:[#allocation5_spill] sm:$0xff] }
 0x5fb   : > { %v3309_v10 = vsub.f32 1.0, %v6902_v1  ;;  %v3315_v33 = vmul.f32 %v6884_v49, %v3307_v44  ;;  %v8343_v16 = vadd.f32 %v3321_v9, %v3313_v8  ;;  %3335 = vst [vmem:[%s7349_s25 + $0xc] sm:$0x1] %v8337_v30  ;;  %v3325_v18 = vmul.f32 %v6902_v1, %v8204_v47 }
 0x5fc   : > { %v3316_v43 = vmul.f32 %v6886_v24, %v3308_v39  ;;  %v8349_v45 = vadd.f32 %v3322_v3, %v3314_v51  ;;  %3336 = vst [vmem:[%s7349_s25 + $0x14] sm:$0x1] %v8340_v6  ;;  %v3366_v29 = vcombine.low %v8330_v55, %v8337_v30  ;;  %v8420_v39 = vld [vmem:[%s7347_s24 + $0x5] ss:$8 sm:$0x7] }
 0x5fd   : > { %v3317_v32 = vmul.f32 %v6888_v26, %v3309_v10  ;;  %v8353_v7 = vadd.f32 %v3323_v0, %v3315_v33  ;;  %3337 = vst [vmem:[%s7349_s25 + $0x1c] sm:$0x1] %v8343_v16  ;;  %v3367_v19 = vcombine.low %v8340_v6, %v8343_v16  ;;  %v8425_v33 = vld [vmem:[%s7347_s24 + $0x1d] ss:$8 sm:$0x7] }
 0x5fe   : > { %v8361_v25 = vadd.f32 %v3324_v21, %v3316_v43  ;;  %3338 = vst [vmem:[%s7349_s25 + $0x24] sm:$0x1] %v8349_v45  ;;  %v3376_v11 = vrot.slane %v3366_v29, %v7620_v50  ;;  %v8428_v0 = vld [vmem:[%s7347_s24 + $0x35] ss:$8 sm:$0x7] }
 0x5ff   : > { %v8365_v52 = vadd.f32 %v3325_v18, %v3317_v32  ;;  %3339 = vst [vmem:[%s7349_s25 + $0x2c] sm:$0x1] %v8353_v7  ;;  %v3368_v47 = vcombine.low %v8349_v45, %v8353_v7  ;;  %v3383_v58 = vrot.slane %v3367_v19, %v7620_v50  ;;  %v8431_v43 = vld [vmem:[%s7347_s24 + $0x4d] ss:$8 sm:$0x7] }
 0x600   : > { %3340 = vst [vmem:[%s7349_s25 + $0x34] sm:$0x1] %v8361_v25  ;;  %v8434_v21 = vld [vmem:[%s7347_s24 + $0x65] ss:$8 sm:$0x7] }
 0x601   : > { %3341 = vst [vmem:[%s7349_s25 + $0x3c] sm:$0x1] %v8365_v52  ;;  %v3369_v12 = vcombine.low %v8361_v25, %v8365_v52  ;;  %v3390_v28 = vrot.slane %v3368_v47, %v7620_v50  ;;  %v3398_v62 = vcombine.low %v3376_v11, %v3383_v58  ;;  %v8439_v47 = vld [vmem:[%s7347_s24 + $0x7d] ss:$8 sm:$0x7] }
 0x602   : > { %v8442_v58 = vld [vmem:[%s7347_s24 + $0x95] ss:$8 sm:$0x7] }
 0x603   : > { %v3397_v53 = vrot.slane %v3369_v12, %v7620_v50  ;;  %v3406_v24 = vrot.slane %v3398_v62, %v7620_v50 }
 0x605   : > { %v3399_v49 = vcombine.low %v3390_v28, %v3397_v53 }
 0x607   : > { %v3413_v26 = vrot.slane %v3399_v49, %v7620_v50 }
 0x609   : > { %v3414_v14 = vcombine.low %v3406_v24, %v3413_v26  ;;  %v8449_v24 = vld [vmem:[%s7347_s24 + $0xad] ss:$8 sm:$0x7] }
 0x60b   : > { %3481 = vmatmul.mubr.f32.vlgmr.msra.gmra.mrb[10].mxu0 %v3414_v14  ;;  %5917 = vmatmul.mubr.f32.vlgmr.msra.gmra.mrb[10].mxu1 %v3414_v14 }
 0x60c   : > { %6328 = vmatpush1.bf16.msra.mxu0 %v7374_v34  ;;  %6359 = vmatpush3.bf16.msra.mxu1 %v7435_v54 }
 0x60d   : > { %6330 = vmatprep.subr.bf16.mxu0 %v7376_v35  ;;  %6360 = vmatprep.subr.bf16.mxu1 %v8867_v15 }
 0x60e   : > { %4086 = vmatprep.mubr.f32.mxu0 %v8868_v38  ;;  %5951 = vmatprep.mubr.msk.f32.mxu1 %vm7205_vm0, %v8868_v38 }
 0x610   : > { %6332 = vmatpush1.bf16.msra.mxu0 %v7394_v40  ;;  %6362 = vmatpush3.bf16.msra.mxu1 %v7450_v59 }
 0x611   : > { %6334 = vmatprep.subr.bf16.mxu0 %v7397_v41  ;;  %6363 = vmatprep.subr.bf16.mxu1 %v8867_v15 }
 0x614   : > { %6336 = vmatpush1.bf16.msra.mxu0 %v7412_v46  ;;  %6365 = vmatpush3.bf16.msra.mxu1 %v7478_v4 }
 0x615   : > { %6338 = vmatprep.subr.bf16.mxu0 %v7418_v48  ;;  %6366 = vmatprep.subr.bf16.mxu1 %v8867_v15 }
 0x618   : > { %6340 = vmatpush1.bf16.msra.mxu0 %v7444_v57  ;;  %6368 = vmatpush3.bf16.msra.mxu1 %v7506_v13 }
 0x619   : > { %6342 = vmatprep.subr.bf16.mxu0 %v7453_v60  ;;  %6369 = vmatprep.subr.bf16.mxu1 %v8867_v15 }
 0x61c   : > { %6344 = vmatpush1.bf16.msra.mxu0 %v7472_v2  ;;  %6371 = vmatpush3.bf16.msra.mxu1 %v8907_v42 }
 0x61d   : > { %6346 = vmatprep.subr.bf16.mxu0 %v8908_v31  ;;  %6372 = vmatprep.subr.bf16.mxu1 %v8867_v15 }
 0x620   : > { %6348 = vmatpush1.bf16.msra.mxu0 %v8909_v20  ;;  %6374 = vmatpush3.bf16.msra.mxu1 %v8910_v22 }
 0x621   : > { %6350 = vmatprep.subr.bf16.mxu0 %v8911_v56  ;;  %6375 = vmatprep.subr.bf16.mxu1 %v8867_v15 }
 0x624   : > { %6352 = vmatpush1.bf16.msra.mxu0 %v8912_v23  ;;  %6377 = vmatpush3.bf16.msra.mxu1 %v8913_v63 }
 0x625   : > { %6354 = vmatprep.subr.bf16.mxu0 %v8914_v5  ;;  %6378 = vmatprep.subr.bf16.mxu1 %v8867_v15 }
 0x628   : > { %6356 = vmatpush1.bf16.msra.mxu0 %v8915_v61  ;;  %6380 = vmatpush3.bf16.msra.mxu1 %v8916_v27 }
 0x629   : > { %6382 = vmatprep.subr.bf16.mxu0 %v8917_v17  ;;  %6413 = vmatprep.subr.bf16.mxu1 %v8867_v15 }
 0x6de   : > { %v3482_v37 = vpop.f32.mrb[10].mxu0  ;;  %v3553_v36 = vpop.f32.mrb[10].mxu1 }
 0x6df   : > { %v3558_v44 = vcombine.high %v3482_v37, %v3482_v37  ;;  %v3565_v8 = vrot.slane %v3482_v37, %v7620_v50  ;;  %v3484_v9 = vpop.f32.mrb[11].mxu0  ;;  %v5918_v1 = vpop.f32.mrb[11].mxu1 }
 0x6e0   : > { %v3703_v11 = vrot.slane %v3484_v9, %v7620_v50  ;;  %v3696_v37 = vcombine.high %v3484_v9, %v3484_v9 }
 0x6e1   : > { %v3572_v51 = vrot.slane %v3558_v44, %v7620_v50  ;;  %v3573_v3 = vcombine.high %v3565_v8, %v3565_v8  ;;  %v3581_v10 = vrot.slane %v3565_v8, %v7620_v50 }
 0x6e2   : > { %v3711_v61 = vcombine.high %v3703_v11, %v3703_v11  ;;  %v3719_v9 = vrot.slane %v3703_v11, %v7620_v50  ;;  %v3681_v11 = vrot.slane %v8428_v0, 1 }
 0x6e3   : > { %v3574_v18 = vcombine.high %v3572_v51, %v3572_v51  ;;  %v3588_v32 = vrot.slane %v3572_v51, %v7620_v50  ;;  %v3595_v29 = vrot.slane %v3573_v3, %v7620_v50  ;;  %v3603_v19 = vcombine.high %v3581_v10, %v3581_v10 }
 0x6e4   : > { %v3615_v12 = vadd.f32 %v8420_v39, %v3581_v10 }
 0x6e5   : > { %v3602_v28 = vrot.slane %v3574_v18, %v7620_v50  ;;  %v3604_v53 = vcombine.high %v3588_v32, %v3588_v32  ;;  %v3605_v62 = vcombine.high %v3595_v29, %v3595_v29  ;;  %v3616_v49 = vadd.f32 %v8425_v33, %v3595_v29 }
 0x6e6   : > { %v3617_v26 = vadd.f32 %v8428_v0, %v3603_v19  ;;  %v3619_v14 = vadd.f32 %v8434_v21, %v3588_v32  ;;  %v5502_v17 = vmul.f32 -1.442695, %v3615_v12  ;;  %v3679_v32 = vrot.slane %v8420_v39, 1 }
 0x6e7   : > { %v3606_v44 = vcombine.high %v3602_v28, %v3602_v28  ;;  %v3618_v8 = vadd.f32 %v8431_v43, %v3605_v62  ;;  %v3620_v1 = vadd.f32 %v8439_v47, %v3602_v28  ;;  %v3621_v51 = vadd.f32 %v8442_v58, %v3604_v53 }
 0x6e8   : > { %6903 = vpow2.f32 %v5502_v17  ;;  %v5503_v3 = vmul.f32 -1.442695, %v3616_v49  ;;  %v5504_v10 = vmul.f32 -1.442695, %v3617_v26  ;;  %v5506_v27 = vmul.f32 -1.442695, %v3619_v14 }
 0x6e9   : > { %v3622_v18 = vadd.f32 %v8449_v24, %v3606_v44  ;;  %v5505_v29 = vmul.f32 -1.442695, %v3618_v8  ;;  %v5507_v19 = vmul.f32 -1.442695, %v3620_v1  ;;  %v5508_v12 = vmul.f32 -1.442695, %v3621_v51 }
 0x6ea   : > { %6905 = vpow2.f32 %v5503_v3  ;;  %v3710_v28 = vrot.slane %v3696_v37, %v7620_v50  ;;  %v3680_v62 = vrot.slane %v8425_v33, 1  ;;  %v3733_v49 = vrot.slane %v3711_v61, %v7620_v50  ;;  %v8918_v17 = vld [vmem:[#allocation16_spill] sm:$0xff] }
 0x6eb   : > { %6907 = vpow2.f32 %v5504_v10  ;;  %v5509_v53 = vmul.f32 -1.442695, %v3622_v18  ;;  %v3753_v26 = vadd.f32 %v3719_v9, %v3679_v32  ;;  %v3809_v44 = vadd.f32 %v8918_v17, %v3553_v36 }
 0x6ec   : > { %6909 = vpow2.f32 %v5505_v29  ;;  %v3712_v14 = vcombine.high %v3710_v28, %v3710_v28  ;;  %v3754_v8 = vadd.f32 %v3733_v49, %v3680_v62  ;;  %v3683_v1 = vrot.slane %v8434_v21, 1 }
 0x6ed   : > { %6911 = vpow2.f32 %v5506_v27  ;;  %v3726_v51 = vrot.slane %v3710_v28, %v7620_v50  ;;  %v3741_v3 = vcombine.high %v3719_v9, %v3719_v9  ;;  %v5510_v10 = vmul.f32 -1.442695, %v3753_v26 }
 0x6ee   : > { %6913 = vpow2.f32 %v5507_v19  ;;  %v5511_v27 = vmul.f32 -1.442695, %v3754_v8  ;;  %v3682_v61 = vrot.slane %v8431_v43, 1  ;;  %v3740_v29 = vrot.slane %v3712_v14, %v7620_v50 }
 0x6ef   : > { %6915 = vpow2.f32 %v5508_v12  ;;  %v3743_v19 = vcombine.high %v3733_v49, %v3733_v49  ;;  %v3811_v12 = vcombine.high %v3809_v44, %v3809_v44  ;;  %v3684_v36 = vrot.slane %v8439_v47, 1 }
 0x6f0   : > { %6917 = vpow2.f32 %v5509_v53  ;;  %v3685_v53 = vrot.slane %v8442_v58, 1  ;;  %v3818_v9 = vrot.slane %v3809_v44, %v7620_v50  ;;  %v3686_v28 = vrot.slane %v8449_v24, 1 }
 0x6f1   : > { %6919 = vpow2.f32 %v5510_v10  ;;  %v3755_v5 = vadd.f32 %v3741_v3, %v3681_v11  ;;  %v3744_v63 = vcombine.high %v3740_v29, %v3740_v29  ;;  %v3756_v23 = vadd.f32 %v3743_v19, %v3682_v61 }
 0x6f2   : > { %v6904_v37 = vpop.eup %6903  ;;  %v3825_v10 = vrot.slane %v3811_v12, %v7620_v50  ;;  %v3826_v20 = vcombine.high %v3818_v9, %v3818_v9  ;;  %v3758_v31 = vadd.f32 %v3740_v29, %v3684_v36  ;;  %v3876_v19 = vrot.slane %v8420_v39, 2 }
 0x6f3   : > { %v3647_v18 = vadd.f32 1.0, %v6904_v37  ;;  %v3742_v37 = vcombine.high %v3726_v51, %v3726_v51  ;;  %v5512_v3 = vmul.f32 -1.442695, %v3755_v5  ;;  %v5513_v61 = vmul.f32 -1.442695, %v3756_v23 }
 0x6f4   : > { %v6906_v32 = vpop.eup %6905  ;;  %v3877_v29 = vrot.slane %v8425_v33, 2 }
 0x6f5   : > { %v6908_v62 = vpop.eup %6907  ;;  %v3648_v17 = vadd.f32 1.0, %v6906_v32  ;;  %6921 = vrcp.f32 %v3647_v18  ;;  %v3757_v18 = vadd.f32 %v3726_v51, %v3683_v1  ;;  %v3759_v11 = vadd.f32 %v3742_v37, %v3685_v53 }
 0x6f6   : > { %v6910_v26 = vpop.eup %6909  ;;  %v3649_v8 = vadd.f32 1.0, %v6908_v62  ;;  %6923 = vpow2.f32 %v5511_v27  ;;  %v3827_v1 = vcombine.high %v3825_v10, %v3825_v10  ;;  %v5515_v51 = vmul.f32 -1.442695, %v3758_v31 }
 0x6f7   : > { %v6912_v49 = vpop.eup %6911  ;;  %v3650_v14 = vadd.f32 1.0, %v6910_v26  ;;  %6925 = vrcp.f32 %v3648_v17  ;;  %v3760_v17 = vadd.f32 %v3744_v63, %v3686_v28  ;;  %v5514_v26 = vmul.f32 -1.442695, %v3757_v18 }
 0x6f8   : > { %v6914_v56 = vpop.eup %6913  ;;  %v3651_v22 = vadd.f32 1.0, %v6912_v49  ;;  %6927 = vrcp.f32 %v3649_v8  ;;  %v5516_v5 = vmul.f32 -1.442695, %v3759_v11  ;;  %v3878_v63 = vrot.slane %v8428_v0, 2 }
 0x6f9   : > { %v6916_v32 = vpop.eup %6915  ;;  %v3652_v44 = vadd.f32 1.0, %v6914_v56  ;;  %6929 = vrcp.f32 %v3650_v14  ;;  %v3834_v56 = vrot.slane %v3818_v9, %v7620_v50  ;;  %v5517_v23 = vmul.f32 -1.442695, %v3760_v17 }
 0x6fa   : > { %v6918_v62 = vpop.eup %6917  ;;  %v3653_v42 = vadd.f32 1.0, %v6916_v32  ;;  %6931 = vrcp.f32 %v3651_v22  ;;  %v3848_v22 = vrot.slane %v3826_v20, %v7620_v50  ;;  %v3880_v53 = vrot.slane %v8434_v21, 2 }
 0x6fb   : > { %v3654_v27 = vadd.f32 1.0, %v6918_v62  ;;  %6933 = vrcp.f32 %v3652_v44  ;;  %v6920_v12 = vpop.eup %6919  ;;  %v3841_v9 = vrot.slane %v3825_v10, %v7620_v50  ;;  %v3855_v33 = vrot.slane %v3827_v1, %v7620_v50 }
 0x6fc   : > { %6935 = vrcp.f32 %v3653_v42  ;;  %v3879_v42 = vrot.slane %v8431_v43, 2  ;;  %v3856_v20 = vcombine.high %v3834_v56, %v3834_v56  ;;  %v3785_v8 = vadd.f32 1.0, %v6920_v12 }
 0x6fd   : > { %6937 = vrcp.f32 %v3654_v27  ;;  %v3858_v49 = vcombine.high %v3848_v22, %v3848_v22  ;;  %v3881_v18 = vrot.slane %v8439_v47, 2  ;;  %v3882_v21 = vrot.slane %v8442_v58, 2 }
 0x6fe   : > { %6939 = vpow2.f32 %v5512_v3  ;;  %v3883_v44 = vrot.slane %v8449_v24, 2  ;;  %v3857_v27 = vcombine.high %v3841_v9, %v3841_v9 }
 0x6ff   : > { %v6922_v36 = vpop.eup %6921  ;;  %6941 = vpow2.f32 %v5513_v61 }
 0x700   : > { %v6924_v39 = vpop.eup %6923  ;;  %v3868_v31 = vmul.f32 %v6922_v36, %v3834_v56  ;;  %6943 = vpow2.f32 %v5514_v26  ;;  %v3859_v26 = vcombine.high %v3855_v33, %v3855_v33 }
 0x701   : > { %v6926_v28 = vpop.eup %6925  ;;  %6945 = vpow2.f32 %v5515_v51  ;;  %v3786_v36 = vadd.f32 1.0, %v6924_v39 }
 0x702   : > { %v6928_v37 = vpop.eup %6927  ;;  %v3869_v0 = vmul.f32 %v6926_v28, %v3848_v22  ;;  %v3892_v14 = vadd.f32 %v3876_v19, %v3868_v31  ;;  %6947 = vpow2.f32 %v5516_v5 }
 0x703   : > { %v6930_v43 = vpop.eup %6929  ;;  %v3870_v32 = vmul.f32 %v6928_v37, %v3856_v20  ;;  %6949 = vpow2.f32 %v5517_v23 }
 0x704   : > { %v6932_v10 = vpop.eup %6931  ;;  %v3871_v62 = vmul.f32 %v6930_v43, %v3858_v49  ;;  %v3893_v11 = vadd.f32 %v3877_v29, %v3869_v0  ;;  %6951 = vtanh.f32 %v3892_v14 }
 0x705   : > { %v6934_v3 = vpop.eup %6933  ;;  %v3872_v17 = vmul.f32 %v6932_v10, %v3841_v9  ;;  %v3894_v61 = vadd.f32 %v3878_v63, %v3870_v32  ;;  %6953 = vrcp.f32 %v3785_v8 }
 0x706   : > { %v6936_v19 = vpop.eup %6935  ;;  %v3873_v1 = vmul.f32 %v6934_v3, %v3855_v33  ;;  %v3895_v56 = vadd.f32 %v3879_v42, %v3871_v62  ;;  %6955 = vtanh.f32 %v3893_v11 }
 0x707   : > { %v6938_v47 = vpop.eup %6937  ;;  %v3874_v58 = vmul.f32 %v6936_v19, %v3857_v27  ;;  %v3896_v51 = vadd.f32 %v3880_v53, %v3872_v17  ;;  %6957 = vtanh.f32 %v3894_v61 }
 0x708   : > { %v6940_v12 = vpop.eup %6939  ;;  %v3875_v22 = vmul.f32 %v6938_v47, %v3859_v26  ;;  %v3897_v24 = vadd.f32 %v3881_v18, %v3873_v1  ;;  %6959 = vtanh.f32 %v3895_v56 }
 0x709   : > { %v6942_v29 = vpop.eup %6941  ;;  %v3898_v5 = vadd.f32 %v3882_v21, %v3874_v58  ;;  %6961 = vtanh.f32 %v3896_v51  ;;  %v3787_v9 = vadd.f32 1.0, %v6940_v12 }
 0x70a   : > { %v6944_v23 = vpop.eup %6943  ;;  %v3899_v63 = vadd.f32 %v3883_v44, %v3875_v22  ;;  %6963 = vtanh.f32 %v3897_v24  ;;  %v3788_v42 = vadd.f32 1.0, %v6942_v29 }
 0x70b   : > { %v6946_v31 = vpop.eup %6945  ;;  %6965 = vtanh.f32 %v3898_v5  ;;  %v3789_v33 = vadd.f32 1.0, %v6944_v23 }
 0x70c   : > { %v6948_v28 = vpop.eup %6947  ;;  %6967 = vtanh.f32 %v3899_v63  ;;  %v3790_v20 = vadd.f32 1.0, %v6946_v31 }
 0x70d   : > { %v6950_v53 = vpop.eup %6949  ;;  %6969 = vrcp.f32 %v3786_v36  ;;  %v3791_v37 = vadd.f32 1.0, %v6948_v28 }
 0x70e   : > { %v6952_v8 = vpop.eup %6951  ;;  %6971 = vrcp.f32 %v3787_v9  ;;  %v3792_v0 = vadd.f32 1.0, %v6950_v53 }
 0x70f   : > { %v6954_v49 = vpop.eup %6953  ;;  %6973 = vrcp.f32 %v3788_v42 }
 0x710   : > { %v6956_v39 = vpop.eup %6955  ;;  %6975 = vrcp.f32 %v3789_v33  ;;  %v3908_v14 = vsub.f32 1.0, %v6954_v49  ;;  %v3924_v21 = vmul.f32 %v6954_v49, %v8330_v55 }
 0x711   : > { %v6958_v43 = vpop.eup %6957  ;;  %6977 = vrcp.f32 %v3790_v20 }
 0x712   : > { %v6960_v18 = vpop.eup %6959  ;;  %6979 = vrcp.f32 %v3791_v37  ;;  %v3916_v32 = vmul.f32 %v6952_v8, %v3908_v14 }
 0x713   : > { %v6962_v10 = vpop.eup %6961  ;;  %6981 = vrcp.f32 %v3792_v0 }
 0x714   : > { %v6964_v44 = vpop.eup %6963  ;;  %v8486_v62 = vadd.f32 %v3924_v21, %v3916_v32 }
 0x715   : > { %v6966_v11 = vpop.eup %6965 }
 0x716   : > { %v6968_v3 = vpop.eup %6967  ;;  %3940 = vst [vmem:[%s7349_s25 + $0x5] sm:$0x1] %v8486_v62 }
 0x717   : > { %v6970_v27 = vpop.eup %6969 }
 0x718   : > { %v6972_v17 = vpop.eup %6971  ;;  %v3909_v61 = vsub.f32 1.0, %v6970_v27  ;;  %v3925_v55 = vmul.f32 %v6970_v27, %v8337_v30 }
 0x719   : > { %v6974_v19 = vpop.eup %6973  ;;  %v3910_v26 = vsub.f32 1.0, %v6972_v17  ;;  %v3926_v22 = vmul.f32 %v6972_v17, %v8340_v6 }
 0x71a   : > { %v6976_v1 = vpop.eup %6975  ;;  %v3911_v56 = vsub.f32 1.0, %v6974_v19  ;;  %v3917_v47 = vmul.f32 %v6956_v39, %v3909_v61  ;;  %v3927_v36 = vmul.f32 %v6974_v19, %v8343_v16  ;;  %v8574_v19 = vld [vmem:[%s7347_s24 + $0x6] ss:$8 sm:$0x7] }
 0x71b   : > { %v6978_v58 = vpop.eup %6977  ;;  %v3912_v51 = vsub.f32 1.0, %v6976_v1  ;;  %v3918_v12 = vmul.f32 %v6958_v43, %v3910_v26  ;;  %v3928_v30 = vmul.f32 %v6976_v1, %v8349_v45 }
 0x71c   : > { %v6980_v24 = vpop.eup %6979  ;;  %v3913_v29 = vsub.f32 1.0, %v6978_v58  ;;  %v3919_v5 = vmul.f32 %v6960_v18, %v3911_v56  ;;  %v8493_v23 = vadd.f32 %v3925_v55, %v3917_v47  ;;  %v3929_v6 = vmul.f32 %v6978_v58, %v8353_v7  ;;  %v8579_v56 = vld [vmem:[%s7347_s24 + $0x1e] ss:$8 sm:$0x7] }
 0x71d   : > { %v6982_v63 = vpop.eup %6981  ;;  %v3914_v9 = vsub.f32 1.0, %v6980_v24  ;;  %v3920_v31 = vmul.f32 %v6962_v10, %v3912_v51  ;;  %v8496_v42 = vadd.f32 %v3926_v22, %v3918_v12  ;;  %v3930_v20 = vmul.f32 %v6980_v24, %v8361_v25  ;;  %v8582_v47 = vld [vmem:[%s7347_s24 + $0x36] ss:$8 sm:$0x7] }
 0x71e   : > { %v3915_v28 = vsub.f32 1.0, %v6982_v63  ;;  %v3921_v33 = vmul.f32 %v6964_v44, %v3913_v29  ;;  %v8499_v53 = vadd.f32 %v3927_v36, %v3919_v5  ;;  %3941 = vst [vmem:[%s7349_s25 + $0xd] sm:$0x1] %v8493_v23  ;;  %v3931_v8 = vmul.f32 %v6982_v63, %v8365_v52  ;;  %v8585_v55 = vld [vmem:[%s7347_s24 + $0x4e] ss:$8 sm:$0x7] }
 0x71f   : > { %v3922_v16 = vmul.f32 %v6966_v11, %v3914_v9  ;;  %v8505_v45 = vadd.f32 %v3928_v30, %v3920_v31  ;;  %3942 = vst [vmem:[%s7349_s25 + $0x15] sm:$0x1] %v8496_v42  ;;  %v3972_v7 = vcombine.low %v8486_v62, %v8493_v23  ;;  %v8588_v58 = vld [vmem:[%s7347_s24 + $0x66] ss:$8 sm:$0x7] }
 0x720   : > { %v3923_v37 = vmul.f32 %v6968_v3, %v3915_v28  ;;  %v8509_v49 = vadd.f32 %v3929_v6, %v3921_v33  ;;  %3943 = vst [vmem:[%s7349_s25 + $0x1d] sm:$0x1] %v8499_v53  ;;  %v3973_v0 = vcombine.low %v8496_v42, %v8499_v53  ;;  %v8593_v29 = vld [vmem:[%s7347_s24 + $0x7e] ss:$8 sm:$0x7] }
 0x721   : > { %v8517_v39 = vadd.f32 %v3930_v20, %v3922_v16  ;;  %3944 = vst [vmem:[%s7349_s25 + $0x25] sm:$0x1] %v8505_v45  ;;  %v3982_v18 = vrot.slane %v3972_v7, %v7620_v50  ;;  %v8596_v5 = vld [vmem:[%s7347_s24 + $0x96] ss:$8 sm:$0x7] }
 0x722   : > { %v8521_v25 = vadd.f32 %v3931_v8, %v3923_v37  ;;  %3945 = vst [vmem:[%s7349_s25 + $0x2d] sm:$0x1] %v8509_v49  ;;  %v3974_v52 = vcombine.low %v8505_v45, %v8509_v49  ;;  %v3989_v14 = vrot.slane %v3973_v0, %v7620_v50  ;;  %v8603_v33 = vld [vmem:[%s7347_s24 + $0xae] ss:$8 sm:$0x7] }
 0x723   : > { %3946 = vst [vmem:[%s7349_s25 + $0x35] sm:$0x1] %v8517_v39 }
 0x724   : > { %3947 = vst [vmem:[%s7349_s25 + $0x3d] sm:$0x1] %v8521_v25  ;;  %v3975_v43 = vcombine.low %v8517_v39, %v8521_v25  ;;  %v3996_v21 = vrot.slane %v3974_v52, %v7620_v50  ;;  %v4004_v10 = vcombine.low %v3982_v18, %v3989_v14 }
 0x726   : > { %v4003_v32 = vrot.slane %v3975_v43, %v7620_v50  ;;  %v4012_v11 = vrot.slane %v4004_v10, %v7620_v50 }
 0x728   : > { %v4005_v44 = vcombine.low %v3996_v21, %v4003_v32 }
 0x72a   : > { %v4019_v3 = vrot.slane %v4005_v44, %v7620_v50 }
 0x72c   : > { %v4020_v27 = vcombine.low %v4012_v11, %v4019_v3  ;;  %v4285_v11 = vrot.slane %v8574_v19, 1 }
 0x72e   : > { %4087 = vmatmul.mubr.f32.vlgmr.msra.gmra.mrb[12].mxu0 %v4020_v27  ;;  %5952 = vmatmul.mubr.f32.vlgmr.msra.gmra.mrb[12].mxu1 %v4020_v27 }
 0x72f   : > { %6384 = vmatpush1.bf16.msra.mxu0 %v7374_v34  ;;  %6415 = vmatpush3.bf16.msra.mxu1 %v7435_v54  ;;  %v8919_v34 = vld [vmem:[#allocation10_spill] sm:$0xff] }
 0x730   : > { %6386 = vmatprep.subr.bf16.mxu0 %v7376_v35  ;;  %6416 = vmatprep.subr.bf16.mxu1 %v8867_v15  ;;  %v8920_v35 = vld [vmem:[#allocation6_spill] sm:$0xff] }
 0x731   : > { %4692 = vmatprep.mubr.f32.mxu0 %v8868_v38  ;;  %5986 = vmatprep.mubr.msk.f32.mxu1 %vm7205_vm0, %v8868_v38  ;;  %v8925_v54 = vld [vmem:[#allocation14_spill] sm:$0xff] }
 0x733   : > { %6388 = vmatpush1.bf16.msra.mxu0 %v7394_v40  ;;  %6418 = vmatpush3.bf16.msra.mxu1 %v7450_v59  ;;  %v8921_v40 = vld [vmem:[#allocation7_spill] sm:$0xff]  ;;  %v8927_v59 = vld [vmem:[#allocation12_spill] sm:$0xff] }
 0x734   : > { %6390 = vmatprep.subr.bf16.mxu0 %v7397_v41  ;;  %6419 = vmatprep.subr.bf16.mxu1 %v8867_v15  ;;  %v8922_v41 = vld [vmem:[#allocation13_spill] sm:$0xff] }
 0x737   : > { %6392 = vmatpush1.bf16.msra.mxu0 %v7412_v46  ;;  %6421 = vmatpush3.bf16.msra.mxu1 %v7478_v4  ;;  %v8923_v46 = vld [vmem:[#allocation8_spill] sm:$0xff] }
 0x738   : > { %6394 = vmatprep.subr.bf16.mxu0 %v7418_v48  ;;  %6422 = vmatprep.subr.bf16.mxu1 %v8867_v15  ;;  %v8924_v48 = vld [vmem:[#allocation9_spill] sm:$0xff] }
 0x73b   : > { %6396 = vmatpush1.bf16.msra.mxu0 %v7444_v57  ;;  %6424 = vmatpush3.bf16.msra.mxu1 %v7506_v13  ;;  %v8926_v57 = vld [vmem:[#allocation11_spill] sm:$0xff] }
 0x73c   : > { %6398 = vmatprep.subr.bf16.mxu0 %v7453_v60  ;;  %6425 = vmatprep.subr.bf16.mxu1 %v8867_v15  ;;  %v8928_v60 = vld [vmem:[#allocation15_spill] sm:$0xff] }
 0x73f   : > { %6400 = vmatpush1.bf16.msra.mxu0 %v7472_v2  ;;  %6427 = vmatpush3.bf16.msra.mxu1 %v8919_v34 }
 0x740   : > { %6402 = vmatprep.subr.bf16.mxu0 %v8920_v35  ;;  %6428 = vmatprep.subr.bf16.mxu1 %v8867_v15 }
 0x743   : > { %6404 = vmatpush1.bf16.msra.mxu0 %v8921_v40  ;;  %6430 = vmatpush3.bf16.msra.mxu1 %v8922_v41  ;;  %v4286_v40 = vrot.slane %v8579_v56, 1 }
 0x744   : > { %6406 = vmatprep.subr.bf16.mxu0 %v8923_v46  ;;  %6431 = vmatprep.subr.bf16.mxu1 %v8867_v15 }
 0x747   : > { %6408 = vmatpush1.bf16.msra.mxu0 %v8924_v48  ;;  %6433 = vmatpush3.bf16.msra.mxu1 %v8925_v54  ;;  %v8619_v54 = vld [vmem:[%s8825_s2] ss:$0 sm:$0xff] }
 0x748   : > { %6410 = vmatprep.subr.bf16.mxu0 %v8926_v57  ;;  %6434 = vmatprep.subr.bf16.mxu1 %v8867_v15 }
 0x74b   : > { %6412 = vmatpush1.bf16.msra.mxu0 %v8927_v59  ;;  %6436 = vmatpush3.bf16.msra.mxu1 %v8928_v60  ;;  %v4287_v60 = vrot.slane %v8582_v47, 1 }
 0x801   : > { %v4088_v2 = vpop.f32.mrb[12].mxu0  ;;  %v4159_v4 = vpop.f32.mrb[12].mxu1 }
 0x802   : > { %v4164_v13 = vcombine.high %v4088_v2, %v4088_v2  ;;  %v4171_v38 = vrot.slane %v4088_v2, %v7620_v50  ;;  %v4090_v17 = vpop.f32.mrb[13].mxu0  ;;  %v5953_v61 = vpop.f32.mrb[13].mxu1  ;;  %v4415_v57 = vadd.f32 %v8619_v54, %v4159_v4  ;;  %v4289_v2 = vrot.slane %v8588_v58, 1 }
 0x803   : > { %v4309_v63 = vrot.slane %v4090_v17, %v7620_v50  ;;  %v4302_v8 = vcombine.high %v4090_v17, %v4090_v17  ;;  %v4290_v4 = vrot.slane %v8593_v29, 1 }
 0x804   : > { %v4178_v26 = vrot.slane %v4164_v13, %v7620_v50  ;;  %v4179_v1 = vcombine.high %v4171_v38, %v4171_v38  ;;  %v4187_v15 = vrot.slane %v4171_v38, %v7620_v50 }
 0x805   : > { %v4317_v10 = vcombine.high %v4309_v63, %v4309_v63  ;;  %v4325_v3 = vrot.slane %v4309_v63, %v7620_v50  ;;  %v4316_v34 = vrot.slane %v4302_v8, %v7620_v50 }
 0x806   : > { %v4180_v51 = vcombine.high %v4178_v26, %v4178_v26  ;;  %v4194_v12 = vrot.slane %v4178_v26, %v7620_v50  ;;  %v4201_v22 = vrot.slane %v4179_v1, %v7620_v50  ;;  %v4209_v24 = vcombine.high %v4187_v15, %v4187_v15 }
 0x807   : > { %v4221_v36 = vadd.f32 %v8574_v19, %v4187_v15  ;;  %v4339_v41 = vrot.slane %v4317_v10, %v7620_v50  ;;  %v4359_v46 = vadd.f32 %v4325_v3, %v4285_v11  ;;  %v4318_v48 = vcombine.high %v4316_v34, %v4316_v34 }
 0x808   : > { %v4208_v9 = vrot.slane %v4180_v51, %v7620_v50  ;;  %v4210_v31 = vcombine.high %v4194_v12, %v4194_v12  ;;  %v4211_v30 = vcombine.high %v4201_v22, %v4201_v22  ;;  %v4222_v28 = vadd.f32 %v8579_v56, %v4201_v22 }
 0x809   : > { %v4223_v6 = vadd.f32 %v8582_v47, %v4209_v24  ;;  %v4225_v16 = vadd.f32 %v8588_v58, %v4194_v12  ;;  %v5526_v20 = vmul.f32 -1.442695, %v4221_v36  ;;  %v4360_v59 = vadd.f32 %v4339_v41, %v4286_v40 }
 0x80a   : > { %v4212_v37 = vcombine.high %v4208_v9, %v4208_v9  ;;  %v4224_v7 = vadd.f32 %v8585_v55, %v4211_v30  ;;  %v4226_v0 = vadd.f32 %v8593_v29, %v4208_v9  ;;  %v4227_v52 = vadd.f32 %v8596_v5, %v4210_v31 }
 0x80b   : > { %6983 = vpow2.f32 %v5526_v20  ;;  %v5527_v14 = vmul.f32 -1.442695, %v4222_v28  ;;  %v5528_v43 = vmul.f32 -1.442695, %v4223_v6  ;;  %v5530_v32 = vmul.f32 -1.442695, %v4225_v16 }
 0x80c   : > { %v4228_v18 = vadd.f32 %v8603_v33, %v4212_v37  ;;  %v5529_v21 = vmul.f32 -1.442695, %v4224_v7  ;;  %v5531_v44 = vmul.f32 -1.442695, %v4226_v0  ;;  %v5532_v27 = vmul.f32 -1.442695, %v4227_v52 }
 0x80d   : > { %6985 = vpow2.f32 %v5527_v14  ;;  %v4332_v38 = vrot.slane %v4316_v34, %v7620_v50  ;;  %v4347_v17 = vcombine.high %v4325_v3, %v4325_v3  ;;  %v5534_v61 = vmul.f32 -1.442695, %v4359_v46 }
 0x80e   : > { %6987 = vpow2.f32 %v5528_v43  ;;  %v5533_v35 = vmul.f32 -1.442695, %v4228_v18  ;;  %v5535_v26 = vmul.f32 -1.442695, %v4360_v59  ;;  %v4288_v15 = vrot.slane %v8585_v55, 1 }
 0x80f   : > { %6989 = vpow2.f32 %v5529_v21  ;;  %v4346_v51 = vrot.slane %v4318_v48, %v7620_v50  ;;  %v4349_v12 = vcombine.high %v4339_v41, %v4339_v41  ;;  %v4417_v24 = vcombine.high %v4415_v57, %v4415_v57 }
 0x810   : > { %6991 = vpow2.f32 %v5530_v32  ;;  %v4291_v36 = vrot.slane %v8596_v5, 1  ;;  %v4424_v31 = vrot.slane %v4415_v57, %v7620_v50  ;;  %v4292_v30 = vrot.slane %v8603_v33, 1 }
 0x811   : > { %6993 = vpow2.f32 %v5531_v44  ;;  %v4348_v16 = vcombine.high %v4332_v38, %v4332_v38  ;;  %v4361_v20 = vadd.f32 %v4347_v17, %v4287_v60  ;;  %v4350_v7 = vcombine.high %v4346_v51, %v4346_v51 }
 0x812   : > { %6995 = vpow2.f32 %v5532_v27  ;;  %v4362_v0 = vadd.f32 %v4349_v12, %v4288_v15  ;;  %v4431_v43 = vrot.slane %v4417_v24, %v7620_v50  ;;  %v4363_v18 = vadd.f32 %v4332_v38, %v4289_v2 }
 0x813   : > { %6997 = vpow2.f32 %v5533_v35  ;;  %v4432_v10 = vcombine.high %v4424_v31, %v4424_v31  ;;  %v4364_v44 = vadd.f32 %v4346_v51, %v4290_v4  ;;  %v4365_v27 = vadd.f32 %v4348_v16, %v4291_v36 }
 0x814   : > { %6999 = vpow2.f32 %v5534_v61  ;;  %v5536_v34 = vmul.f32 -1.442695, %v4361_v20  ;;  %v4366_v40 = vadd.f32 %v4350_v7, %v4292_v30  ;;  %v5537_v41 = vmul.f32 -1.442695, %v4362_v0 }
 0x815   : > { %v6984_v13 = vpop.eup %6983  ;;  %v4482_v46 = vrot.slane %v8574_v19, 2  ;;  %v5538_v48 = vmul.f32 -1.442695, %v4363_v18  ;;  %v4433_v57 = vcombine.high %v4431_v43, %v4431_v43  ;;  %v4440_v59 = vrot.slane %v4424_v31, %v7620_v50 }
 0x816   : > { %v4253_v1 = vadd.f32 1.0, %v6984_v13  ;;  %v5539_v60 = vmul.f32 -1.442695, %v4364_v44  ;;  %v4483_v13 = vrot.slane %v8579_v56, 2  ;;  %v4454_v38 = vrot.slane %v4432_v10, %v7620_v50 }
 0x817   : > { %v6986_v22 = vpop.eup %6985  ;;  %v5540_v17 = vmul.f32 -1.442695, %v4365_v27  ;;  %v5541_v19 = vmul.f32 -1.442695, %v4366_v40  ;;  %v4486_v51 = vrot.slane %v8588_v58, 2  ;;  %v4447_v12 = vrot.slane %v4431_v43, %v7620_v50 }
 0x818   : > { %v6988_v63 = vpop.eup %6987  ;;  %v4254_v9 = vadd.f32 1.0, %v6986_v22  ;;  %7001 = vrcp.f32 %v4253_v1  ;;  %v4485_v1 = vrot.slane %v8585_v55, 2  ;;  %v4461_v56 = vrot.slane %v4433_v57, %v7620_v50 }
 0x819   : > { %v6990_v28 = vpop.eup %6989  ;;  %v4255_v6 = vadd.f32 1.0, %v6988_v63  ;;  %7003 = vpow2.f32 %v5535_v26  ;;  %v4484_v26 = vrot.slane %v8582_v47, 2  ;;  %v4462_v4 = vcombine.high %v4440_v59, %v4440_v59 }
 0x81a   : > { %v6992_v8 = vpop.eup %6991  ;;  %v4256_v37 = vadd.f32 1.0, %v6990_v28  ;;  %7005 = vrcp.f32 %v4254_v9  ;;  %v4464_v9 = vcombine.high %v4454_v38, %v4454_v38  ;;  %v4487_v30 = vrot.slane %v8593_v29, 2 }
 0x81b   : > { %v6994_v52 = vpop.eup %6993  ;;  %v4257_v14 = vadd.f32 1.0, %v6992_v8  ;;  %7007 = vrcp.f32 %v4255_v6  ;;  %v4488_v58 = vrot.slane %v8596_v5, 2  ;;  %v4489_v16 = vrot.slane %v8603_v33, 2 }
 0x81c   : > { %v6996_v21 = vpop.eup %6995  ;;  %v4258_v32 = vadd.f32 1.0, %v6994_v52  ;;  %7009 = vrcp.f32 %v4256_v37  ;;  %v4463_v7 = vcombine.high %v4447_v12, %v4447_v12  ;;  %v4465_v43 = vcombine.high %v4461_v56, %v4461_v56 }
 0x81d   : > { %v6998_v11 = vpop.eup %6997  ;;  %v4259_v3 = vadd.f32 1.0, %v6996_v21  ;;  %7011 = vrcp.f32 %v4257_v14 }
 0x81e   : > { %v4260_v35 = vadd.f32 1.0, %v6998_v11  ;;  %7013 = vrcp.f32 %v4258_v32  ;;  %v7000_v2 = vpop.eup %6999 }
 0x81f   : > { %7015 = vrcp.f32 %v4259_v3  ;;  %v4391_v36 = vadd.f32 1.0, %v7000_v2 }
 0x820   : > { %7017 = vrcp.f32 %v4260_v35 }
 0x821   : > { %7019 = vpow2.f32 %v5536_v34 }
 0x822   : > { %v7002_v61 = vpop.eup %7001  ;;  %7021 = vpow2.f32 %v5537_v41 }
 0x823   : > { %v7004_v15 = vpop.eup %7003  ;;  %v4474_v22 = vmul.f32 %v7002_v61, %v4440_v59  ;;  %7023 = vpow2.f32 %v5538_v48 }
 0x824   : > { %v7006_v24 = vpop.eup %7005  ;;  %7025 = vpow2.f32 %v5539_v60  ;;  %v4392_v27 = vadd.f32 1.0, %v7004_v15 }
 0x825   : > { %v7008_v63 = vpop.eup %7007  ;;  %v4475_v47 = vmul.f32 %v7006_v24, %v4454_v38  ;;  %v4498_v31 = vadd.f32 %v4482_v46, %v4474_v22  ;;  %7027 = vpow2.f32 %v5540_v17 }
 0x826   : > { %v7010_v55 = vpop.eup %7009  ;;  %v4476_v28 = vmul.f32 %v7008_v63, %v4462_v4  ;;  %7029 = vpow2.f32 %v5541_v19 }
 0x827   : > { %v7012_v6 = vpop.eup %7011  ;;  %v4477_v20 = vmul.f32 %v7010_v55, %v4464_v9  ;;  %v4499_v8 = vadd.f32 %v4483_v13, %v4475_v47  ;;  %7031 = vtanh.f32 %v4498_v31 }
 0x828   : > { %v7014_v37 = vpop.eup %7013  ;;  %v4478_v0 = vmul.f32 %v7012_v6, %v4447_v12  ;;  %v4500_v52 = vadd.f32 %v4484_v26, %v4476_v28  ;;  %7033 = vrcp.f32 %v4391_v36 }
 0x829   : > { %v7016_v14 = vpop.eup %7015  ;;  %v4479_v18 = vmul.f32 %v7014_v37, %v4461_v56  ;;  %v4501_v21 = vadd.f32 %v4485_v1, %v4477_v20  ;;  %7035 = vtanh.f32 %v4499_v8 }
 0x82a   : > { %v7018_v29 = vpop.eup %7017  ;;  %v4480_v5 = vmul.f32 %v7016_v14, %v4463_v7  ;;  %v4502_v32 = vadd.f32 %v4486_v51, %v4478_v0  ;;  %7037 = vtanh.f32 %v4500_v52 }
 0x82b   : > { %v7020_v10 = vpop.eup %7019  ;;  %v4481_v44 = vmul.f32 %v7018_v29, %v4465_v43  ;;  %v4503_v33 = vadd.f32 %v4487_v30, %v4479_v18  ;;  %7039 = vtanh.f32 %v4501_v21 }
 0x82c   : > { %v7022_v11 = vpop.eup %7021  ;;  %v4504_v3 = vadd.f32 %v4488_v58, %v4480_v5  ;;  %7041 = vtanh.f32 %v4502_v32  ;;  %v4393_v40 = vadd.f32 1.0, %v7020_v10 }
 0x82d   : > { %v7024_v34 = vpop.eup %7023  ;;  %v4505_v35 = vadd.f32 %v4489_v16, %v4481_v44  ;;  %7043 = vtanh.f32 %v4503_v33  ;;  %v4394_v46 = vadd.f32 1.0, %v7022_v11 }
 0x82e   : > { %v7026_v41 = vpop.eup %7025  ;;  %7045 = vtanh.f32 %v4504_v3  ;;  %v4395_v57 = vadd.f32 1.0, %v7024_v34 }
 0x82f   : > { %v7028_v48 = vpop.eup %7027  ;;  %7047 = vtanh.f32 %v4505_v35  ;;  %v4396_v60 = vadd.f32 1.0, %v7026_v41 }
 0x830   : > { %v7030_v59 = vpop.eup %7029  ;;  %7049 = vrcp.f32 %v4392_v27  ;;  %v4397_v13 = vadd.f32 1.0, %v7028_v48 }
 0x831   : > { %v7032_v2 = vpop.eup %7031  ;;  %7051 = vrcp.f32 %v4393_v40  ;;  %v4398_v17 = vadd.f32 1.0, %v7030_v59 }
 0x832   : > { %v7034_v38 = vpop.eup %7033  ;;  %7053 = vrcp.f32 %v4394_v46 }
 0x833   : > { %v7036_v61 = vpop.eup %7035  ;;  %7055 = vrcp.f32 %v4395_v57  ;;  %v4514_v26 = vsub.f32 1.0, %v7034_v38  ;;  %v4530_v15 = vmul.f32 %v7034_v38, %v8486_v62 }
 0x834   : > { %v7038_v1 = vpop.eup %7037  ;;  %7057 = vrcp.f32 %v4396_v60 }
 0x835   : > { %v7040_v19 = vpop.eup %7039  ;;  %7059 = vrcp.f32 %v4397_v13  ;;  %v4522_v51 = vmul.f32 %v7032_v2, %v4514_v26 }
 0x836   : > { %v7042_v12 = vpop.eup %7041  ;;  %7061 = vrcp.f32 %v4398_v17 }
 0x837   : > { %v7044_v22 = vpop.eup %7043  ;;  %v8645_v24 = vadd.f32 %v4530_v15, %v4522_v51 }
 0x838   : > { %v7046_v56 = vpop.eup %7045 }
 0x839   : > { %v7048_v4 = vpop.eup %7047  ;;  %4546 = vst [vmem:[%s7349_s25 + $0x6] sm:$0x1] %v8645_v24 }
 0x83a   : > { %v7050_v36 = vpop.eup %7049 }
 0x83b   : > { %v7052_v63 = vpop.eup %7051  ;;  %v4515_v9 = vsub.f32 1.0, %v7050_v36  ;;  %v4531_v62 = vmul.f32 %v7050_v36, %v8493_v23  ;;  %v8714_v36 = vld [vmem:[%s7347_s24 + $0x67] ss:$8 sm:$0x7] }
 0x83c   : > { %v7054_v47 = vpop.eup %7053  ;;  %v4516_v31 = vsub.f32 1.0, %v7052_v63  ;;  %v4532_v20 = vmul.f32 %v7052_v63, %v8496_v42 }
 0x83d   : > { %v7056_v55 = vpop.eup %7055  ;;  %v4517_v30 = vsub.f32 1.0, %v7054_v47  ;;  %v4523_v58 = vmul.f32 %v7036_v61, %v4515_v9  ;;  %v4533_v0 = vmul.f32 %v7054_v47, %v8499_v53 }
 0x83e   : > { %v7058_v28 = vpop.eup %7057  ;;  %v4518_v6 = vsub.f32 1.0, %v7056_v55  ;;  %v4524_v16 = vmul.f32 %v7038_v1, %v4516_v31  ;;  %v4534_v23 = vmul.f32 %v7056_v55, %v8505_v45  ;;  %v8719_v55 = vld [vmem:[%s7347_s24 + $0x7f] ss:$8 sm:$0x7] }
 0x83f   : > { %v7060_v8 = vpop.eup %7059  ;;  %v4519_v37 = vsub.f32 1.0, %v7058_v28  ;;  %v4525_v7 = vmul.f32 %v7040_v19, %v4517_v30  ;;  %v8652_v52 = vadd.f32 %v4531_v62, %v4523_v58  ;;  %v4535_v42 = vmul.f32 %v7058_v28, %v8509_v49  ;;  %v8700_v19 = vld [vmem:[%s7347_s24 + $0x7] ss:$8 sm:$0x7] }
 0x840   : > { %v7062_v14 = vpop.eup %7061  ;;  %v4520_v43 = vsub.f32 1.0, %v7060_v8  ;;  %v4526_v18 = vmul.f32 %v7042_v12, %v4518_v6  ;;  %v8655_v21 = vadd.f32 %v4532_v20, %v4524_v16  ;;  %v4536_v10 = vmul.f32 %v7060_v8, %v8517_v39  ;;  %v8722_v30 = vld [vmem:[%s7347_s24 + $0x97] ss:$8 sm:$0x7] }
 0x841   : > { %v4521_v29 = vsub.f32 1.0, %v7062_v14  ;;  %v4527_v5 = vmul.f32 %v7044_v22, %v4519_v37  ;;  %v8658_v32 = vadd.f32 %v4533_v0, %v4525_v7  ;;  %4547 = vst [vmem:[%s7349_s25 + $0xe] sm:$0x1] %v8652_v52  ;;  %v4537_v44 = vmul.f32 %v7062_v14, %v8521_v25  ;;  %v8705_v22 = vld [vmem:[%s7347_s24 + $0x1f] ss:$8 sm:$0x7] }
 0x842   : > { %v4528_v53 = vmul.f32 %v7046_v56, %v4520_v43  ;;  %v8664_v45 = vadd.f32 %v4534_v23, %v4526_v18  ;;  %4548 = vst [vmem:[%s7349_s25 + $0x16] sm:$0x1] %v8655_v21  ;;  %v4578_v49 = vcombine.low %v8645_v24, %v8652_v52  ;;  %v8708_v56 = vld [vmem:[%s7347_s24 + $0x37] ss:$8 sm:$0x7] }
 0x843   : > { %v4529_v33 = vmul.f32 %v7048_v4, %v4521_v29  ;;  %v8668_v11 = vadd.f32 %v4535_v42, %v4527_v5  ;;  %4549 = vst [vmem:[%s7349_s25 + $0x1e] sm:$0x1] %v8658_v32  ;;  %v4579_v3 = vcombine.low %v8655_v21, %v8658_v32  ;;  %v8711_v4 = vld [vmem:[%s7347_s24 + $0x4f] ss:$8 sm:$0x7] }
 0x844   : > { %v8676_v27 = vadd.f32 %v4536_v10, %v4528_v53  ;;  %4550 = vst [vmem:[%s7349_s25 + $0x26] sm:$0x1] %v8664_v45  ;;  %v4588_v40 = vrot.slane %v4578_v49, %v7620_v50  ;;  %v8729_v8 = vld [vmem:[%s7347_s24 + $0xaf] ss:$8 sm:$0x7]  ;;  %s5572_s24 = sshll.u32 (%p7275_p6), %s7188_s15, 4 }
 0x845   : > { %v8680_v39 = vadd.f32 %v4537_v44, %v4529_v33  ;;  %4551 = vst [vmem:[%s7349_s25 + $0x2e] sm:$0x1] %v8668_v11  ;;  %v4580_v25 = vcombine.low %v8664_v45, %v8668_v11  ;;  %v4595_v34 = vrot.slane %v4579_v3, %v7620_v50  ;;  %v4891_v3 = vrot.slane %v8700_v19, 1  ;;  %s5228_s22 = sadd.s32 (%p7275_p6), %s7184_s14, %s5572_s24 }
 0x846   : > { %4552 = vst [vmem:[%s7349_s25 + $0x36] sm:$0x1] %v8676_v27  ;;  %s5569_s23 = sshll.u32 (%p7275_p6), %s5228_s22, 3 }
 0x847   : > { %4553 = vst [vmem:[%s7349_s25 + $0x3e] sm:$0x1] %v8680_v39  ;;  %v4581_v35 = vcombine.low %v8676_v27, %v8680_v39  ;;  %v4602_v41 = vrot.slane %v4580_v25, %v7620_v50  ;;  %v4610_v48 = vcombine.low %v4588_v40, %v4595_v34  ;;  %s5230_s29 = scalar_lea.vmem (%p7275_p6), %s8826_s3, %s5569_s23 }
 0x849   : > { %v4609_v46 = vrot.slane %v4581_v35, %v7620_v50  ;;  %v4618_v59 = vrot.slane %v4610_v48, %v7620_v50 }
 0x84b   : > { %v4611_v57 = vcombine.low %v4602_v41, %v4609_v46  ;;  %v4892_v41 = vrot.slane %v8705_v22, 1 }
 0x84d   : > { %v4625_v60 = vrot.slane %v4611_v57, %v7620_v50 }
 0x84f   : > { %v4626_v2 = vcombine.low %v4618_v59, %v4625_v60 }
 0x851   : > { %4693 = vmatmul.mubr.f32.vlgmr.msra.gmra.mrb[14].mxu0 %v4626_v2  ;;  %5987 = vmatmul.mubr.f32.vlgmr.msra.gmra.mrb[14].mxu1 %v4626_v2  ;;  %v4893_v2 = vrot.slane %v8708_v56, 1 }
 0x924   : > { %v4694_v13 = vpop.f32.mrb[14].mxu0  ;;  %v4765_v38 = vpop.f32.mrb[14].mxu1 }
 0x925   : > { %v4770_v17 = vcombine.high %v4694_v13, %v4694_v13  ;;  %v4777_v61 = vrot.slane %v4694_v13, %v7620_v50  ;;  %v4696_v26 = vpop.f32.mrb[15].mxu0  ;;  %v5988_v1 = vpop.f32.mrb[15].mxu1  ;;  %v5021_v59 = vadd.f32 %v8619_v54, %v4765_v38  ;;  %v4895_v13 = vrot.slane %v8714_v36, 1 }
 0x926   : > { %v4915_v62 = vrot.slane %v4696_v26, %v7620_v50  ;;  %v4908_v14 = vcombine.high %v4696_v26, %v4696_v26  ;;  %v4896_v54 = vrot.slane %v8719_v55, 1  ;;  %v4897_v38 = vrot.slane %v8722_v30, 1 }
 0x927   : > { %v4784_v15 = vrot.slane %v4770_v17, %v7620_v50  ;;  %v4785_v51 = vcombine.high %v4777_v61, %v4777_v61  ;;  %v4793_v12 = vrot.slane %v4777_v61, %v7620_v50 }
 0x928   : > { %v4923_v33 = vcombine.high %v4915_v62, %v4915_v62  ;;  %v4931_v25 = vrot.slane %v4915_v62, %v7620_v50  ;;  %v4922_v35 = vrot.slane %v4908_v14, %v7620_v50 }
 0x929   : > { %v4786_v63 = vcombine.high %v4784_v15, %v4784_v15  ;;  %v4800_v9 = vrot.slane %v4784_v15, %v7620_v50  ;;  %v4807_v47 = vrot.slane %v4785_v51, %v7620_v50  ;;  %v4815_v31 = vcombine.high %v4793_v12, %v4793_v12 }
 0x92a   : > { %v4827_v58 = vadd.f32 %v8700_v19, %v4793_v12  ;;  %v4945_v46 = vrot.slane %v4923_v33, %v7620_v50  ;;  %v4965_v48 = vadd.f32 %v4931_v25, %v4891_v3  ;;  %v4924_v57 = vcombine.high %v4922_v35, %v4922_v35 }
 0x92b   : > { %v4814_v28 = vrot.slane %v4786_v63, %v7620_v50  ;;  %v4816_v6 = vcombine.high %v4800_v9, %v4800_v9  ;;  %v4817_v16 = vcombine.high %v4807_v47, %v4807_v47  ;;  %v4828_v20 = vadd.f32 %v8705_v22, %v4807_v47 }
 0x92c   : > { %v4829_v37 = vadd.f32 %v8708_v56, %v4815_v31  ;;  %v4831_v7 = vadd.f32 %v8714_v36, %v4800_v9  ;;  %v5550_v0 = vmul.f32 -1.442695, %v4827_v58  ;;  %v4966_v60 = vadd.f32 %v4945_v46, %v4892_v41 }
 0x92d   : > { %v4818_v43 = vcombine.high %v4814_v28, %v4814_v28  ;;  %v4830_v18 = vadd.f32 %v8711_v4, %v4817_v16  ;;  %v4832_v23 = vadd.f32 %v8719_v55, %v4814_v28  ;;  %v4833_v29 = vadd.f32 %v8722_v30, %v4816_v6 }
 0x92e   : > { %7063 = vpow2.f32 %v5550_v0  ;;  %v5551_v5 = vmul.f32 -1.442695, %v4828_v20  ;;  %v5552_v42 = vmul.f32 -1.442695, %v4829_v37  ;;  %v5554_v44 = vmul.f32 -1.442695, %v4831_v7 }
 0x92f   : > { %v4834_v53 = vadd.f32 %v8729_v8, %v4818_v43  ;;  %v5553_v10 = vmul.f32 -1.442695, %v4830_v18  ;;  %v5555_v49 = vmul.f32 -1.442695, %v4832_v23  ;;  %v5556_v34 = vmul.f32 -1.442695, %v4833_v29 }
 0x930   : > { %7065 = vpow2.f32 %v5551_v5  ;;  %v4938_v61 = vrot.slane %v4922_v35, %v7620_v50  ;;  %v4953_v26 = vcombine.high %v4931_v25, %v4931_v25  ;;  %v5558_v1 = vmul.f32 -1.442695, %v4965_v48 }
 0x931   : > { %7067 = vpow2.f32 %v5552_v42  ;;  %v5557_v40 = vmul.f32 -1.442695, %v4834_v53  ;;  %v5559_v15 = vmul.f32 -1.442695, %v4966_v60  ;;  %v4894_v12 = vrot.slane %v8711_v4, 1 }
 0x932   : > { %7069 = vpow2.f32 %v5553_v10  ;;  %v4952_v63 = vrot.slane %v4924_v57, %v7620_v50  ;;  %v4955_v9 = vcombine.high %v4945_v46, %v4945_v46  ;;  %v5023_v31 = vcombine.high %v5021_v59, %v5021_v59 }
 0x933   : > { %7071 = vpow2.f32 %v5554_v44  ;;  %v5030_v28 = vrot.slane %v5021_v59, %v7620_v50  ;;  %v4898_v6 = vrot.slane %v8729_v8, 1  ;;  %v4954_v37 = vcombine.high %v4938_v61, %v4938_v61 }
 0x934   : > { %7073 = vpow2.f32 %v5555_v49  ;;  %v4967_v7 = vadd.f32 %v4953_v26, %v4893_v2  ;;  %v4956_v43 = vcombine.high %v4952_v63, %v4952_v63  ;;  %v4968_v18 = vadd.f32 %v4955_v9, %v4894_v12 }
 0x935   : > { %7075 = vpow2.f32 %v5556_v34  ;;  %v5037_v5 = vrot.slane %v5023_v31, %v7620_v50  ;;  %v4969_v42 = vadd.f32 %v4938_v61, %v4895_v13  ;;  %v5038_v44 = vcombine.high %v5030_v28, %v5030_v28 }
 0x936   : > { %7077 = vpow2.f32 %v5557_v40  ;;  %v4970_v33 = vadd.f32 %v4952_v63, %v4896_v54  ;;  %v4971_v25 = vadd.f32 %v4954_v37, %v4897_v38  ;;  %v5560_v34 = vmul.f32 -1.442695, %v4967_v7 }
 0x937   : > { %7079 = vpow2.f32 %v5558_v1  ;;  %v4972_v40 = vadd.f32 %v4956_v43, %v4898_v6  ;;  %v5561_v41 = vmul.f32 -1.442695, %v4968_v18  ;;  %v5088_v46 = vrot.slane %v8700_v19, 2 }
 0x938   : > { %v7064_v17 = vpop.eup %7063  ;;  %v5562_v48 = vmul.f32 -1.442695, %v4969_v42  ;;  %v5039_v57 = vcombine.high %v5037_v5, %v5037_v5  ;;  %v5046_v59 = vrot.slane %v5030_v28, %v7620_v50  ;;  %v5563_v60 = vmul.f32 -1.442695, %v4970_v33 }
 0x939   : > { %v4859_v51 = vadd.f32 1.0, %v7064_v17  ;;  %v5089_v13 = vrot.slane %v8705_v22, 2  ;;  %v5060_v17 = vrot.slane %v5038_v44, %v7620_v50  ;;  %v5564_v61 = vmul.f32 -1.442695, %v4971_v25 }
 0x93a   : > { %v7066_v47 = vpop.eup %7065  ;;  %v5090_v1 = vrot.slane %v8708_v56, 2  ;;  %v5565_v19 = vmul.f32 -1.442695, %v4972_v40  ;;  %v5092_v12 = vrot.slane %v8714_v36, 2  ;;  %v5053_v63 = vrot.slane %v5037_v5, %v7620_v50 }
 0x93b   : > { %v7068_v58 = vpop.eup %7067  ;;  %v4860_v62 = vadd.f32 1.0, %v7066_v47  ;;  %7081 = vrcp.f32 %v4859_v51  ;;  %v5067_v22 = vrot.slane %v5039_v57, %v7620_v50  ;;  %v5068_v31 = vcombine.high %v5046_v59, %v5046_v59 }
 0x93c   : > { %v7070_v16 = vpop.eup %7069  ;;  %v4861_v20 = vadd.f32 1.0, %v7068_v58  ;;  %7083 = vpow2.f32 %v5559_v15  ;;  %v5091_v15 = vrot.slane %v8711_v4, 2  ;;  %v5070_v58 = vcombine.high %v5060_v17, %v5060_v17 }
 0x93d   : > { %v7072_v0 = vpop.eup %7071  ;;  %v4862_v14 = vadd.f32 1.0, %v7070_v16  ;;  %7085 = vrcp.f32 %v4860_v62  ;;  %v5093_v28 = vrot.slane %v8719_v55, 2  ;;  %v5094_v36 = vrot.slane %v8722_v30, 2 }
 0x93e   : > { %v7074_v23 = vpop.eup %7073  ;;  %v4863_v29 = vadd.f32 1.0, %v7072_v0  ;;  %7087 = vrcp.f32 %v4861_v20  ;;  %v5095_v20 = vrot.slane %v8729_v8, 2 }
 0x93f   : > { %v7076_v53 = vpop.eup %7075  ;;  %v4864_v10 = vadd.f32 1.0, %v7074_v23  ;;  %7089 = vrcp.f32 %v4862_v14  ;;  %v5069_v14 = vcombine.high %v5053_v63, %v5053_v63 }
 0x940   : > { %v7078_v49 = vpop.eup %7077  ;;  %v4865_v3 = vadd.f32 1.0, %v7076_v53  ;;  %7091 = vrcp.f32 %v4863_v29  ;;  %v5071_v29 = vcombine.high %v5067_v22, %v5067_v22 }
 0x941   : > { %v4866_v35 = vadd.f32 1.0, %v7078_v49  ;;  %7093 = vrcp.f32 %v4864_v10  ;;  %v7080_v2 = vpop.eup %7079 }
 0x942   : > { %7095 = vrcp.f32 %v4865_v3  ;;  %v4997_v54 = vadd.f32 1.0, %v7080_v2 }
 0x943   : > { %7097 = vrcp.f32 %v4866_v35 }
 0x944   : > { %7099 = vpow2.f32 %v5560_v34 }
 0x945   : > { %v7082_v26 = vpop.eup %7081  ;;  %7101 = vpow2.f32 %v5561_v41 }
 0x946   : > { %v7084_v51 = vpop.eup %7083  ;;  %v5080_v9 = vmul.f32 %v7082_v26, %v5046_v59  ;;  %7103 = vpow2.f32 %v5562_v48 }
 0x947   : > { %v7086_v47 = vpop.eup %7085  ;;  %7105 = vpow2.f32 %v5563_v60  ;;  %v4998_v3 = vadd.f32 1.0, %v7084_v51 }
 0x948   : > { %v7088_v38 = vpop.eup %7087  ;;  %v5081_v56 = vmul.f32 %v7086_v47, %v5060_v17  ;;  %v5104_v62 = vadd.f32 %v5088_v46, %v5080_v9  ;;  %7107 = vpow2.f32 %v5564_v61 }
 0x949   : > { %v7090_v4 = vpop.eup %7089  ;;  %v5082_v6 = vmul.f32 %v7088_v38, %v5068_v31  ;;  %7109 = vpow2.f32 %v5565_v19 }
 0x94a   : > { %v7092_v16 = vpop.eup %7091  ;;  %v5083_v37 = vmul.f32 %v7090_v4, %v5070_v58  ;;  %v5105_v7 = vadd.f32 %v5089_v13, %v5081_v56  ;;  %7111 = vtanh.f32 %v5104_v62 }
 0x94b   : > { %v7094_v0 = vpop.eup %7093  ;;  %v5084_v43 = vmul.f32 %v7092_v16, %v5053_v63  ;;  %v5106_v18 = vadd.f32 %v5090_v1, %v5082_v6  ;;  %7113 = vrcp.f32 %v4997_v54 }
 0x94c   : > { %v7096_v23 = vpop.eup %7095  ;;  %v5085_v5 = vmul.f32 %v7094_v0, %v5067_v22  ;;  %v5107_v42 = vadd.f32 %v5091_v15, %v5083_v37  ;;  %7115 = vtanh.f32 %v5105_v7 }
 0x94d   : > { %v7098_v55 = vpop.eup %7097  ;;  %v5086_v30 = vmul.f32 %v7096_v23, %v5069_v14  ;;  %v5108_v53 = vadd.f32 %v5092_v12, %v5084_v43  ;;  %7117 = vtanh.f32 %v5106_v18 }
 0x94e   : > { %v7100_v10 = vpop.eup %7099  ;;  %v5087_v44 = vmul.f32 %v7098_v55, %v5071_v29  ;;  %v5109_v8 = vadd.f32 %v5093_v28, %v5085_v5  ;;  %7119 = vtanh.f32 %v5107_v42 }
 0x94f   : > { %v7102_v33 = vpop.eup %7101  ;;  %v5110_v49 = vadd.f32 %v5094_v36, %v5086_v30  ;;  %7121 = vtanh.f32 %v5108_v53  ;;  %v4999_v35 = vadd.f32 1.0, %v7100_v10 }
 0x950   : > { %v7104_v25 = vpop.eup %7103  ;;  %v5111_v34 = vadd.f32 %v5095_v20, %v5087_v44  ;;  %7123 = vtanh.f32 %v5109_v8  ;;  %v5000_v41 = vadd.f32 1.0, %v7102_v33 }
 0x951   : > { %v7106_v40 = vpop.eup %7105  ;;  %7125 = vtanh.f32 %v5110_v49  ;;  %v5001_v48 = vadd.f32 1.0, %v7104_v25 }
 0x952   : > { %v7108_v46 = vpop.eup %7107  ;;  %7127 = vtanh.f32 %v5111_v34  ;;  %v5002_v59 = vadd.f32 1.0, %v7106_v40 }
 0x953   : > { %v7110_v57 = vpop.eup %7109  ;;  %7129 = vrcp.f32 %v4998_v3  ;;  %v5003_v2 = vadd.f32 1.0, %v7108_v46 }
 0x954   : > { %v7112_v60 = vpop.eup %7111  ;;  %7131 = vrcp.f32 %v4999_v35  ;;  %v5004_v17 = vadd.f32 1.0, %v7110_v57 }
 0x955   : > { %v7114_v13 = vpop.eup %7113  ;;  %7133 = vrcp.f32 %v5000_v41 }
 0x956   : > { %v7116_v61 = vpop.eup %7115  ;;  %7135 = vrcp.f32 %v5001_v48  ;;  %v5120_v26 = vsub.f32 1.0, %v7114_v13  ;;  %v5136_v51 = vmul.f32 %v7114_v13, %v8645_v24 }
 0x957   : > { %v7118_v1 = vpop.eup %7117  ;;  %7137 = vrcp.f32 %v5002_v59 }
 0x958   : > { %v7120_v15 = vpop.eup %7119  ;;  %7139 = vrcp.f32 %v5003_v2  ;;  %v5128_v19 = vmul.f32 %v7112_v60, %v5120_v26 }
 0x959   : > { %v7122_v12 = vpop.eup %7121  ;;  %7141 = vrcp.f32 %v5004_v17 }
 0x95a   : > { %v7124_v63 = vpop.eup %7123  ;;  %v5144_v9 = vadd.f32 %v5136_v51, %v5128_v19 }
 0x95b   : > { %v7126_v47 = vpop.eup %7125 }
 0x95c   : > { %v7128_v22 = vpop.eup %7127  ;;  %5152 = vst [vmem:[%s7349_s25 + $0x7] sm:$0x1] %v5144_v9 }
 0x95d   : > { %v7130_v31 = vpop.eup %7129 }
 0x95e   : > { %v7132_v54 = vpop.eup %7131  ;;  %v5121_v38 = vsub.f32 1.0, %v7130_v31  ;;  %v5137_v36 = vmul.f32 %v7130_v31, %v8652_v52 }
 0x95f   : > { %v7134_v58 = vpop.eup %7133  ;;  %v5122_v56 = vsub.f32 1.0, %v7132_v54  ;;  %v5138_v20 = vmul.f32 %v7132_v54, %v8655_v21 }
 0x960   : > { %v7136_v62 = vpop.eup %7135  ;;  %v5123_v4 = vsub.f32 1.0, %v7134_v58  ;;  %v5129_v28 = vmul.f32 %v7116_v61, %v5121_v38  ;;  %v5139_v14 = vmul.f32 %v7134_v58, %v8658_v32 }
 0x961   : > { %v7138_v6 = vpop.eup %7137  ;;  %v5124_v16 = vsub.f32 1.0, %v7136_v62  ;;  %v5130_v24 = vmul.f32 %v7118_v1, %v5122_v56  ;;  %v5140_v5 = vmul.f32 %v7136_v62, %v8664_v45 }
 0x962   : > { %v7140_v37 = vpop.eup %7139  ;;  %v5125_v7 = vsub.f32 1.0, %v7138_v6  ;;  %v5131_v0 = vmul.f32 %v7120_v15, %v5123_v4  ;;  %v5145_v43 = vadd.f32 %v5137_v36, %v5129_v28  ;;  %v5141_v30 = vmul.f32 %v7138_v6, %v8668_v11 }
 0x963   : > { %v7142_v18 = vpop.eup %7141  ;;  %v5126_v23 = vsub.f32 1.0, %v7140_v37  ;;  %v5132_v29 = vmul.f32 %v7122_v12, %v5124_v16  ;;  %v5146_v52 = vadd.f32 %v5138_v20, %v5130_v24  ;;  %v5142_v10 = vmul.f32 %v7140_v37, %v8676_v27  ;;  %v5272_v60 = vld [vmem:[%s7349_s25] sm:$0xff] (%p7275_p6) }
 0x964   : > { %v5127_v42 = vsub.f32 1.0, %v7142_v18  ;;  %v5133_v55 = vmul.f32 %v7124_v63, %v5125_v7  ;;  %v5147_v21 = vadd.f32 %v5139_v14, %v5131_v0  ;;  %5153 = vst [vmem:[%s7349_s25 + $0xf] sm:$0x1] %v5145_v43  ;;  %v5168_v44 = vcombine.low %v5144_v9, %v5145_v43  ;;  %5273 = vst [vmem:[%s5230_s29] sm:$0xff] (%p7275_p6), %v5272_v60 }
 0x965   : > { %v5134_v53 = vmul.f32 %v7126_v47, %v5126_v23  ;;  %v5148_v32 = vadd.f32 %v5140_v5, %v5132_v29  ;;  %5154 = vst [vmem:[%s7349_s25 + $0x17] sm:$0x1] %v5146_v52  ;;  %v5143_v45 = vmul.f32 %v7142_v18, %v8680_v39 }
 0x966   : > { %v5135_v8 = vmul.f32 %v7128_v22, %v5127_v42  ;;  %v5149_v33 = vadd.f32 %v5141_v30, %v5133_v55  ;;  %5155 = vst [vmem:[%s7349_s25 + $0x1f] sm:$0x1] %v5147_v21  ;;  %v5169_v49 = vcombine.low %v5146_v52, %v5147_v21  ;;  %v5178_v34 = vrot.slane %v5168_v44, %v7620_v50 }
 0x967   : > { %v5150_v3 = vadd.f32 %v5142_v10, %v5134_v53  ;;  %5156 = vst [vmem:[%s7349_s25 + $0x27] sm:$0x1] %v5148_v32 }
 0x968   : > { %v5151_v11 = vadd.f32 %v5143_v45, %v5135_v8  ;;  %5157 = vst [vmem:[%s7349_s25 + $0x2f] sm:$0x1] %v5149_v33  ;;  %v5170_v25 = vcombine.low %v5148_v32, %v5149_v33  ;;  %v5185_v27 = vrot.slane %v5169_v49, %v7620_v50 }
 0x969   : > { %5158 = vst [vmem:[%s7349_s25 + $0x37] sm:$0x1] %v5150_v3 }
 0x96a   : > { %5159 = vst [vmem:[%s7349_s25 + $0x3f] sm:$0x1] %v5151_v11  ;;  %v5171_v35 = vcombine.low %v5150_v3, %v5151_v11  ;;  %v5200_v40 = vcombine.low %v5178_v34, %v5185_v27  ;;  %v5192_v41 = vrot.slane %v5170_v25, %v7620_v50 }
 0x96b   : > { %v5274_v2 = vld [vmem:[%s7349_s25 + $0x8] sm:$0xff] (%p7275_p6) }
 0x96c   : > { %v5199_v39 = vrot.slane %v5171_v35, %v7620_v50  ;;  %v5208_v48 = vrot.slane %v5200_v40, %v7620_v50  ;;  %v5276_v13 = vld [vmem:[%s7349_s25 + $0x10] sm:$0xff] (%p7275_p6)  ;;  %5275 = vst [vmem:[%s5230_s29 + $0x10] sm:$0xff] (%p7275_p6), %v5274_v2 }
 0x96d   : > { %5277 = vst [vmem:[%s5230_s29 + $0x20] sm:$0xff] (%p7275_p6), %v5276_v13 }
 0x96e   : > { %v5201_v46 = vcombine.low %v5192_v41, %v5199_v39  ;;  %5225 = sbr.rel (!%p7275_p6) target bundleno = 2421 (0x975), region = 63  ;;  %v5280_v17 = vld [vmem:[%s7349_s25 + $0x20] sm:$0xff] (%p7275_p6) }
 0x96f   : > { %v5282_v61 = vld [vmem:[%s7349_s25 + $0x28] sm:$0xff] (%p7275_p6)  ;;  %5281 = vst [vmem:[%s5230_s29 + $0x40] sm:$0xff] (%p7275_p6), %v5280_v17 }
 0x970   : > { %v5215_v57 = vrot.slane %v5201_v46, %v7620_v50  ;;  %v5278_v50 = vld [vmem:[%s7349_s25 + $0x18] sm:$0xff] (%p7275_p6)  ;;  %v5284_v26 = vld [vmem:[%s7349_s25 + $0x30] sm:$0xff] (%p7275_p6)  ;;  %5283 = vst [vmem:[%s5230_s29 + $0x50] sm:$0xff] (%p7275_p6), %v5282_v61 }
 0x971   : > { %v5286_v1 = vld [vmem:[%s7349_s25 + $0x38] sm:$0xff] (%p7275_p6)  ;;  %5279 = vst [vmem:[%s5230_s29 + $0x30] sm:$0xff] (%p7275_p6), %v5278_v50  ;;  %5285 = vst [vmem:[%s5230_s29 + $0x60] sm:$0xff] (%p7275_p6), %v5284_v26 }
 0x972   : > { %v5216_v59 = vcombine.low %v5208_v48, %v5215_v57  ;;  %5287 = vst [vmem:[%s5230_s29 + $0x70] sm:$0xff] (%p7275_p6), %v5286_v1 }
 0x974   : > { %5218 = vst [vmem:[#allocation2] sm:$0xff] %v5216_v59 }
 0x975 PF: > { %s13_s18 = sadd.s32 1, %s7200_s18   ;;  %s8929_s12 = smov %s7180_s13 }
 0x976   : > { %p10_p13 = scmp.ge.s32.totalorder %s13_s18, 6   ;;  %s8930_s13 = smov %s7283_s27 }
 0x977   : > { %s8931_s14 = smov %s7192_s16  ;;  %s8932_s15 = smov %s7196_s17 }
 0x978   : > { %s8933_s16 = smov %s8936_s19  ;;  %s8934_s17 = smov %s8940_s20 }
 0x979   :  { %12 = sbr.rel (!%p10_p13) target bundleno = 4 (0x4), region = 195 }

</bundles_post_ra>
